<compile_context>
chip_gen: v5e
topology: v5e:2x2
jax: 0.10.0
libtpu: 0.0.40
codegen_flags: <defaults>
</compile_context>

<pallas_src>
import math
import functools

import jax
import jax.numpy as jnp
from jax import lax
from jax.experimental import pallas as pl
from jax.experimental.pallas import tpu as pltpu


def _round_up(x, m):
    return ((x + m - 1) // m) * m


def _pick_vmem_limit_bytes():
    # Explicit scoped-VMEM budget (review item). Conservative cap so it is safe
    # on v5e/v6e (128 MiB physical) and v7x (64 MiB physical per TC).
    try:
        cap = int(pltpu.get_tpu_info().vmem_capacity_bytes)
        return min(cap * 3 // 4, 96 * 1024 * 1024)
    except Exception:
        return 48 * 1024 * 1024


_VMEM_LIMIT_BYTES = _pick_vmem_limit_bytes()


def _const_spec(*shape):
    """Grid-invariant (weight / bias) BlockSpec, single-buffered to halve VMEM."""
    index_map = lambda *_: (0,) * len(shape)
    try:
        return pl.BlockSpec(shape, index_map, pipeline_mode=pl.Buffered(1))
    except Exception:        # older jax without pipeline_mode / Buffered
        return pl.BlockSpec(shape, index_map)


# ----------------------------------------------------------------------------
# Decoder-layer kernel: one grid step == one batch element.
# Fused lane-aligned QKV projection, fori_loop over H heads (128-aligned lane
# slices from a VMEM scratch), mean over heads, residual + LN1, FFN, residual
# + LN2.
# ----------------------------------------------------------------------------
def decoder_layer_kernel(padr_ref, padc_ref, x_ref,
                         qkvw_ref, qkvb_ref,
                         ln1g_ref, ln1b_ref, ln2g_ref, ln2b_ref,
                         w1_ref, b1_ref, w2_ref, b2_ref,
                         o_ref, qkv_scr,
                         *, num_heads, key_dim, key_pad):
    x = x_ref[0]                                    # [S, E] f32
    S, E = x.shape
    H, Kp = num_heads, key_pad
    HKp = H * Kp

    # ---- causal + padding mask built in-kernel (no [S,S] HBM traffic) ------
    row = lax.broadcasted_iota(jnp.int32, (S, S), 0)
    col = lax.broadcasted_iota(jnp.int32, (S, S), 1)
    causal = (col > row).astype(jnp.int32)                       # strictly upper
    mask = (causal + padr_ref[0] + padc_ref[0]) > 0              # [S, S] bool
    fully_masked = jnp.all(mask, axis=-1, keepdims=True)         # [S, 1]

    # One additive -inf bias + per-row scale precomputed OUTSIDE the head loop.
    # Fully masked (all-pad) query rows get scale 0 and bias 0 -> scores become
    # exactly 0 -> uniform softmax (matches the PyTorch reference semantics).
    bias = jnp.where(jnp.logical_and(mask, jnp.logical_not(fully_masked)),
                     jnp.float32(-jnp.inf), jnp.float32(0.0))    # [S, S]
    row_scale = jnp.where(fully_masked, jnp.float32(0.0),
                          jnp.float32(1.0 / math.sqrt(key_dim)))  # [S, 1]

    # ---- fused, lane-aligned QKV projection -> bf16 VMEM scratch -----------
    qkv_scr[...] = (jnp.dot(x.astype(jnp.bfloat16), qkvw_ref[...],
                            preferred_element_type=jnp.float32)
                    + qkvb_ref[...]).astype(jnp.bfloat16)

    def head_body(h, acc):
        qoff = pl.multiple_of(h * Kp, 128)
        koff = pl.multiple_of(HKp + h * Kp, 128)
        voff = 2 * HKp + h * E
        if E % 128 == 0:
            voff = pl.multiple_of(voff, 128)
        q = qkv_scr[:, pl.ds(qoff, Kp)]              # [S, Kp] bf16 (pad lanes 0)
        k = qkv_scr[:, pl.ds(koff, Kp)]              # [S, Kp] bf16 (pad lanes 0)
        v = qkv_scr[:, pl.ds(voff, E)]               # [S, E ] bf16

        # q @ k^T with transposed-RHS contraction (no materialized transpose).
        s = lax.dot_general(q, k, (((1,), (1,)), ((), ())),
                            preferred_element_type=jnp.float32)
        s = s * row_scale + bias
        m = jnp.max(s, axis=-1, keepdims=True)
        e = jnp.exp(s - m)
        attn = e * pl.reciprocal(jnp.sum(e, axis=-1, keepdims=True), approx=True)
        return acc + jnp.dot(attn.astype(jnp.bfloat16), v,
                             preferred_element_type=jnp.float32)

    acc = lax.fori_loop(0, H, head_body, jnp.zeros((S, E), jnp.float32),
                        unroll=H <= 4)
    acc = acc * jnp.float32(1.0 / H)

    def layer_norm(y, g, b):
        mu = jnp.mean(y, axis=-1, keepdims=True)
        var = jnp.mean((y - mu) ** 2, axis=-1, keepdims=True)
        return (y - mu) * lax.rsqrt(var + 1e-5) * g + b

    h1 = layer_norm(x + acc, ln1g_ref[...], ln1b_ref[...])

    ff = jnp.dot(h1.astype(jnp.bfloat16), w1_ref[...],
                 preferred_element_type=jnp.float32) + b1_ref[...]
    ff = jnp.maximum(ff, 0.0)
    ff = jnp.dot(ff.astype(jnp.bfloat16), w2_ref[...],
                 preferred_element_type=jnp.float32) + b2_ref[...]

    o_ref[0] = layer_norm(h1 + ff, ln2g_ref[...], ln2b_ref[...])


def decoder_layer(x, pad_row, pad_col, lp, *, num_heads, key_dim, key_pad):
    B, S, E = x.shape
    P = lp["qkvw"].shape[1]
    F = lp["w1"].shape[1]

    per_batch = lambda *shape: pl.BlockSpec((1,) + shape, lambda b: (b, 0, 0))

    kernel = functools.partial(decoder_layer_kernel, num_heads=num_heads,
                               key_dim=key_dim, key_pad=key_pad)

    return pl.pallas_call(
        kernel,
        out_shape=jax.ShapeDtypeStruct((B, S, E), jnp.float32),
        grid=(B,),
        in_specs=[
            per_batch(S, 1),                  # pad mask (query rows)
            per_batch(1, S),                  # pad mask (key cols)
            per_batch(S, E),                  # x
            _const_spec(E, P), _const_spec(1, P),   # fused QKV weight / bias
            _const_spec(1, E), _const_spec(1, E),   # LN1
            _const_spec(1, E), _const_spec(1, E),   # LN2
            _const_spec(E, F), _const_spec(1, F),   # FF1
            _const_spec(F, E), _const_spec(1, E),   # FF2
        ],
        out_specs=per_batch(S, E),
        scratch_shapes=[pltpu.VMEM((S, P), jnp.bfloat16)],
        compiler_params=pltpu.CompilerParams(
            dimension_semantics=("parallel",),
            vmem_limit_bytes=_VMEM_LIMIT_BYTES),
    )(pad_row, pad_col, x,
      lp["qkvw"], lp["qkvb"],
      lp["ln1g"], lp["ln1b"], lp["ln2g"], lp["ln2b"],
      lp["w1"], lp["b1"], lp["w2"], lp["b2"])


# ----------------------------------------------------------------------------
# Output projection: [B*S, E] @ [E, V] + b, tiled over vocab only so the
# weight is streamed exactly once (activations are grid-invariant, bf16).
# ----------------------------------------------------------------------------
def proj_kernel(x_ref, w_ref, b_ref, o_ref):
    o_ref[...] = (jnp.dot(x_ref[...], w_ref[...],
                          preferred_element_type=jnp.float32) + b_ref[...])


def _vocab_tile(v):
    for tv in (1024, 512, 256, 128):
        if v % tv == 0:
            return tv
    return v            # tiny / non-128-multiple vocab: single tile


def output_projection(x, w, b):
    B, S, E = x.shape
    V = w.shape[1]
    M = B * S
    tv = _vocab_tile(V)
    x2 = x.reshape(M, E).astype(jnp.bfloat16)
    # TODO(synk): tile the M axis as well once B*S*E exceeds the VMEM budget.
    out = pl.pallas_call(
        proj_kernel,
        out_shape=jax.ShapeDtypeStruct((M, V), jnp.float32),
        grid=(V // tv,),
        in_specs=[
            pl.BlockSpec((M, E), lambda j: (0, 0)),     # invariant activations
            pl.BlockSpec((E, tv), lambda j: (0, j)),    # weight: streamed once
            pl.BlockSpec((1, tv), lambda j: (0, j)),
        ],
        out_specs=pl.BlockSpec((M, tv), lambda j: (0, j)),
        compiler_params=pltpu.CompilerParams(
            dimension_semantics=("parallel",),
            vmem_limit_bytes=_VMEM_LIMIT_BYTES),
    )(x2, w, b)
    return out.reshape(B, S, V)


# ----------------------------------------------------------------------------
# Parameter construction & full forward pass (glue in plain JAX).
# ----------------------------------------------------------------------------
def positional_encoding(seq_len, d_model):
    position = jnp.arange(seq_len, dtype=jnp.float32)[:, None]
    div_term = jnp.exp(jnp.arange(0, d_model, 2, dtype=jnp.float32)
                       * (-math.log(10000.0) / d_model))
    pe = jnp.zeros((seq_len, d_model), jnp.float32)
    pe = pe.at[:, 0::2].set(jnp.sin(position * div_term))
    pe = pe.at[:, 1::2].set(jnp.cos(position * div_term))
    return pe


def init_params(key, *, embedding_size, vocab_size, seq_len,
                num_attention_heads, num_layers, ff_size=None):
    E = embedding_size
    H = num_attention_heads
    Kd = E // H
    Kp = _round_up(Kd, 128)          # lane-aligned per-head Q/K width
    F = ff_size or 4 * E
    P = 2 * H * Kp + H * E           # [Q_0..Q_{H-1} | K_0..K_{H-1} | V_0..V_{H-1}]
    keys = jax.random.split(key, 2 + num_layers)

    params = {
        "emb": jax.random.normal(keys[0], (vocab_size, E), jnp.float32) * (E ** -0.5),
        "pe": positional_encoding(seq_len, E),
        "wout": (jax.random.normal(keys[1], (E, vocab_size), jnp.float32)
                 * 0.02).astype(jnp.bfloat16),
        "bout": jnp.zeros((1, vocab_size), jnp.float32),
        "layers": [],
    }
    for l in range(num_layers):
        ks = jax.random.split(keys[2 + l], 3 * H + 2)
        qkvw = jnp.zeros((E, P), jnp.float32)
        for h in range(H):
            wq = jax.random.normal(ks[3 * h + 0], (E, Kd), jnp.float32) * 0.02
            wk = jax.random.normal(ks[3 * h + 1], (E, Kd), jnp.float32) * 0.02
            wv = jax.random.normal(ks[3 * h + 2], (E, E), jnp.float32) * 0.02
            qkvw = qkvw.at[:, h * Kp: h * Kp + Kd].set(wq)
            qkvw = qkvw.at[:, H * Kp + h * Kp: H * Kp + h * Kp + Kd].set(wk)
            qkvw = qkvw.at[:, 2 * H * Kp + h * E: 2 * H * Kp + (h + 1) * E].set(wv)
        params["layers"].append({
            "qkvw": qkvw.astype(jnp.bfloat16),
            "qkvb": jnp.zeros((1, P), jnp.float32),
            "ln1g": jnp.ones((1, E), jnp.float32), "ln1b": jnp.zeros((1, E), jnp.float32),
            "ln2g": jnp.ones((1, E), jnp.float32), "ln2b": jnp.zeros((1, E), jnp.float32),
            "w1": (jax.random.normal(ks[3 * H], (E, F), jnp.float32)
                   * 0.02).astype(jnp.bfloat16),
            "b1": jnp.zeros((1, F), jnp.float32),
            "w2": (jax.random.normal(ks[3 * H + 1], (F, E), jnp.float32)
                   * 0.02).astype(jnp.bfloat16),
            "b2": jnp.zeros((1, E), jnp.float32),
        })
    return params


@functools.partial(jax.jit, static_argnames=("pad_token_id", "num_heads"))
def transformer_forward(token_ids, params, pad_token_id, num_heads):
    B, S = token_ids.shape
    E = params["emb"].shape[1]
    Kd = E // num_heads
    Kp = _round_up(Kd, 128)

    pad = (token_ids == pad_token_id).astype(jnp.int32)          # [B, S]
    pad_row = pad[:, :, None]                                    # [B, S, 1]
    pad_col = pad[:, None, :]                                    # [B, 1, S]

    # TODO(synk): embedding gather + positional add stay in plain JAX
    # (table lookup has no tidy BlockSpec form at this size).
    x = params["emb"][token_ids] + params["pe"][None]            # [B, S, E] f32

    for lp in params["layers"]:
        x = decoder_layer(x, pad_row, pad_col, lp,
                          num_heads=num_heads, key_dim=Kd, key_pad=Kp)

    return output_projection(x, params["wout"], params["bout"])  # [B, S, V]


# ----------------------------------------------------------------------------
# Pure-JAX reference (same math, same bf16 matmul casts) for a spot-check.
# ----------------------------------------------------------------------------
def _mm(a, b):
    return jnp.einsum("...ij,jk->...ik",
                      a.astype(jnp.bfloat16), b.astype(jnp.bfloat16),
                      preferred_element_type=jnp.float32)


def reference_forward(token_ids, params, pad_token_id, num_heads):
    B, S = token_ids.shape
    E = params["emb"].shape[1]
    Kd = E // num_heads
    Kp = _round_up(Kd, 128)
    HKp = num_heads * Kp

    pad = token_ids == pad_token_id
    x = params["emb"][token_ids] + params["pe"][None]
    causal = jnp.triu(jnp.ones((S, S), dtype=bool), k=1)
    mask = causal[None] | pad[:, None, :] | pad[:, :, None]
    fully_masked = jnp.all(mask, -1, keepdims=True)

    def ln(y, g, b):
        mu = jnp.mean(y, -1, keepdims=True)
        var = jnp.mean((y - mu) ** 2, -1, keepdims=True)
        return (y - mu) * lax.rsqrt(var + 1e-5) * g + b

    for lp in params["layers"]:
        qkv = _mm(x, lp["qkvw"]) + lp["qkvb"]
        acc = jnp.zeros_like(x)
        for h in range(num_heads):
            q = qkv[..., h * Kp: h * Kp + Kd]
            k = qkv[..., HKp + h * Kp: HKp + h * Kp + Kd]
            v = qkv[..., 2 * HKp + h * E: 2 * HKp + (h + 1) * E]
            s = jnp.einsum("bik,bjk->bij",
                           q.astype(jnp.bfloat16), k.astype(jnp.bfloat16),
                           preferred_element_type=jnp.float32) / math.sqrt(Kd)
            s = jnp.where(mask, -jnp.inf, s)
            s = jnp.where(fully_masked, 0.0, s)
            attn = jax.nn.softmax(s, -1)
            acc = acc + jnp.einsum("bij,bjd->bid",
                                   attn.astype(jnp.bfloat16), v.astype(jnp.bfloat16),
                                   preferred_element_type=jnp.float32)
        acc = acc / num_heads
        h1 = ln(x + acc, lp["ln1g"], lp["ln1b"])
        ff = jnp.maximum(_mm(h1, lp["w1"]) + lp["b1"], 0.0)
        ff = _mm(ff, lp["w2"]) + lp["b2"]
        x = ln(h1 + ff, lp["ln2g"], lp["ln2b"])
    return _mm(x, params["wout"]) + params["bout"]


if __name__ == "__main__":
    B, S, E, H, L = 2, 16, 128, 4, 2
    VOCAB, PAD_ID = 128, 0

    key = jax.random.PRNGKey(0)
    k_tok, k_par = jax.random.split(key)
    token_ids = jax.random.randint(k_tok, (B, S), 0, VOCAB, dtype=jnp.int32)
    # force some padded positions so the pad / fully-masked-row path is hit
    token_ids = token_ids.at[:, -2:].set(PAD_ID)

    params = init_params(k_par, embedding_size=E, vocab_size=VOCAB, seq_len=S,
                         num_attention_heads=H, num_layers=L)

    out = transformer_forward(token_ids, params, PAD_ID, H)
    out = jax.block_until_ready(out)
    assert out.shape == (B, S, VOCAB), out.shape

    ref = reference_forward(token_ids, params, PAD_ID, H)
    max_err = float(jnp.max(jnp.abs(out - ref)))
    assert jnp.allclose(out, ref, rtol=5e-2, atol=5e-2), f"mismatch: {max_err}"

    print("KERNEL_OK")
</pallas_src>

<mosaic_0001>
module attributes {stable_mosaic.version = 11 : i64} {
  func.func @decoder_layer_kernel(%arg0: i32, %arg1: memref<1x16x1xi32, #tpu.memory_space<vmem>>, %arg2: memref<1x1x16xi32, #tpu.memory_space<vmem>>, %arg3: memref<1x16x128xf32, #tpu.memory_space<vmem>>, %arg4: memref<128x1536xbf16, #tpu.memory_space<vmem>>, %arg5: memref<1x1536xf32, #tpu.memory_space<vmem>>, %arg6: memref<1x128xf32, #tpu.memory_space<vmem>>, %arg7: memref<1x128xf32, #tpu.memory_space<vmem>>, %arg8: memref<1x128xf32, #tpu.memory_space<vmem>>, %arg9: memref<1x128xf32, #tpu.memory_space<vmem>>, %arg10: memref<128x512xbf16, #tpu.memory_space<vmem>>, %arg11: memref<1x512xf32, #tpu.memory_space<vmem>>, %arg12: memref<512x128xbf16, #tpu.memory_space<vmem>>, %arg13: memref<1x128xf32, #tpu.memory_space<vmem>>, %arg14: memref<1x16x128xf32, #tpu.memory_space<vmem>>, %arg15: memref<16x1536xbf16, #tpu.memory_space<vmem>>) attributes {dimension_semantics = [#tpu.dimension_semantics<parallel>], iteration_bounds = array<i64: 2>, scalar_prefetch = 0 : i64, scratch_operands = 1 : i64, tpu.core_type = #tpu.core_type<tc>, window_params = [{transform_indices = @transform_0, window_bounds = array<i64: 1, 16, 1>}, {transform_indices = @transform_1, window_bounds = array<i64: 1, 1, 16>}, {transform_indices = @transform_2, window_bounds = array<i64: 1, 16, 128>}, {pipeline_mode = #tpu.pipeline_mode<synchronous>, transform_indices = @transform_3, window_bounds = array<i64: 128, 1536>}, {pipeline_mode = #tpu.pipeline_mode<synchronous>, transform_indices = @transform_4, window_bounds = array<i64: 1, 1536>}, {pipeline_mode = #tpu.pipeline_mode<synchronous>, transform_indices = @transform_5, window_bounds = array<i64: 1, 128>}, {pipeline_mode = #tpu.pipeline_mode<synchronous>, transform_indices = @transform_6, window_bounds = array<i64: 1, 128>}, {pipeline_mode = #tpu.pipeline_mode<synchronous>, transform_indices = @transform_7, window_bounds = array<i64: 1, 128>}, {pipeline_mode = #tpu.pipeline_mode<synchronous>, transform_indices = @transform_8, window_bounds = array<i64: 1, 128>}, {pipeline_mode = #tpu.pipeline_mode<synchronous>, transform_indices = @transform_9, window_bounds = array<i64: 128, 512>}, {pipeline_mode = #tpu.pipeline_mode<synchronous>, transform_indices = @transform_10, window_bounds = array<i64: 1, 512>}, {pipeline_mode = #tpu.pipeline_mode<synchronous>, transform_indices = @transform_11, window_bounds = array<i64: 512, 128>}, {pipeline_mode = #tpu.pipeline_mode<synchronous>, transform_indices = @transform_12, window_bounds = array<i64: 1, 128>}, {transform_indices = @transform_13, window_bounds = array<i64: 1, 16, 128>}]} {
    %c0 = arith.constant 0 : index
    %c0_0 = arith.constant 0 : index
    %c0_1 = arith.constant 0 : index
    %0 = vector.load %arg3[%c0, %c0_0, %c0_1] : memref<1x16x128xf32, #tpu.memory_space<vmem>>, vector<1x16x128xf32>
    %1 = vector.shape_cast %0 : vector<1x16x128xf32> to vector<16x128xf32>
    %2 = tpu.iota {dimensions = array<i32: 0>} : vector<16x16xi32>
    %3 = tpu.iota {dimensions = array<i32: 1>} : vector<16x16xi32>
    %4 = arith.cmpi sgt, %3, %2 : vector<16x16xi32>
    %5 = arith.extui %4 : vector<16x16xi1> to vector<16x16xi32>
    %c0_2 = arith.constant 0 : index
    %c0_3 = arith.constant 0 : index
    %c0_4 = arith.constant 0 : index
    %6 = vector.load %arg1[%c0_2, %c0_3, %c0_4] : memref<1x16x1xi32, #tpu.memory_space<vmem>>, vector<1x16x1xi32>
    %7 = vector.shape_cast %6 : vector<1x16x1xi32> to vector<16x1xi32>
    %8 = vector.broadcast %7 : vector<16x1xi32> to vector<16x16xi32>
    %9 = arith.addi %5, %8 : vector<16x16xi32>
    %c0_5 = arith.constant 0 : index
    %c0_6 = arith.constant 0 : index
    %c0_7 = arith.constant 0 : index
    %10 = vector.load %arg2[%c0_5, %c0_6, %c0_7] : memref<1x1x16xi32, #tpu.memory_space<vmem>>, vector<1x1x16xi32>
    %11 = vector.shape_cast %10 : vector<1x1x16xi32> to vector<1x16xi32>
    %12 = vector.broadcast %11 : vector<1x16xi32> to vector<16x16xi32>
    %13 = arith.addi %9, %12 : vector<16x16xi32>
    %c0_i32 = arith.constant 0 : i32
    %14 = vector.broadcast %c0_i32 : i32 to vector<16x16xi32>
    %15 = arith.cmpi sgt, %13, %14 : vector<16x16xi32>
    %cst = arith.constant 1.000000e+00 : f32
    %cst_8 = arith.constant 0.000000e+00 : f32
    %16 = vector.broadcast %cst : f32 to vector<16x16xf32>
    %17 = vector.broadcast %cst_8 : f32 to vector<16x16xf32>
    %18 = arith.select %15, %16, %17 : vector<16x16xi1>, vector<16x16xf32>
    %cst_9 = arith.constant dense<0x7F800000> : vector<16xf32>
    %19 = vector.multi_reduction <minimumf>, %18, %cst_9 [1] : vector<16x16xf32> to vector<16xf32>
    %cst_10 = arith.constant 0.000000e+00 : f32
    %20 = vector.broadcast %cst_10 : f32 to vector<16xf32>
    %21 = arith.cmpf ogt, %19, %20 : vector<16xf32>
    %22 = vector.shape_cast %21 : vector<16xi1> to vector<16x1xi1>
    %cst_11 = arith.constant dense<true> : vector<16x1xi1>
    %23 = arith.xori %22, %cst_11 : vector<16x1xi1>
    %24 = vector.broadcast %23 : vector<16x1xi1> to vector<16x16xi1>
    %25 = arith.andi %15, %24 : vector<16x16xi1>
    %cst_12 = arith.constant 0xFF800000 : f32
    %cst_13 = arith.constant 0.000000e+00 : f32
    %26 = vector.broadcast %cst_12 : f32 to vector<16x16xf32>
    %27 = vector.broadcast %cst_13 : f32 to vector<16x16xf32>
    %28 = arith.select %25, %26, %27 : vector<16x16xi1>, vector<16x16xf32>
    %cst_14 = arith.constant 0.000000e+00 : f32
    %cst_15 = arith.constant 0.176776692 : f32
    %29 = vector.broadcast %cst_14 : f32 to vector<16x1xf32>
    %30 = vector.broadcast %cst_15 : f32 to vector<16x1xf32>
    %31 = arith.select %22, %29, %30 : vector<16x1xi1>, vector<16x1xf32>
    %32 = arith.truncf %1 : vector<16x128xf32> to vector<16x128xbf16>
    %c0_16 = arith.constant 0 : index
    %c0_17 = arith.constant 0 : index
    %33 = vector.load %arg4[%c0_16, %c0_17] : memref<128x1536xbf16, #tpu.memory_space<vmem>>, vector<128x1536xbf16>
    %cst_18 = arith.constant dense<0.000000e+00> : vector<16x1536xf32>
    %34 = tpu.matmul %32, %33, %cst_18 {dimension_numbers = #tpu.dot_dimension_numbers<[1], [0], [0], [1], [0, 0, 1, 1], [], []>} : vector<16x128xbf16>, vector<128x1536xbf16>, vector<16x1536xf32> -> vector<16x1536xf32>
    %c0_19 = arith.constant 0 : index
    %c0_20 = arith.constant 0 : index
    %35 = vector.load %arg5[%c0_19, %c0_20] : memref<1x1536xf32, #tpu.memory_space<vmem>>, vector<1x1536xf32>
    %36 = vector.broadcast %35 : vector<1x1536xf32> to vector<16x1536xf32>
    %37 = arith.addf %34, %36 : vector<16x1536xf32>
    %38 = arith.truncf %37 : vector<16x1536xf32> to vector<16x1536xbf16>
    %c0_21 = arith.constant 0 : index
    %c0_22 = arith.constant 0 : index
    %39 = vector.load %arg15[%c0_21, %c0_22] : memref<16x1536xbf16, #tpu.memory_space<vmem>>, vector<16x1536xbf16>
    tpu.vector_store %arg15[%c0_21, %c0_22], %38 {strides = array<i32>} : memref<16x1536xbf16, #tpu.memory_space<vmem>>, vector<16x1536xbf16>,
    %cst_23 = arith.constant 0.000000e+00 : f32
    %40 = vector.broadcast %cst_23 : f32 to vector<16x128xf32>
    %c0_i32_24 = arith.constant 0 : i32
    %c128_i32 = arith.constant 128 : i32
    %41 = arith.muli %c0_i32_24, %c128_i32 : i32
    %42 = tpu.assume_multiple %41, 128 : i32
    %c128_i32_25 = arith.constant 128 : i32
    %43 = arith.muli %c0_i32_24, %c128_i32_25 : i32
    %c512_i32 = arith.constant 512 : i32
    %44 = arith.addi %c512_i32, %43 : i32
    %45 = tpu.assume_multiple %44, 128 : i32
    %c128_i32_26 = arith.constant 128 : i32
    %46 = arith.muli %c0_i32_24, %c128_i32_26 : i32
    %c1024_i32 = arith.constant 1024 : i32
    %47 = arith.addi %c1024_i32, %46 : i32
    %48 = tpu.assume_multiple %47, 128 : i32
    %c0_27 = arith.constant 0 : index
    %49 = arith.index_cast %42 : i32 to index
    %50 = vector.load %arg15[%c0_27, %49] : memref<16x1536xbf16, #tpu.memory_space<vmem>>, vector<16x128xbf16>
    %c0_28 = arith.constant 0 : index
    %51 = arith.index_cast %45 : i32 to index
    %52 = vector.load %arg15[%c0_28, %51] : memref<16x1536xbf16, #tpu.memory_space<vmem>>, vector<16x128xbf16>
    %c0_29 = arith.constant 0 : index
    %53 = arith.index_cast %48 : i32 to index
    %54 = vector.load %arg15[%c0_29, %53] : memref<16x1536xbf16, #tpu.memory_space<vmem>>, vector<16x128xbf16>
    %cst_30 = arith.constant dense<0.000000e+00> : vector<16x16xf32>
    %55 = tpu.matmul %50, %52, %cst_30 {dimension_numbers = #tpu.dot_dimension_numbers<[1], [1], [0], [0], [0, 0, 1, 0], [], []>} : vector<16x128xbf16>, vector<16x128xbf16>, vector<16x16xf32> -> vector<16x16xf32>
    %56 = vector.broadcast %31 : vector<16x1xf32> to vector<16x16xf32>
    %57 = arith.mulf %55, %56 : vector<16x16xf32>
    %58 = arith.addf %57, %28 : vector<16x16xf32>
    %cst_31 = arith.constant dense<0xFF800000> : vector<16xf32>
    %59 = vector.multi_reduction <maximumf>, %58, %cst_31 [1] : vector<16x16xf32> to vector<16xf32>
    %60 = vector.shape_cast %59 : vector<16xf32> to vector<16x1xf32>
    %61 = vector.broadcast %60 : vector<16x1xf32> to vector<16x16xf32>
    %62 = arith.subf %58, %61 : vector<16x16xf32>
    %63 = math.exp %62 : vector<16x16xf32>
    %cst_32 = arith.constant dense<0.000000e+00> : vector<16xf32>
    %64 = vector.multi_reduction <add>, %63, %cst_32 [1] : vector<16x16xf32> to vector<16xf32>
    %65 = vector.shape_cast %64 : vector<16xf32> to vector<16x1xf32>
    %66 = tpu.reciprocal %65 {approx = true} : vector<16x1xf32> -> vector<16x1xf32>
    %67 = vector.broadcast %66 : vector<16x1xf32> to vector<16x16xf32>
    %68 = arith.mulf %63, %67 : vector<16x16xf32>
    %69 = arith.truncf %68 : vector<16x16xf32> to vector<16x16xbf16>
    %cst_33 = arith.constant dense<0.000000e+00> : vector<16x128xf32>
    %70 = tpu.matmul %69, %54, %cst_33 {dimension_numbers = #tpu.dot_dimension_numbers<[1], [0], [0], [1], [0, 0, 1, 1], [], []>} : vector<16x16xbf16>, vector<16x128xbf16>, vector<16x128xf32> -> vector<16x128xf32>
    %71 = arith.addf %40, %70 : vector<16x128xf32>
    %c1_i32 = arith.constant 1 : i32
    %c128_i32_34 = arith.constant 128 : i32
    %72 = arith.muli %c1_i32, %c128_i32_34 : i32
    %73 = tpu.assume_multiple %72, 128 : i32
    %c128_i32_35 = arith.constant 128 : i32
    %74 = arith.muli %c1_i32, %c128_i32_35 : i32
    %c512_i32_36 = arith.constant 512 : i32
    %75 = arith.addi %c512_i32_36, %74 : i32
    %76 = tpu.assume_multiple %75, 128 : i32
    %c128_i32_37 = arith.constant 128 : i32
    %77 = arith.muli %c1_i32, %c128_i32_37 : i32
    %c1024_i32_38 = arith.constant 1024 : i32
    %78 = arith.addi %c1024_i32_38, %77 : i32
    %79 = tpu.assume_multiple %78, 128 : i32
    %c0_39 = arith.constant 0 : index
    %80 = arith.index_cast %73 : i32 to index
    %81 = vector.load %arg15[%c0_39, %80] : memref<16x1536xbf16, #tpu.memory_space<vmem>>, vector<16x128xbf16>
    %c0_40 = arith.constant 0 : index
    %82 = arith.index_cast %76 : i32 to index
    %83 = vector.load %arg15[%c0_40, %82] : memref<16x1536xbf16, #tpu.memory_space<vmem>>, vector<16x128xbf16>
    %c0_41 = arith.constant 0 : index
    %84 = arith.index_cast %79 : i32 to index
    %85 = vector.load %arg15[%c0_41, %84] : memref<16x1536xbf16, #tpu.memory_space<vmem>>, vector<16x128xbf16>
    %cst_42 = arith.constant dense<0.000000e+00> : vector<16x16xf32>
    %86 = tpu.matmul %81, %83, %cst_42 {dimension_numbers = #tpu.dot_dimension_numbers<[1], [1], [0], [0], [0, 0, 1, 0], [], []>} : vector<16x128xbf16>, vector<16x128xbf16>, vector<16x16xf32> -> vector<16x16xf32>
    %87 = vector.broadcast %31 : vector<16x1xf32> to vector<16x16xf32>
    %88 = arith.mulf %86, %87 : vector<16x16xf32>
    %89 = arith.addf %88, %28 : vector<16x16xf32>
    %cst_43 = arith.constant dense<0xFF800000> : vector<16xf32>
    %90 = vector.multi_reduction <maximumf>, %89, %cst_43 [1] : vector<16x16xf32> to vector<16xf32>
    %91 = vector.shape_cast %90 : vector<16xf32> to vector<16x1xf32>
    %92 = vector.broadcast %91 : vector<16x1xf32> to vector<16x16xf32>
    %93 = arith.subf %89, %92 : vector<16x16xf32>
    %94 = math.exp %93 : vector<16x16xf32>
    %cst_44 = arith.constant dense<0.000000e+00> : vector<16xf32>
    %95 = vector.multi_reduction <add>, %94, %cst_44 [1] : vector<16x16xf32> to vector<16xf32>
    %96 = vector.shape_cast %95 : vector<16xf32> to vector<16x1xf32>
    %97 = tpu.reciprocal %96 {approx = true} : vector<16x1xf32> -> vector<16x1xf32>
    %98 = vector.broadcast %97 : vector<16x1xf32> to vector<16x16xf32>
    %99 = arith.mulf %94, %98 : vector<16x16xf32>
    %100 = arith.truncf %99 : vector<16x16xf32> to vector<16x16xbf16>
    %cst_45 = arith.constant dense<0.000000e+00> : vector<16x128xf32>
    %101 = tpu.matmul %100, %85, %cst_45 {dimension_numbers = #tpu.dot_dimension_numbers<[1], [0], [0], [1], [0, 0, 1, 1], [], []>} : vector<16x16xbf16>, vector<16x128xbf16>, vector<16x128xf32> -> vector<16x128xf32>
    %102 = arith.addf %71, %101 : vector<16x128xf32>
    %c2_i32 = arith.constant 2 : i32
    %c128_i32_46 = arith.constant 128 : i32
    %103 = arith.muli %c2_i32, %c128_i32_46 : i32
    %104 = tpu.assume_multiple %103, 128 : i32
    %c128_i32_47 = arith.constant 128 : i32
    %105 = arith.muli %c2_i32, %c128_i32_47 : i32
    %c512_i32_48 = arith.constant 512 : i32
    %106 = arith.addi %c512_i32_48, %105 : i32
    %107 = tpu.assume_multiple %106, 128 : i32
    %c128_i32_49 = arith.constant 128 : i32
    %108 = arith.muli %c2_i32, %c128_i32_49 : i32
    %c1024_i32_50 = arith.constant 1024 : i32
    %109 = arith.addi %c1024_i32_50, %108 : i32
    %110 = tpu.assume_multiple %109, 128 : i32
    %c0_51 = arith.constant 0 : index
    %111 = arith.index_cast %104 : i32 to index
    %112 = vector.load %arg15[%c0_51, %111] : memref<16x1536xbf16, #tpu.memory_space<vmem>>, vector<16x128xbf16>
    %c0_52 = arith.constant 0 : index
    %113 = arith.index_cast %107 : i32 to index
    %114 = vector.load %arg15[%c0_52, %113] : memref<16x1536xbf16, #tpu.memory_space<vmem>>, vector<16x128xbf16>
    %c0_53 = arith.constant 0 : index
    %115 = arith.index_cast %110 : i32 to index
    %116 = vector.load %arg15[%c0_53, %115] : memref<16x1536xbf16, #tpu.memory_space<vmem>>, vector<16x128xbf16>
    %cst_54 = arith.constant dense<0.000000e+00> : vector<16x16xf32>
    %117 = tpu.matmul %112, %114, %cst_54 {dimension_numbers = #tpu.dot_dimension_numbers<[1], [1], [0], [0], [0, 0, 1, 0], [], []>} : vector<16x128xbf16>, vector<16x128xbf16>, vector<16x16xf32> -> vector<16x16xf32>
    %118 = vector.broadcast %31 : vector<16x1xf32> to vector<16x16xf32>
    %119 = arith.mulf %117, %118 : vector<16x16xf32>
    %120 = arith.addf %119, %28 : vector<16x16xf32>
    %cst_55 = arith.constant dense<0xFF800000> : vector<16xf32>
    %121 = vector.multi_reduction <maximumf>, %120, %cst_55 [1] : vector<16x16xf32> to vector<16xf32>
    %122 = vector.shape_cast %121 : vector<16xf32> to vector<16x1xf32>
    %123 = vector.broadcast %122 : vector<16x1xf32> to vector<16x16xf32>
    %124 = arith.subf %120, %123 : vector<16x16xf32>
    %125 = math.exp %124 : vector<16x16xf32>
    %cst_56 = arith.constant dense<0.000000e+00> : vector<16xf32>
    %126 = vector.multi_reduction <add>, %125, %cst_56 [1] : vector<16x16xf32> to vector<16xf32>
    %127 = vector.shape_cast %126 : vector<16xf32> to vector<16x1xf32>
    %128 = tpu.reciprocal %127 {approx = true} : vector<16x1xf32> -> vector<16x1xf32>
    %129 = vector.broadcast %128 : vector<16x1xf32> to vector<16x16xf32>
    %130 = arith.mulf %125, %129 : vector<16x16xf32>
    %131 = arith.truncf %130 : vector<16x16xf32> to vector<16x16xbf16>
    %cst_57 = arith.constant dense<0.000000e+00> : vector<16x128xf32>
    %132 = tpu.matmul %131, %116, %cst_57 {dimension_numbers = #tpu.dot_dimension_numbers<[1], [0], [0], [1], [0, 0, 1, 1], [], []>} : vector<16x16xbf16>, vector<16x128xbf16>, vector<16x128xf32> -> vector<16x128xf32>
    %133 = arith.addf %102, %132 : vector<16x128xf32>
    %c3_i32 = arith.constant 3 : i32
    %c128_i32_58 = arith.constant 128 : i32
    %134 = arith.muli %c3_i32, %c128_i32_58 : i32
    %135 = tpu.assume_multiple %134, 128 : i32
    %c128_i32_59 = arith.constant 128 : i32
    %136 = arith.muli %c3_i32, %c128_i32_59 : i32
    %c512_i32_60 = arith.constant 512 : i32
    %137 = arith.addi %c512_i32_60, %136 : i32
    %138 = tpu.assume_multiple %137, 128 : i32
    %c128_i32_61 = arith.constant 128 : i32
    %139 = arith.muli %c3_i32, %c128_i32_61 : i32
    %c1024_i32_62 = arith.constant 1024 : i32
    %140 = arith.addi %c1024_i32_62, %139 : i32
    %141 = tpu.assume_multiple %140, 128 : i32
    %c0_63 = arith.constant 0 : index
    %142 = arith.index_cast %135 : i32 to index
    %143 = vector.load %arg15[%c0_63, %142] : memref<16x1536xbf16, #tpu.memory_space<vmem>>, vector<16x128xbf16>
    %c0_64 = arith.constant 0 : index
    %144 = arith.index_cast %138 : i32 to index
    %145 = vector.load %arg15[%c0_64, %144] : memref<16x1536xbf16, #tpu.memory_space<vmem>>, vector<16x128xbf16>
    %c0_65 = arith.constant 0 : index
    %146 = arith.index_cast %141 : i32 to index
    %147 = vector.load %arg15[%c0_65, %146] : memref<16x1536xbf16, #tpu.memory_space<vmem>>, vector<16x128xbf16>
    %cst_66 = arith.constant dense<0.000000e+00> : vector<16x16xf32>
    %148 = tpu.matmul %143, %145, %cst_66 {dimension_numbers = #tpu.dot_dimension_numbers<[1], [1], [0], [0], [0, 0, 1, 0], [], []>} : vector<16x128xbf16>, vector<16x128xbf16>, vector<16x16xf32> -> vector<16x16xf32>
    %149 = vector.broadcast %31 : vector<16x1xf32> to vector<16x16xf32>
    %150 = arith.mulf %148, %149 : vector<16x16xf32>
    %151 = arith.addf %150, %28 : vector<16x16xf32>
    %cst_67 = arith.constant dense<0xFF800000> : vector<16xf32>
    %152 = vector.multi_reduction <maximumf>, %151, %cst_67 [1] : vector<16x16xf32> to vector<16xf32>
    %153 = vector.shape_cast %152 : vector<16xf32> to vector<16x1xf32>
    %154 = vector.broadcast %153 : vector<16x1xf32> to vector<16x16xf32>
    %155 = arith.subf %151, %154 : vector<16x16xf32>
    %156 = math.exp %155 : vector<16x16xf32>
    %cst_68 = arith.constant dense<0.000000e+00> : vector<16xf32>
    %157 = vector.multi_reduction <add>, %156, %cst_68 [1] : vector<16x16xf32> to vector<16xf32>
    %158 = vector.shape_cast %157 : vector<16xf32> to vector<16x1xf32>
    %159 = tpu.reciprocal %158 {approx = true} : vector<16x1xf32> -> vector<16x1xf32>
    %160 = vector.broadcast %159 : vector<16x1xf32> to vector<16x16xf32>
    %161 = arith.mulf %156, %160 : vector<16x16xf32>
    %162 = arith.truncf %161 : vector<16x16xf32> to vector<16x16xbf16>
    %cst_69 = arith.constant dense<0.000000e+00> : vector<16x128xf32>
    %163 = tpu.matmul %162, %147, %cst_69 {dimension_numbers = #tpu.dot_dimension_numbers<[1], [0], [0], [1], [0, 0, 1, 1], [], []>} : vector<16x16xbf16>, vector<16x128xbf16>, vector<16x128xf32> -> vector<16x128xf32>
    %164 = arith.addf %133, %163 : vector<16x128xf32>
    %c4_i32 = arith.constant 4 : i32
    %cst_70 = arith.constant 2.500000e-01 : f32
    %165 = vector.broadcast %cst_70 : f32 to vector<16x128xf32>
    %166 = arith.mulf %164, %165 : vector<16x128xf32>
    %167 = arith.addf %1, %166 : vector<16x128xf32>
    %c0_71 = arith.constant 0 : index
    %c0_72 = arith.constant 0 : index
    %168 = vector.load %arg6[%c0_71, %c0_72] : memref<1x128xf32, #tpu.memory_space<vmem>>, vector<1x128xf32>
    %c0_73 = arith.constant 0 : index
    %c0_74 = arith.constant 0 : index
    %169 = vector.load %arg7[%c0_73, %c0_74] : memref<1x128xf32, #tpu.memory_space<vmem>>, vector<1x128xf32>
    %cst_75 = arith.constant dense<0.000000e+00> : vector<16xf32>
    %170 = vector.multi_reduction <add>, %167, %cst_75 [1] : vector<16x128xf32> to vector<16xf32>
    %171 = vector.shape_cast %170 : vector<16xf32> to vector<16x1xf32>
    %cst_76 = arith.constant 1.280000e+02 : f32
    %172 = vector.broadcast %cst_76 : f32 to vector<16x1xf32>
    %173 = arith.divf %171, %172 : vector<16x1xf32>
    %174 = vector.broadcast %173 : vector<16x1xf32> to vector<16x128xf32>
    %175 = arith.subf %167, %174 : vector<16x128xf32>
    %176 = arith.mulf %175, %175 : vector<16x128xf32>
    %cst_77 = arith.constant dense<0.000000e+00> : vector<16xf32>
    %177 = vector.multi_reduction <add>, %176, %cst_77 [1] : vector<16x128xf32> to vector<16xf32>
    %178 = vector.shape_cast %177 : vector<16xf32> to vector<16x1xf32>
    %cst_78 = arith.constant 1.280000e+02 : f32
    %179 = vector.broadcast %cst_78 : f32 to vector<16x1xf32>
    %180 = arith.divf %178, %179 : vector<16x1xf32>
    %181 = vector.broadcast %173 : vector<16x1xf32> to vector<16x128xf32>
    %182 = arith.subf %167, %181 : vector<16x128xf32>
    %cst_79 = arith.constant 9.99999974E-6 : f32
    %183 = vector.broadcast %cst_79 : f32 to vector<16x1xf32>
    %184 = arith.addf %180, %183 : vector<16x1xf32>
    %185 = math.rsqrt %184 : vector<16x1xf32>
    %186 = vector.broadcast %185 : vector<16x1xf32> to vector<16x128xf32>
    %187 = arith.mulf %182, %186 : vector<16x128xf32>
    %188 = vector.broadcast %168 : vector<1x128xf32> to vector<16x128xf32>
    %189 = arith.mulf %187, %188 : vector<16x128xf32>
    %190 = vector.broadcast %169 : vector<1x128xf32> to vector<16x128xf32>
    %191 = arith.addf %189, %190 : vector<16x128xf32>
    %192 = arith.truncf %191 : vector<16x128xf32> to vector<16x128xbf16>
    %c0_80 = arith.constant 0 : index
    %c0_81 = arith.constant 0 : index
    %193 = vector.load %arg10[%c0_80, %c0_81] : memref<128x512xbf16, #tpu.memory_space<vmem>>, vector<128x512xbf16>
    %cst_82 = arith.constant dense<0.000000e+00> : vector<16x512xf32>
    %194 = tpu.matmul %192, %193, %cst_82 {dimension_numbers = #tpu.dot_dimension_numbers<[1], [0], [0], [1], [0, 0, 1, 1], [], []>} : vector<16x128xbf16>, vector<128x512xbf16>, vector<16x512xf32> -> vector<16x512xf32>
    %c0_83 = arith.constant 0 : index
    %c0_84 = arith.constant 0 : index
    %195 = vector.load %arg11[%c0_83, %c0_84] : memref<1x512xf32, #tpu.memory_space<vmem>>, vector<1x512xf32>
    %196 = vector.broadcast %195 : vector<1x512xf32> to vector<16x512xf32>
    %197 = arith.addf %194, %196 : vector<16x512xf32>
    %cst_85 = arith.constant 0.000000e+00 : f32
    %198 = vector.broadcast %cst_85 : f32 to vector<16x512xf32>
    %199 = arith.maximumf %197, %198 : vector<16x512xf32>
    %200 = arith.truncf %199 : vector<16x512xf32> to vector<16x512xbf16>
    %c0_86 = arith.constant 0 : index
    %c0_87 = arith.constant 0 : index
    %201 = vector.load %arg12[%c0_86, %c0_87] : memref<512x128xbf16, #tpu.memory_space<vmem>>, vector<512x128xbf16>
    %cst_88 = arith.constant dense<0.000000e+00> : vector<16x128xf32>
    %202 = tpu.matmul %200, %201, %cst_88 {dimension_numbers = #tpu.dot_dimension_numbers<[1], [0], [0], [1], [0, 0, 1, 1], [], []>} : vector<16x512xbf16>, vector<512x128xbf16>, vector<16x128xf32> -> vector<16x128xf32>
    %c0_89 = arith.constant 0 : index
    %c0_90 = arith.constant 0 : index
    %203 = vector.load %arg13[%c0_89, %c0_90] : memref<1x128xf32, #tpu.memory_space<vmem>>, vector<1x128xf32>
    %204 = vector.broadcast %203 : vector<1x128xf32> to vector<16x128xf32>
    %205 = arith.addf %202, %204 : vector<16x128xf32>
    %206 = arith.addf %191, %205 : vector<16x128xf32>
    %c0_91 = arith.constant 0 : index
    %c0_92 = arith.constant 0 : index
    %207 = vector.load %arg8[%c0_91, %c0_92] : memref<1x128xf32, #tpu.memory_space<vmem>>, vector<1x128xf32>
    %c0_93 = arith.constant 0 : index
    %c0_94 = arith.constant 0 : index
    %208 = vector.load %arg9[%c0_93, %c0_94] : memref<1x128xf32, #tpu.memory_space<vmem>>, vector<1x128xf32>
    %cst_95 = arith.constant dense<0.000000e+00> : vector<16xf32>
    %209 = vector.multi_reduction <add>, %206, %cst_95 [1] : vector<16x128xf32> to vector<16xf32>
    %210 = vector.shape_cast %209 : vector<16xf32> to vector<16x1xf32>
    %cst_96 = arith.constant 1.280000e+02 : f32
    %211 = vector.broadcast %cst_96 : f32 to vector<16x1xf32>
    %212 = arith.divf %210, %211 : vector<16x1xf32>
    %213 = vector.broadcast %212 : vector<16x1xf32> to vector<16x128xf32>
    %214 = arith.subf %206, %213 : vector<16x128xf32>
    %215 = arith.mulf %214, %214 : vector<16x128xf32>
    %cst_97 = arith.constant dense<0.000000e+00> : vector<16xf32>
    %216 = vector.multi_reduction <add>, %215, %cst_97 [1] : vector<16x128xf32> to vector<16xf32>
    %217 = vector.shape_cast %216 : vector<16xf32> to vector<16x1xf32>
    %cst_98 = arith.constant 1.280000e+02 : f32
    %218 = vector.broadcast %cst_98 : f32 to vector<16x1xf32>
    %219 = arith.divf %217, %218 : vector<16x1xf32>
    %220 = vector.broadcast %212 : vector<16x1xf32> to vector<16x128xf32>
    %221 = arith.subf %206, %220 : vector<16x128xf32>
    %cst_99 = arith.constant 9.99999974E-6 : f32
    %222 = vector.broadcast %cst_99 : f32 to vector<16x1xf32>
    %223 = arith.addf %219, %222 : vector<16x1xf32>
    %224 = math.rsqrt %223 : vector<16x1xf32>
    %225 = vector.broadcast %224 : vector<16x1xf32> to vector<16x128xf32>
    %226 = arith.mulf %221, %225 : vector<16x128xf32>
    %227 = vector.broadcast %207 : vector<1x128xf32> to vector<16x128xf32>
    %228 = arith.mulf %226, %227 : vector<16x128xf32>
    %229 = vector.broadcast %208 : vector<1x128xf32> to vector<16x128xf32>
    %230 = arith.addf %228, %229 : vector<16x128xf32>
    %c0_100 = arith.constant 0 : index
    %c0_101 = arith.constant 0 : index
    %c0_102 = arith.constant 0 : index
    %231 = vector.load %arg14[%c0_100, %c0_101, %c0_102] : memref<1x16x128xf32, #tpu.memory_space<vmem>>, vector<1x16x128xf32>
    %232 = vector.shape_cast %231 : vector<1x16x128xf32> to vector<16x128xf32>
    %233 = vector.shape_cast %230 : vector<16x128xf32> to vector<1x16x128xf32>
    tpu.vector_store %arg14[%c0_100, %c0_101, %c0_102], %233 {strides = array<i32>} : memref<1x16x128xf32, #tpu.memory_space<vmem>>, vector<1x16x128xf32>,
    return
  }
  func.func @transform_0(%arg0: i32) -> (i32, i32, i32) {
    %c0_i32 = arith.constant 0 : i32
    %c0_i32_0 = arith.constant 0 : i32
    %c0_i32_1 = arith.constant 0 : i32
    return %arg0, %c0_i32, %c0_i32_0 : i32, i32, i32
  }
  func.func @transform_1(%arg0: i32) -> (i32, i32, i32) {
    %c0_i32 = arith.constant 0 : i32
    %c0_i32_0 = arith.constant 0 : i32
    %c0_i32_1 = arith.constant 0 : i32
    return %arg0, %c0_i32, %c0_i32_0 : i32, i32, i32
  }
  func.func @transform_2(%arg0: i32) -> (i32, i32, i32) {
    %c0_i32 = arith.constant 0 : i32
    %c0_i32_0 = arith.constant 0 : i32
    %c0_i32_1 = arith.constant 0 : i32
    return %arg0, %c0_i32, %c0_i32_0 : i32, i32, i32
  }
  func.func @transform_3(%arg0: i32) -> (i32, i32) {
    %c0_i32 = arith.constant 0 : i32
    %c0_i32_0 = arith.constant 0 : i32
    %c0_i32_1 = arith.constant 0 : i32
    return %c0_i32, %c0_i32_0 : i32, i32
  }
  func.func @transform_4(%arg0: i32) -> (i32, i32) {
    %c0_i32 = arith.constant 0 : i32
    %c0_i32_0 = arith.constant 0 : i32
    %c0_i32_1 = arith.constant 0 : i32
    return %c0_i32, %c0_i32_0 : i32, i32
  }
  func.func @transform_5(%arg0: i32) -> (i32, i32) {
    %c0_i32 = arith.constant 0 : i32
    %c0_i32_0 = arith.constant 0 : i32
    %c0_i32_1 = arith.constant 0 : i32
    return %c0_i32, %c0_i32_0 : i32, i32
  }
  func.func @transform_6(%arg0: i32) -> (i32, i32) {
    %c0_i32 = arith.constant 0 : i32
    %c0_i32_0 = arith.constant 0 : i32
    %c0_i32_1 = arith.constant 0 : i32
    return %c0_i32, %c0_i32_0 : i32, i32
  }
  func.func @transform_7(%arg0: i32) -> (i32, i32) {
    %c0_i32 = arith.constant 0 : i32
    %c0_i32_0 = arith.constant 0 : i32
    %c0_i32_1 = arith.constant 0 : i32
    return %c0_i32, %c0_i32_0 : i32, i32
  }
  func.func @transform_8(%arg0: i32) -> (i32, i32) {
    %c0_i32 = arith.constant 0 : i32
    %c0_i32_0 = arith.constant 0 : i32
    %c0_i32_1 = arith.constant 0 : i32
    return %c0_i32, %c0_i32_0 : i32, i32
  }
  func.func @transform_9(%arg0: i32) -> (i32, i32) {
    %c0_i32 = arith.constant 0 : i32
    %c0_i32_0 = arith.constant 0 : i32
    %c0_i32_1 = arith.constant 0 : i32
    return %c0_i32, %c0_i32_0 : i32, i32
  }
  func.func @transform_10(%arg0: i32) -> (i32, i32) {
    %c0_i32 = arith.constant 0 : i32
    %c0_i32_0 = arith.constant 0 : i32
    %c0_i32_1 = arith.constant 0 : i32
    return %c0_i32, %c0_i32_0 : i32, i32
  }
  func.func @transform_11(%arg0: i32) -> (i32, i32) {
    %c0_i32 = arith.constant 0 : i32
    %c0_i32_0 = arith.constant 0 : i32
    %c0_i32_1 = arith.constant 0 : i32
    return %c0_i32, %c0_i32_0 : i32, i32
  }
  func.func @transform_12(%arg0: i32) -> (i32, i32) {
    %c0_i32 = arith.constant 0 : i32
    %c0_i32_0 = arith.constant 0 : i32
    %c0_i32_1 = arith.constant 0 : i32
    return %c0_i32, %c0_i32_0 : i32, i32
  }
  func.func @transform_13(%arg0: i32) -> (i32, i32, i32) {
    %c0_i32 = arith.constant 0 : i32
    %c0_i32_0 = arith.constant 0 : i32
    %c0_i32_1 = arith.constant 0 : i32
    return %arg0, %c0_i32, %c0_i32_0 : i32, i32, i32
  }
}

module attributes {stable_mosaic.version = 11 : i64} {
  func.func @proj_kernel(%arg0: i32, %arg1: memref<32x128xbf16, #tpu.memory_space<vmem>>, %arg2: memref<128x128xbf16, #tpu.memory_space<vmem>>, %arg3: memref<1x128xf32, #tpu.memory_space<vmem>>, %arg4: memref<32x128xf32, #tpu.memory_space<vmem>>) attributes {dimension_semantics = [#tpu.dimension_semantics<parallel>], iteration_bounds = array<i64: 1>, scalar_prefetch = 0 : i64, scratch_operands = 0 : i64, tpu.core_type = #tpu.core_type<tc>, window_params = [{pipeline_mode = #tpu.pipeline_mode<synchronous>, transform_indices = @transform_0, window_bounds = array<i64: 32, 128>}, {transform_indices = @transform_1, window_bounds = array<i64: 128, 128>}, {transform_indices = @transform_2, window_bounds = array<i64: 1, 128>}, {transform_indices = @transform_3, window_bounds = array<i64: 32, 128>}]} {
    %c0 = arith.constant 0 : index
    %c0_0 = arith.constant 0 : index
    %0 = vector.load %arg1[%c0, %c0_0] : memref<32x128xbf16, #tpu.memory_space<vmem>>, vector<32x128xbf16>
    %c0_1 = arith.constant 0 : index
    %c0_2 = arith.constant 0 : index
    %1 = vector.load %arg2[%c0_1, %c0_2] : memref<128x128xbf16, #tpu.memory_space<vmem>>, vector<128x128xbf16>
    %cst = arith.constant dense<0.000000e+00> : vector<32x128xf32>
    %2 = tpu.matmul %0, %1, %cst {dimension_numbers = #tpu.dot_dimension_numbers<[1], [0], [0], [1], [0, 0, 1, 1], [], []>} : vector<32x128xbf16>, vector<128x128xbf16>, vector<32x128xf32> -> vector<32x128xf32>
    %c0_3 = arith.constant 0 : index
    %c0_4 = arith.constant 0 : index
    %3 = vector.load %arg3[%c0_3, %c0_4] : memref<1x128xf32, #tpu.memory_space<vmem>>, vector<1x128xf32>
    %4 = vector.broadcast %3 : vector<1x128xf32> to vector<32x128xf32>
    %5 = arith.addf %2, %4 : vector<32x128xf32>
    %c0_5 = arith.constant 0 : index
    %c0_6 = arith.constant 0 : index
    %6 = vector.load %arg4[%c0_5, %c0_6] : memref<32x128xf32, #tpu.memory_space<vmem>>, vector<32x128xf32>
    tpu.vector_store %arg4[%c0_5, %c0_6], %5 {strides = array<i32>} : memref<32x128xf32, #tpu.memory_space<vmem>>, vector<32x128xf32>,
    return
  }
  func.func @transform_0(%arg0: i32) -> (i32, i32) {
    %c0_i32 = arith.constant 0 : i32
    %c0_i32_0 = arith.constant 0 : i32
    %c0_i32_1 = arith.constant 0 : i32
    return %c0_i32, %c0_i32_0 : i32, i32
  }
  func.func @transform_1(%arg0: i32) -> (i32, i32) {
    %c0_i32 = arith.constant 0 : i32
    %c0_i32_0 = arith.constant 0 : i32
    return %c0_i32, %arg0 : i32, i32
  }
  func.func @transform_2(%arg0: i32) -> (i32, i32) {
    %c0_i32 = arith.constant 0 : i32
    %c0_i32_0 = arith.constant 0 : i32
    return %c0_i32, %arg0 : i32, i32
  }
  func.func @transform_3(%arg0: i32) -> (i32, i32) {
    %c0_i32 = arith.constant 0 : i32
    %c0_i32_0 = arith.constant 0 : i32
    return %c0_i32, %arg0 : i32, i32
  }
}

module attributes {stable_mosaic.version = 11 : i64} {
  func.func @decoder_layer_kernel(%arg0: i32, %arg1: memref<1x16x1xi32, #tpu.memory_space<vmem>>, %arg2: memref<1x1x16xi32, #tpu.memory_space<vmem>>, %arg3: memref<1x16x128xf32, #tpu.memory_space<vmem>>, %arg4: memref<128x1536xbf16, #tpu.memory_space<vmem>>, %arg5: memref<1x1536xf32, #tpu.memory_space<vmem>>, %arg6: memref<1x128xf32, #tpu.memory_space<vmem>>, %arg7: memref<1x128xf32, #tpu.memory_space<vmem>>, %arg8: memref<1x128xf32, #tpu.memory_space<vmem>>, %arg9: memref<1x128xf32, #tpu.memory_space<vmem>>, %arg10: memref<128x512xbf16, #tpu.memory_space<vmem>>, %arg11: memref<1x512xf32, #tpu.memory_space<vmem>>, %arg12: memref<512x128xbf16, #tpu.memory_space<vmem>>, %arg13: memref<1x128xf32, #tpu.memory_space<vmem>>, %arg14: memref<1x16x128xf32, #tpu.memory_space<vmem>>, %arg15: memref<16x1536xbf16, #tpu.memory_space<vmem>>) attributes {dimension_semantics = [#tpu.dimension_semantics<parallel>], iteration_bounds = array<i64: 2>, scalar_prefetch = 0 : i64, scratch_operands = 1 : i64, tpu.core_type = #tpu.core_type<tc>, window_params = [{transform_indices = @transform_0, window_bounds = array<i64: 1, 16, 1>}, {transform_indices = @transform_1, window_bounds = array<i64: 1, 1, 16>}, {transform_indices = @transform_2, window_bounds = array<i64: 1, 16, 128>}, {pipeline_mode = #tpu.pipeline_mode<synchronous>, transform_indices = @transform_3, window_bounds = array<i64: 128, 1536>}, {pipeline_mode = #tpu.pipeline_mode<synchronous>, transform_indices = @transform_4, window_bounds = array<i64: 1, 1536>}, {pipeline_mode = #tpu.pipeline_mode<synchronous>, transform_indices = @transform_5, window_bounds = array<i64: 1, 128>}, {pipeline_mode = #tpu.pipeline_mode<synchronous>, transform_indices = @transform_6, window_bounds = array<i64: 1, 128>}, {pipeline_mode = #tpu.pipeline_mode<synchronous>, transform_indices = @transform_7, window_bounds = array<i64: 1, 128>}, {pipeline_mode = #tpu.pipeline_mode<synchronous>, transform_indices = @transform_8, window_bounds = array<i64: 1, 128>}, {pipeline_mode = #tpu.pipeline_mode<synchronous>, transform_indices = @transform_9, window_bounds = array<i64: 128, 512>}, {pipeline_mode = #tpu.pipeline_mode<synchronous>, transform_indices = @transform_10, window_bounds = array<i64: 1, 512>}, {pipeline_mode = #tpu.pipeline_mode<synchronous>, transform_indices = @transform_11, window_bounds = array<i64: 512, 128>}, {pipeline_mode = #tpu.pipeline_mode<synchronous>, transform_indices = @transform_12, window_bounds = array<i64: 1, 128>}, {transform_indices = @transform_13, window_bounds = array<i64: 1, 16, 128>}]} {
    %c0 = arith.constant 0 : index
    %c0_0 = arith.constant 0 : index
    %c0_1 = arith.constant 0 : index
    %0 = vector.load %arg3[%c0, %c0_0, %c0_1] : memref<1x16x128xf32, #tpu.memory_space<vmem>>, vector<1x16x128xf32>
    %1 = vector.shape_cast %0 : vector<1x16x128xf32> to vector<16x128xf32>
    %2 = tpu.iota {dimensions = array<i32: 0>} : vector<16x16xi32>
    %3 = tpu.iota {dimensions = array<i32: 1>} : vector<16x16xi32>
    %4 = arith.cmpi sgt, %3, %2 : vector<16x16xi32>
    %5 = arith.extui %4 : vector<16x16xi1> to vector<16x16xi32>
    %c0_2 = arith.constant 0 : index
    %c0_3 = arith.constant 0 : index
    %c0_4 = arith.constant 0 : index
    %6 = vector.load %arg1[%c0_2, %c0_3, %c0_4] : memref<1x16x1xi32, #tpu.memory_space<vmem>>, vector<1x16x1xi32>
    %7 = vector.shape_cast %6 : vector<1x16x1xi32> to vector<16x1xi32>
    %8 = vector.broadcast %7 : vector<16x1xi32> to vector<16x16xi32>
    %9 = arith.addi %5, %8 : vector<16x16xi32>
    %c0_5 = arith.constant 0 : index
    %c0_6 = arith.constant 0 : index
    %c0_7 = arith.constant 0 : index
    %10 = vector.load %arg2[%c0_5, %c0_6, %c0_7] : memref<1x1x16xi32, #tpu.memory_space<vmem>>, vector<1x1x16xi32>
    %11 = vector.shape_cast %10 : vector<1x1x16xi32> to vector<1x16xi32>
    %12 = vector.broadcast %11 : vector<1x16xi32> to vector<16x16xi32>
    %13 = arith.addi %9, %12 : vector<16x16xi32>
    %c0_i32 = arith.constant 0 : i32
    %14 = vector.broadcast %c0_i32 : i32 to vector<16x16xi32>
    %15 = arith.cmpi sgt, %13, %14 : vector<16x16xi32>
    %cst = arith.constant 1.000000e+00 : f32
    %cst_8 = arith.constant 0.000000e+00 : f32
    %16 = vector.broadcast %cst : f32 to vector<16x16xf32>
    %17 = vector.broadcast %cst_8 : f32 to vector<16x16xf32>
    %18 = arith.select %15, %16, %17 : vector<16x16xi1>, vector<16x16xf32>
    %cst_9 = arith.constant dense<0x7F800000> : vector<16xf32>
    %19 = vector.multi_reduction <minimumf>, %18, %cst_9 [1] : vector<16x16xf32> to vector<16xf32>
    %cst_10 = arith.constant 0.000000e+00 : f32
    %20 = vector.broadcast %cst_10 : f32 to vector<16xf32>
    %21 = arith.cmpf ogt, %19, %20 : vector<16xf32>
    %22 = vector.shape_cast %21 : vector<16xi1> to vector<16x1xi1>
    %cst_11 = arith.constant dense<true> : vector<16x1xi1>
    %23 = arith.xori %22, %cst_11 : vector<16x1xi1>
    %24 = vector.broadcast %23 : vector<16x1xi1> to vector<16x16xi1>
    %25 = arith.andi %15, %24 : vector<16x16xi1>
    %cst_12 = arith.constant 0xFF800000 : f32
    %cst_13 = arith.constant 0.000000e+00 : f32
    %26 = vector.broadcast %cst_12 : f32 to vector<16x16xf32>
    %27 = vector.broadcast %cst_13 : f32 to vector<16x16xf32>
    %28 = arith.select %25, %26, %27 : vector<16x16xi1>, vector<16x16xf32>
    %cst_14 = arith.constant 0.000000e+00 : f32
    %cst_15 = arith.constant 0.176776692 : f32
    %29 = vector.broadcast %cst_14 : f32 to vector<16x1xf32>
    %30 = vector.broadcast %cst_15 : f32 to vector<16x1xf32>
    %31 = arith.select %22, %29, %30 : vector<16x1xi1>, vector<16x1xf32>
    %32 = arith.truncf %1 : vector<16x128xf32> to vector<16x128xbf16>
    %c0_16 = arith.constant 0 : index
    %c0_17 = arith.constant 0 : index
    %33 = vector.load %arg4[%c0_16, %c0_17] : memref<128x1536xbf16, #tpu.memory_space<vmem>>, vector<128x1536xbf16>
    %cst_18 = arith.constant dense<0.000000e+00> : vector<16x1536xf32>
    %34 = tpu.matmul %32, %33, %cst_18 {dimension_numbers = #tpu.dot_dimension_numbers<[1], [0], [0], [1], [0, 0, 1, 1], [], []>} : vector<16x128xbf16>, vector<128x1536xbf16>, vector<16x1536xf32> -> vector<16x1536xf32>
    %c0_19 = arith.constant 0 : index
    %c0_20 = arith.constant 0 : index
    %35 = vector.load %arg5[%c0_19, %c0_20] : memref<1x1536xf32, #tpu.memory_space<vmem>>, vector<1x1536xf32>
    %36 = vector.broadcast %35 : vector<1x1536xf32> to vector<16x1536xf32>
    %37 = arith.addf %34, %36 : vector<16x1536xf32>
    %38 = arith.truncf %37 : vector<16x1536xf32> to vector<16x1536xbf16>
    %c0_21 = arith.constant 0 : index
    %c0_22 = arith.constant 0 : index
    %39 = vector.load %arg15[%c0_21, %c0_22] : memref<16x1536xbf16, #tpu.memory_space<vmem>>, vector<16x1536xbf16>
    tpu.vector_store %arg15[%c0_21, %c0_22], %38 {strides = array<i32>} : memref<16x1536xbf16, #tpu.memory_space<vmem>>, vector<16x1536xbf16>,
    %cst_23 = arith.constant 0.000000e+00 : f32
    %40 = vector.broadcast %cst_23 : f32 to vector<16x128xf32>
    %c0_i32_24 = arith.constant 0 : i32
    %c128_i32 = arith.constant 128 : i32
    %41 = arith.muli %c0_i32_24, %c128_i32 : i32
    %42 = tpu.assume_multiple %41, 128 : i32
    %c128_i32_25 = arith.constant 128 : i32
    %43 = arith.muli %c0_i32_24, %c128_i32_25 : i32
    %c512_i32 = arith.constant 512 : i32
    %44 = arith.addi %c512_i32, %43 : i32
    %45 = tpu.assume_multiple %44, 128 : i32
    %c128_i32_26 = arith.constant 128 : i32
    %46 = arith.muli %c0_i32_24, %c128_i32_26 : i32
    %c1024_i32 = arith.constant 1024 : i32
    %47 = arith.addi %c1024_i32, %46 : i32
    %48 = tpu.assume_multiple %47, 128 : i32
    %c0_27 = arith.constant 0 : index
    %49 = arith.index_cast %42 : i32 to index
    %50 = vector.load %arg15[%c0_27, %49] : memref<16x1536xbf16, #tpu.memory_space<vmem>>, vector<16x128xbf16>
    %c0_28 = arith.constant 0 : index
    %51 = arith.index_cast %45 : i32 to index
    %52 = vector.load %arg15[%c0_28, %51] : memref<16x1536xbf16, #tpu.memory_space<vmem>>, vector<16x128xbf16>
    %c0_29 = arith.constant 0 : index
    %53 = arith.index_cast %48 : i32 to index
    %54 = vector.load %arg15[%c0_29, %53] : memref<16x1536xbf16, #tpu.memory_space<vmem>>, vector<16x128xbf16>
    %cst_30 = arith.constant dense<0.000000e+00> : vector<16x16xf32>
    %55 = tpu.matmul %50, %52, %cst_30 {dimension_numbers = #tpu.dot_dimension_numbers<[1], [1], [0], [0], [0, 0, 1, 0], [], []>} : vector<16x128xbf16>, vector<16x128xbf16>, vector<16x16xf32> -> vector<16x16xf32>
    %56 = vector.broadcast %31 : vector<16x1xf32> to vector<16x16xf32>
    %57 = arith.mulf %55, %56 : vector<16x16xf32>
    %58 = arith.addf %57, %28 : vector<16x16xf32>
    %cst_31 = arith.constant dense<0xFF800000> : vector<16xf32>
    %59 = vector.multi_reduction <maximumf>, %58, %cst_31 [1] : vector<16x16xf32> to vector<16xf32>
    %60 = vector.shape_cast %59 : vector<16xf32> to vector<16x1xf32>
    %61 = vector.broadcast %60 : vector<16x1xf32> to vector<16x16xf32>
    %62 = arith.subf %58, %61 : vector<16x16xf32>
    %63 = math.exp %62 : vector<16x16xf32>
    %cst_32 = arith.constant dense<0.000000e+00> : vector<16xf32>
    %64 = vector.multi_reduction <add>, %63, %cst_32 [1] : vector<16x16xf32> to vector<16xf32>
    %65 = vector.shape_cast %64 : vector<16xf32> to vector<16x1xf32>
    %66 = tpu.reciprocal %65 {approx = true} : vector<16x1xf32> -> vector<16x1xf32>
    %67 = vector.broadcast %66 : vector<16x1xf32> to vector<16x16xf32>
    %68 = arith.mulf %63, %67 : vector<16x16xf32>
    %69 = arith.truncf %68 : vector<16x16xf32> to vector<16x16xbf16>
    %cst_33 = arith.constant dense<0.000000e+00> : vector<16x128xf32>
    %70 = tpu.matmul %69, %54, %cst_33 {dimension_numbers = #tpu.dot_dimension_numbers<[1], [0], [0], [1], [0, 0, 1, 1], [], []>} : vector<16x16xbf16>, vector<16x128xbf16>, vector<16x128xf32> -> vector<16x128xf32>
    %71 = arith.addf %40, %70 : vector<16x128xf32>
    %c1_i32 = arith.constant 1 : i32
    %c128_i32_34 = arith.constant 128 : i32
    %72 = arith.muli %c1_i32, %c128_i32_34 : i32
    %73 = tpu.assume_multiple %72, 128 : i32
    %c128_i32_35 = arith.constant 128 : i32
    %74 = arith.muli %c1_i32, %c128_i32_35 : i32
    %c512_i32_36 = arith.constant 512 : i32
    %75 = arith.addi %c512_i32_36, %74 : i32
    %76 = tpu.assume_multiple %75, 128 : i32
    %c128_i32_37 = arith.constant 128 : i32
    %77 = arith.muli %c1_i32, %c128_i32_37 : i32
    %c1024_i32_38 = arith.constant 1024 : i32
    %78 = arith.addi %c1024_i32_38, %77 : i32
    %79 = tpu.assume_multiple %78, 128 : i32
    %c0_39 = arith.constant 0 : index
    %80 = arith.index_cast %73 : i32 to index
    %81 = vector.load %arg15[%c0_39, %80] : memref<16x1536xbf16, #tpu.memory_space<vmem>>, vector<16x128xbf16>
    %c0_40 = arith.constant 0 : index
    %82 = arith.index_cast %76 : i32 to index
    %83 = vector.load %arg15[%c0_40, %82] : memref<16x1536xbf16, #tpu.memory_space<vmem>>, vector<16x128xbf16>
    %c0_41 = arith.constant 0 : index
    %84 = arith.index_cast %79 : i32 to index
    %85 = vector.load %arg15[%c0_41, %84] : memref<16x1536xbf16, #tpu.memory_space<vmem>>, vector<16x128xbf16>
    %cst_42 = arith.constant dense<0.000000e+00> : vector<16x16xf32>
    %86 = tpu.matmul %81, %83, %cst_42 {dimension_numbers = #tpu.dot_dimension_numbers<[1], [1], [0], [0], [0, 0, 1, 0], [], []>} : vector<16x128xbf16>, vector<16x128xbf16>, vector<16x16xf32> -> vector<16x16xf32>
    %87 = vector.broadcast %31 : vector<16x1xf32> to vector<16x16xf32>
    %88 = arith.mulf %86, %87 : vector<16x16xf32>
    %89 = arith.addf %88, %28 : vector<16x16xf32>
    %cst_43 = arith.constant dense<0xFF800000> : vector<16xf32>
    %90 = vector.multi_reduction <maximumf>, %89, %cst_43 [1] : vector<16x16xf32> to vector<16xf32>
    %91 = vector.shape_cast %90 : vector<16xf32> to vector<16x1xf32>
    %92 = vector.broadcast %91 : vector<16x1xf32> to vector<16x16xf32>
    %93 = arith.subf %89, %92 : vector<16x16xf32>
    %94 = math.exp %93 : vector<16x16xf32>
    %cst_44 = arith.constant dense<0.000000e+00> : vector<16xf32>
    %95 = vector.multi_reduction <add>, %94, %cst_44 [1] : vector<16x16xf32> to vector<16xf32>
    %96 = vector.shape_cast %95 : vector<16xf32> to vector<16x1xf32>
    %97 = tpu.reciprocal %96 {approx = true} : vector<16x1xf32> -> vector<16x1xf32>
    %98 = vector.broadcast %97 : vector<16x1xf32> to vector<16x16xf32>
    %99 = arith.mulf %94, %98 : vector<16x16xf32>
    %100 = arith.truncf %99 : vector<16x16xf32> to vector<16x16xbf16>
    %cst_45 = arith.constant dense<0.000000e+00> : vector<16x128xf32>
    %101 = tpu.matmul %100, %85, %cst_45 {dimension_numbers = #tpu.dot_dimension_numbers<[1], [0], [0], [1], [0, 0, 1, 1], [], []>} : vector<16x16xbf16>, vector<16x128xbf16>, vector<16x128xf32> -> vector<16x128xf32>
    %102 = arith.addf %71, %101 : vector<16x128xf32>
    %c2_i32 = arith.constant 2 : i32
    %c128_i32_46 = arith.constant 128 : i32
    %103 = arith.muli %c2_i32, %c128_i32_46 : i32
    %104 = tpu.assume_multiple %103, 128 : i32
    %c128_i32_47 = arith.constant 128 : i32
    %105 = arith.muli %c2_i32, %c128_i32_47 : i32
    %c512_i32_48 = arith.constant 512 : i32
    %106 = arith.addi %c512_i32_48, %105 : i32
    %107 = tpu.assume_multiple %106, 128 : i32
    %c128_i32_49 = arith.constant 128 : i32
    %108 = arith.muli %c2_i32, %c128_i32_49 : i32
    %c1024_i32_50 = arith.constant 1024 : i32
    %109 = arith.addi %c1024_i32_50, %108 : i32
    %110 = tpu.assume_multiple %109, 128 : i32
    %c0_51 = arith.constant 0 : index
    %111 = arith.index_cast %104 : i32 to index
    %112 = vector.load %arg15[%c0_51, %111] : memref<16x1536xbf16, #tpu.memory_space<vmem>>, vector<16x128xbf16>
    %c0_52 = arith.constant 0 : index
    %113 = arith.index_cast %107 : i32 to index
    %114 = vector.load %arg15[%c0_52, %113] : memref<16x1536xbf16, #tpu.memory_space<vmem>>, vector<16x128xbf16>
    %c0_53 = arith.constant 0 : index
    %115 = arith.index_cast %110 : i32 to index
    %116 = vector.load %arg15[%c0_53, %115] : memref<16x1536xbf16, #tpu.memory_space<vmem>>, vector<16x128xbf16>
    %cst_54 = arith.constant dense<0.000000e+00> : vector<16x16xf32>
    %117 = tpu.matmul %112, %114, %cst_54 {dimension_numbers = #tpu.dot_dimension_numbers<[1], [1], [0], [0], [0, 0, 1, 0], [], []>} : vector<16x128xbf16>, vector<16x128xbf16>, vector<16x16xf32> -> vector<16x16xf32>
    %118 = vector.broadcast %31 : vector<16x1xf32> to vector<16x16xf32>
    %119 = arith.mulf %117, %118 : vector<16x16xf32>
    %120 = arith.addf %119, %28 : vector<16x16xf32>
    %cst_55 = arith.constant dense<0xFF800000> : vector<16xf32>
    %121 = vector.multi_reduction <maximumf>, %120, %cst_55 [1] : vector<16x16xf32> to vector<16xf32>
    %122 = vector.shape_cast %121 : vector<16xf32> to vector<16x1xf32>
    %123 = vector.broadcast %122 : vector<16x1xf32> to vector<16x16xf32>
    %124 = arith.subf %120, %123 : vector<16x16xf32>
    %125 = math.exp %124 : vector<16x16xf32>
    %cst_56 = arith.constant dense<0.000000e+00> : vector<16xf32>
    %126 = vector.multi_reduction <add>, %125, %cst_56 [1] : vector<16x16xf32> to vector<16xf32>
    %127 = vector.shape_cast %126 : vector<16xf32> to vector<16x1xf32>
    %128 = tpu.reciprocal %127 {approx = true} : vector<16x1xf32> -> vector<16x1xf32>
    %129 = vector.broadcast %128 : vector<16x1xf32> to vector<16x16xf32>
    %130 = arith.mulf %125, %129 : vector<16x16xf32>
    %131 = arith.truncf %130 : vector<16x16xf32> to vector<16x16xbf16>
    %cst_57 = arith.constant dense<0.000000e+00> : vector<16x128xf32>
    %132 = tpu.matmul %131, %116, %cst_57 {dimension_numbers = #tpu.dot_dimension_numbers<[1], [0], [0], [1], [0, 0, 1, 1], [], []>} : vector<16x16xbf16>, vector<16x128xbf16>, vector<16x128xf32> -> vector<16x128xf32>
    %133 = arith.addf %102, %132 : vector<16x128xf32>
    %c3_i32 = arith.constant 3 : i32
    %c128_i32_58 = arith.constant 128 : i32
    %134 = arith.muli %c3_i32, %c128_i32_58 : i32
    %135 = tpu.assume_multiple %134, 128 : i32
    %c128_i32_59 = arith.constant 128 : i32
    %136 = arith.muli %c3_i32, %c128_i32_59 : i32
    %c512_i32_60 = arith.constant 512 : i32
    %137 = arith.addi %c512_i32_60, %136 : i32
    %138 = tpu.assume_multiple %137, 128 : i32
    %c128_i32_61 = arith.constant 128 : i32
    %139 = arith.muli %c3_i32, %c128_i32_61 : i32
    %c1024_i32_62 = arith.constant 1024 : i32
    %140 = arith.addi %c1024_i32_62, %139 : i32
    %141 = tpu.assume_multiple %140, 128 : i32
    %c0_63 = arith.constant 0 : index
    %142 = arith.index_cast %135 : i32 to index
    %143 = vector.load %arg15[%c0_63, %142] : memref<16x1536xbf16, #tpu.memory_space<vmem>>, vector<16x128xbf16>
    %c0_64 = arith.constant 0 : index
    %144 = arith.index_cast %138 : i32 to index
    %145 = vector.load %arg15[%c0_64, %144] : memref<16x1536xbf16, #tpu.memory_space<vmem>>, vector<16x128xbf16>
    %c0_65 = arith.constant 0 : index
    %146 = arith.index_cast %141 : i32 to index
    %147 = vector.load %arg15[%c0_65, %146] : memref<16x1536xbf16, #tpu.memory_space<vmem>>, vector<16x128xbf16>
    %cst_66 = arith.constant dense<0.000000e+00> : vector<16x16xf32>
    %148 = tpu.matmul %143, %145, %cst_66 {dimension_numbers = #tpu.dot_dimension_numbers<[1], [1], [0], [0], [0, 0, 1, 0], [], []>} : vector<16x128xbf16>, vector<16x128xbf16>, vector<16x16xf32> -> vector<16x16xf32>
    %149 = vector.broadcast %31 : vector<16x1xf32> to vector<16x16xf32>
    %150 = arith.mulf %148, %149 : vector<16x16xf32>
    %151 = arith.addf %150, %28 : vector<16x16xf32>
    %cst_67 = arith.constant dense<0xFF800000> : vector<16xf32>
    %152 = vector.multi_reduction <maximumf>, %151, %cst_67 [1] : vector<16x16xf32> to vector<16xf32>
    %153 = vector.shape_cast %152 : vector<16xf32> to vector<16x1xf32>
    %154 = vector.broadcast %153 : vector<16x1xf32> to vector<16x16xf32>
    %155 = arith.subf %151, %154 : vector<16x16xf32>
    %156 = math.exp %155 : vector<16x16xf32>
    %cst_68 = arith.constant dense<0.000000e+00> : vector<16xf32>
    %157 = vector.multi_reduction <add>, %156, %cst_68 [1] : vector<16x16xf32> to vector<16xf32>
    %158 = vector.shape_cast %157 : vector<16xf32> to vector<16x1xf32>
    %159 = tpu.reciprocal %158 {approx = true} : vector<16x1xf32> -> vector<16x1xf32>
    %160 = vector.broadcast %159 : vector<16x1xf32> to vector<16x16xf32>
    %161 = arith.mulf %156, %160 : vector<16x16xf32>
    %162 = arith.truncf %161 : vector<16x16xf32> to vector<16x16xbf16>
    %cst_69 = arith.constant dense<0.000000e+00> : vector<16x128xf32>
    %163 = tpu.matmul %162, %147, %cst_69 {dimension_numbers = #tpu.dot_dimension_numbers<[1], [0], [0], [1], [0, 0, 1, 1], [], []>} : vector<16x16xbf16>, vector<16x128xbf16>, vector<16x128xf32> -> vector<16x128xf32>
    %164 = arith.addf %133, %163 : vector<16x128xf32>
    %c4_i32 = arith.constant 4 : i32
    %cst_70 = arith.constant 2.500000e-01 : f32
    %165 = vector.broadcast %cst_70 : f32 to vector<16x128xf32>
    %166 = arith.mulf %164, %165 : vector<16x128xf32>
    %167 = arith.addf %1, %166 : vector<16x128xf32>
    %c0_71 = arith.constant 0 : index
    %c0_72 = arith.constant 0 : index
    %168 = vector.load %arg6[%c0_71, %c0_72] : memref<1x128xf32, #tpu.memory_space<vmem>>, vector<1x128xf32>
    %c0_73 = arith.constant 0 : index
    %c0_74 = arith.constant 0 : index
    %169 = vector.load %arg7[%c0_73, %c0_74] : memref<1x128xf32, #tpu.memory_space<vmem>>, vector<1x128xf32>
    %cst_75 = arith.constant dense<0.000000e+00> : vector<16xf32>
    %170 = vector.multi_reduction <add>, %167, %cst_75 [1] : vector<16x128xf32> to vector<16xf32>
    %171 = vector.shape_cast %170 : vector<16xf32> to vector<16x1xf32>
    %cst_76 = arith.constant 1.280000e+02 : f32
    %172 = vector.broadcast %cst_76 : f32 to vector<16x1xf32>
    %173 = arith.divf %171, %172 : vector<16x1xf32>
    %174 = vector.broadcast %173 : vector<16x1xf32> to vector<16x128xf32>
    %175 = arith.subf %167, %174 : vector<16x128xf32>
    %176 = arith.mulf %175, %175 : vector<16x128xf32>
    %cst_77 = arith.constant dense<0.000000e+00> : vector<16xf32>
    %177 = vector.multi_reduction <add>, %176, %cst_77 [1] : vector<16x128xf32> to vector<16xf32>
    %178 = vector.shape_cast %177 : vector<16xf32> to vector<16x1xf32>
    %cst_78 = arith.constant 1.280000e+02 : f32
    %179 = vector.broadcast %cst_78 : f32 to vector<16x1xf32>
    %180 = arith.divf %178, %179 : vector<16x1xf32>
    %181 = vector.broadcast %173 : vector<16x1xf32> to vector<16x128xf32>
    %182 = arith.subf %167, %181 : vector<16x128xf32>
    %cst_79 = arith.constant 9.99999974E-6 : f32
    %183 = vector.broadcast %cst_79 : f32 to vector<16x1xf32>
    %184 = arith.addf %180, %183 : vector<16x1xf32>
    %185 = math.rsqrt %184 : vector<16x1xf32>
    %186 = vector.broadcast %185 : vector<16x1xf32> to vector<16x128xf32>
    %187 = arith.mulf %182, %186 : vector<16x128xf32>
    %188 = vector.broadcast %168 : vector<1x128xf32> to vector<16x128xf32>
    %189 = arith.mulf %187, %188 : vector<16x128xf32>
    %190 = vector.broadcast %169 : vector<1x128xf32> to vector<16x128xf32>
    %191 = arith.addf %189, %190 : vector<16x128xf32>
    %192 = arith.truncf %191 : vector<16x128xf32> to vector<16x128xbf16>
    %c0_80 = arith.constant 0 : index
    %c0_81 = arith.constant 0 : index
    %193 = vector.load %arg10[%c0_80, %c0_81] : memref<128x512xbf16, #tpu.memory_space<vmem>>, vector<128x512xbf16>
    %cst_82 = arith.constant dense<0.000000e+00> : vector<16x512xf32>
    %194 = tpu.matmul %192, %193, %cst_82 {dimension_numbers = #tpu.dot_dimension_numbers<[1], [0], [0], [1], [0, 0, 1, 1], [], []>} : vector<16x128xbf16>, vector<128x512xbf16>, vector<16x512xf32> -> vector<16x512xf32>
    %c0_83 = arith.constant 0 : index
    %c0_84 = arith.constant 0 : index
    %195 = vector.load %arg11[%c0_83, %c0_84] : memref<1x512xf32, #tpu.memory_space<vmem>>, vector<1x512xf32>
    %196 = vector.broadcast %195 : vector<1x512xf32> to vector<16x512xf32>
    %197 = arith.addf %194, %196 : vector<16x512xf32>
    %cst_85 = arith.constant 0.000000e+00 : f32
    %198 = vector.broadcast %cst_85 : f32 to vector<16x512xf32>
    %199 = arith.maximumf %197, %198 : vector<16x512xf32>
    %200 = arith.truncf %199 : vector<16x512xf32> to vector<16x512xbf16>
    %c0_86 = arith.constant 0 : index
    %c0_87 = arith.constant 0 : index
    %201 = vector.load %arg12[%c0_86, %c0_87] : memref<512x128xbf16, #tpu.memory_space<vmem>>, vector<512x128xbf16>
    %cst_88 = arith.constant dense<0.000000e+00> : vector<16x128xf32>
    %202 = tpu.matmul %200, %201, %cst_88 {dimension_numbers = #tpu.dot_dimension_numbers<[1], [0], [0], [1], [0, 0, 1, 1], [], []>} : vector<16x512xbf16>, vector<512x128xbf16>, vector<16x128xf32> -> vector<16x128xf32>
    %c0_89 = arith.constant 0 : index
    %c0_90 = arith.constant 0 : index
    %203 = vector.load %arg13[%c0_89, %c0_90] : memref<1x128xf32, #tpu.memory_space<vmem>>, vector<1x128xf32>
    %204 = vector.broadcast %203 : vector<1x128xf32> to vector<16x128xf32>
    %205 = arith.addf %202, %204 : vector<16x128xf32>
    %206 = arith.addf %191, %205 : vector<16x128xf32>
    %c0_91 = arith.constant 0 : index
    %c0_92 = arith.constant 0 : index
    %207 = vector.load %arg8[%c0_91, %c0_92] : memref<1x128xf32, #tpu.memory_space<vmem>>, vector<1x128xf32>
    %c0_93 = arith.constant 0 : index
    %c0_94 = arith.constant 0 : index
    %208 = vector.load %arg9[%c0_93, %c0_94] : memref<1x128xf32, #tpu.memory_space<vmem>>, vector<1x128xf32>
    %cst_95 = arith.constant dense<0.000000e+00> : vector<16xf32>
    %209 = vector.multi_reduction <add>, %206, %cst_95 [1] : vector<16x128xf32> to vector<16xf32>
    %210 = vector.shape_cast %209 : vector<16xf32> to vector<16x1xf32>
    %cst_96 = arith.constant 1.280000e+02 : f32
    %211 = vector.broadcast %cst_96 : f32 to vector<16x1xf32>
    %212 = arith.divf %210, %211 : vector<16x1xf32>
    %213 = vector.broadcast %212 : vector<16x1xf32> to vector<16x128xf32>
    %214 = arith.subf %206, %213 : vector<16x128xf32>
    %215 = arith.mulf %214, %214 : vector<16x128xf32>
    %cst_97 = arith.constant dense<0.000000e+00> : vector<16xf32>
    %216 = vector.multi_reduction <add>, %215, %cst_97 [1] : vector<16x128xf32> to vector<16xf32>
    %217 = vector.shape_cast %216 : vector<16xf32> to vector<16x1xf32>
    %cst_98 = arith.constant 1.280000e+02 : f32
    %218 = vector.broadcast %cst_98 : f32 to vector<16x1xf32>
    %219 = arith.divf %217, %218 : vector<16x1xf32>
    %220 = vector.broadcast %212 : vector<16x1xf32> to vector<16x128xf32>
    %221 = arith.subf %206, %220 : vector<16x128xf32>
    %cst_99 = arith.constant 9.99999974E-6 : f32
    %222 = vector.broadcast %cst_99 : f32 to vector<16x1xf32>
    %223 = arith.addf %219, %222 : vector<16x1xf32>
    %224 = math.rsqrt %223 : vector<16x1xf32>
    %225 = vector.broadcast %224 : vector<16x1xf32> to vector<16x128xf32>
    %226 = arith.mulf %221, %225 : vector<16x128xf32>
    %227 = vector.broadcast %207 : vector<1x128xf32> to vector<16x128xf32>
    %228 = arith.mulf %226, %227 : vector<16x128xf32>
    %229 = vector.broadcast %208 : vector<1x128xf32> to vector<16x128xf32>
    %230 = arith.addf %228, %229 : vector<16x128xf32>
    %c0_100 = arith.constant 0 : index
    %c0_101 = arith.constant 0 : index
    %c0_102 = arith.constant 0 : index
    %231 = vector.load %arg14[%c0_100, %c0_101, %c0_102] : memref<1x16x128xf32, #tpu.memory_space<vmem>>, vector<1x16x128xf32>
    %232 = vector.shape_cast %231 : vector<1x16x128xf32> to vector<16x128xf32>
    %233 = vector.shape_cast %230 : vector<16x128xf32> to vector<1x16x128xf32>
    tpu.vector_store %arg14[%c0_100, %c0_101, %c0_102], %233 {strides = array<i32>} : memref<1x16x128xf32, #tpu.memory_space<vmem>>, vector<1x16x128xf32>,
    return
  }
  func.func @transform_0(%arg0: i32) -> (i32, i32, i32) {
    %c0_i32 = arith.constant 0 : i32
    %c0_i32_0 = arith.constant 0 : i32
    %c0_i32_1 = arith.constant 0 : i32
    return %arg0, %c0_i32, %c0_i32_0 : i32, i32, i32
  }
  func.func @transform_1(%arg0: i32) -> (i32, i32, i32) {
    %c0_i32 = arith.constant 0 : i32
    %c0_i32_0 = arith.constant 0 : i32
    %c0_i32_1 = arith.constant 0 : i32
    return %arg0, %c0_i32, %c0_i32_0 : i32, i32, i32
  }
  func.func @transform_2(%arg0: i32) -> (i32, i32, i32) {
    %c0_i32 = arith.constant 0 : i32
    %c0_i32_0 = arith.constant 0 : i32
    %c0_i32_1 = arith.constant 0 : i32
    return %arg0, %c0_i32, %c0_i32_0 : i32, i32, i32
  }
  func.func @transform_3(%arg0: i32) -> (i32, i32) {
    %c0_i32 = arith.constant 0 : i32
    %c0_i32_0 = arith.constant 0 : i32
    %c0_i32_1 = arith.constant 0 : i32
    return %c0_i32, %c0_i32_0 : i32, i32
  }
  func.func @transform_4(%arg0: i32) -> (i32, i32) {
    %c0_i32 = arith.constant 0 : i32
    %c0_i32_0 = arith.constant 0 : i32
    %c0_i32_1 = arith.constant 0 : i32
    return %c0_i32, %c0_i32_0 : i32, i32
  }
  func.func @transform_5(%arg0: i32) -> (i32, i32) {
    %c0_i32 = arith.constant 0 : i32
    %c0_i32_0 = arith.constant 0 : i32
    %c0_i32_1 = arith.constant 0 : i32
    return %c0_i32, %c0_i32_0 : i32, i32
  }
  func.func @transform_6(%arg0: i32) -> (i32, i32) {
    %c0_i32 = arith.constant 0 : i32
    %c0_i32_0 = arith.constant 0 : i32
    %c0_i32_1 = arith.constant 0 : i32
    return %c0_i32, %c0_i32_0 : i32, i32
  }
  func.func @transform_7(%arg0: i32) -> (i32, i32) {
    %c0_i32 = arith.constant 0 : i32
    %c0_i32_0 = arith.constant 0 : i32
    %c0_i32_1 = arith.constant 0 : i32
    return %c0_i32, %c0_i32_0 : i32, i32
  }
  func.func @transform_8(%arg0: i32) -> (i32, i32) {
    %c0_i32 = arith.constant 0 : i32
    %c0_i32_0 = arith.constant 0 : i32
    %c0_i32_1 = arith.constant 0 : i32
    return %c0_i32, %c0_i32_0 : i32, i32
  }
  func.func @transform_9(%arg0: i32) -> (i32, i32) {
    %c0_i32 = arith.constant 0 : i32
    %c0_i32_0 = arith.constant 0 : i32
    %c0_i32_1 = arith.constant 0 : i32
    return %c0_i32, %c0_i32_0 : i32, i32
  }
  func.func @transform_10(%arg0: i32) -> (i32, i32) {
    %c0_i32 = arith.constant 0 : i32
    %c0_i32_0 = arith.constant 0 : i32
    %c0_i32_1 = arith.constant 0 : i32
    return %c0_i32, %c0_i32_0 : i32, i32
  }
  func.func @transform_11(%arg0: i32) -> (i32, i32) {
    %c0_i32 = arith.constant 0 : i32
    %c0_i32_0 = arith.constant 0 : i32
    %c0_i32_1 = arith.constant 0 : i32
    return %c0_i32, %c0_i32_0 : i32, i32
  }
  func.func @transform_12(%arg0: i32) -> (i32, i32) {
    %c0_i32 = arith.constant 0 : i32
    %c0_i32_0 = arith.constant 0 : i32
    %c0_i32_1 = arith.constant 0 : i32
    return %c0_i32, %c0_i32_0 : i32, i32
  }
  func.func @transform_13(%arg0: i32) -> (i32, i32, i32) {
    %c0_i32 = arith.constant 0 : i32
    %c0_i32_0 = arith.constant 0 : i32
    %c0_i32_1 = arith.constant 0 : i32
    return %arg0, %c0_i32, %c0_i32_0 : i32, i32, i32
  }
}

</mosaic_0001>

<bundles_post_ra>
// kernel: transformer_forward.5
= control target key start
LH: loop header
LB: loop body
LE: loop exit
PB: predicated region body
PF: predicated region fallthrough
CT: control target
= control target key end

     0   :  { %s287_s0 = inlined_call_operand.vmem [shape: bf16[32,128], index: 0, kind: input, shape index: {}]   ;;  %s288_s1 = inlined_call_operand.vmem [shape: bf16[128,128], index: 1, kind: input, shape index: {}]   ;;  %s289_s2 = inlined_call_operand.vmem [shape: f32[1,128], index: 2, kind: input, shape index: {}]   ;;  %s290_s3 = inlined_call_operand.hbm [shape: f32[32,128], index: 3, kind: output, shape index: {}]  }
   0x1   :  { %v189_v0 = vld [vmem:[%s288_s1 + $0x38] sm:$0xff]  ;;  %v188_v1 = vld [vmem:[%s288_s1 + $0x30] sm:$0xff] }
   0x2   :  { %99 = vmatpush.bf16.msra.mxu0 %v189_v0  ;;  %190 = vmatpush.bf16.msra.mxu1 %v189_v0 }
   0x3   :  { %8 = vsyncpa [#allocation3], 0  ;;  %v187_v2 = vld [vmem:[%s288_s1 + $0x28] sm:$0xff]  ;;  %v186_v3 = vld [vmem:[%s288_s1 + $0x20] sm:$0xff]  ;;  %s230_s10 = smov 8  }
   0x4   :  { %v185_v4 = vld [vmem:[%s288_s1 + $0x18] sm:$0xff]  ;;  %v184_v5 = vld [vmem:[%s288_s1 + $0x10] sm:$0xff]  ;;  %v183_v6 = vld [vmem:[%s288_s1 + $0x8] sm:$0xff] }
   0x5   :  { %v182_v7 = vld [vmem:[%s288_s1] sm:$0xff]  ;;  %v181_v9 = vld [vmem:[%s287_s0 + $0x8] sm:$0xff]  ;;  %s228_s1 = smov [#allocation2]  }
   0x6   :  { %100 = vmatpush.bf16.msra.mxu0 %v188_v1  ;;  %191 = vmatpush.bf16.msra.mxu1 %v188_v1  ;;  %v180_v8 = vld [vmem:[%s287_s0] sm:$0xff]  ;;  %s126_s7 = sshll.u32 %s228_s1, 4  ;;  %s128_s0 = sshll.u32 %s290_s3, 4  ;;  %s127_s7 = int_to_ptr.vmem [resolvable:$true] %s126_s7  ;;  %s129_s0 = int_to_ptr.hbm [resolvable:$true] %s128_s0 }
   0x7   :  { %v201_v10 = vld [vmem:[%s289_s2] ss:$0 sm:$0xff]  ;;  %s229_s2 = smov 128  }
   0xa   :  { %101 = vmatpush.bf16.msra.mxu0 %v187_v2  ;;  %192 = vmatpush.bf16.msra.mxu1 %v187_v2 }
   0xe   :  { %102 = vmatpush.bf16.msra.mxu0 %v186_v3  ;;  %193 = vmatpush.bf16.msra.mxu1 %v186_v3 }
  0x12   :  { %103 = vmatpush.bf16.msra.mxu0 %v185_v4  ;;  %194 = vmatpush.bf16.msra.mxu1 %v185_v4 }
  0x16   :  { %104 = vmatpush.bf16.msra.mxu0 %v184_v5  ;;  %195 = vmatpush.bf16.msra.mxu1 %v184_v5 }
  0x1a   :  { %105 = vmatpush.bf16.msra.mxu0 %v183_v6  ;;  %196 = vmatpush.bf16.msra.mxu1 %v183_v6 }
  0x1e   :  { %106 = vmatpush.bf16.msra.mxu0 %v182_v7  ;;  %197 = vmatpush.bf16.msra.mxu1 %v182_v7 }
  0x21   :  { %107 = vmatmul.bf16.vlgmr.msra.gmra.mxu0 %v180_v8  ;;  %112 = vmatmul.bf16.vlgmr.msra.gmra.mxu1 %v181_v9 }
  0x9e   :  { %v108_v11 = vpop.f32.mrf.mxu0  ;;  %v113_v12 = vpop.f32.mrf.mxu1 }
  0x9f   :  { %v109_v13 = vadd.f32 %v201_v10, %v108_v11  ;;  %v114_v14 = vadd.f32 %v201_v10, %v113_v12 }
  0xa1   :  { %118 = vst [vmem:[#allocation2] sm:$0xff] %v109_v13 }
  0xa2   :  { %120 = vst [vmem:[#allocation2 + $0x10] sm:$0xff] %v114_v14 }
  0xa6   :  { %v110_v15 = vpop.f32.mrf.mxu0  ;;  %v115_v16 = vpop.f32.mrf.mxu1 }
  0xa7   :  { %v111_v17 = vadd.f32 %v201_v10, %v110_v15  ;;  %v116_v18 = vadd.f32 %v201_v10, %v115_v16 }
  0xa9   :  { %119 = vst [vmem:[#allocation2 + $0x8] sm:$0xff] %v111_v17 }
  0xaa   :  { %121 = vst [vmem:[#allocation2 + $0x18] sm:$0xff] %v116_v18 }
  0xab   :  { %134 = dma.vmem_to_hbm [thread:$0]  %s127_s7, 512, %s129_s0, [#allocation3], %s229_s2, %s229_s2, %s230_s10  }
  0xac   :  { %226 = dma.done.wait [#allocation3], 512  }
  0xad   :  { %227 = vsyncadd [#allocation3], 4294966784 }
  0xae   :  { %139 = vsyncpa [#allocation3], 1 }

// kernel: transformer_forward.3
= control target key start
LH: loop header
LB: loop body
LE: loop exit
PB: predicated region body
PF: predicated region fallthrough
CT: control target
= control target key end

     0   :  { %18 = vsyncpa [#allocation4], 0  ;;  %s4051_s0 = inlined_call_operand.vmem [shape: s32[2,16,1], index: 0, kind: input, shape index: {}]   ;;  %s4052_s1 = inlined_call_operand.vmem [shape: s32[2,1,16], index: 1, kind: input, shape index: {}]   ;;  %s4053_s2 = inlined_call_operand.vmem [shape: f32[2,16,128], index: 2, kind: input, shape index: {}]   ;;  %s4054_s3 = inlined_call_operand.hbm [shape: bf16[128,1536], index: 3, kind: input, shape index: {}]   ;;  %s4055_s4 = inlined_call_operand.vmem [shape: f32[1,1536], index: 4, kind: input, shape index: {}]   ;;  %s4056_s5 = inlined_call_operand.vmem [shape: f32[1,128], index: 5, kind: input, shape index: {}]   ;;  %s4057_s6 = inlined_call_operand.vmem [shape: f32[1,128], index: 6, kind: input, shape index: {}]   ;;  %s4058_s7 = inlined_call_operand.vmem [shape: f32[1,128], index: 7, kind: input, shape index: {}]   ;;  %s4059_s8 = inlined_call_operand.vmem [shape: f32[1,128], index: 8, kind: input, shape index: {}]   ;;  %s4060_s9 = inlined_call_operand.vmem [shape: bf16[128,512], index: 9, kind: input, shape index: {}]   ;;  %s4061_s10 = inlined_call_operand.vmem [shape: f32[1,512], index: 10, kind: input, shape index: {}]   ;;  %s4062_s11 = inlined_call_operand.hbm [shape: bf16[512,128], index: 11, kind: input, shape index: {}]   ;;  %s4063_s12 = inlined_call_operand.vmem [shape: f32[1,128], index: 12, kind: input, shape index: {}]   ;;  %s4064_s13 = inlined_call_operand.vmem [shape: f32[2,16,128], index: 13, kind: output, shape index: {}]  }
   0x1   :  { %19 = vsyncpa [#allocation6], 0  ;;  %s3634_s25 = smov 0  }
   0x2 LB: > { %s355_s28 = sshll.u32 %s4054_s3, 4  ;;  %s2504_s29 = sadd.s32 4294967295, %s3551_s25   ;;  %s3551_s25 = sphi %s3634_s25, %s25_s25   ;;  %s356_s28 = int_to_ptr.hbm [resolvable:$true] %s355_s28 }
   0x3   : > { %p2506_p0 = scmp.ge.s32.totalorder %s3551_s25, 1  ;;  %p344_p1 = scmp.lt.s32.totalorder %s3551_s25, 3 }
   0x4   : > { %p3403_p2 = scmp.eq.s32.totalorder %s2504_s29, 0  ;;  %s3553_s14 = smov [#allocation3]  }
   0x5   : > { %p3645_p3 = pnand %p2506_p0, %p344_p1  ;;  %s357_s15 = sshll.u32 %s3553_s14, 4  ;;  %s358_s15 = int_to_ptr.vmem [resolvable:$true] %s357_s15 }
   0x6   : > { %s390_s18 = sshll.u32 %s4062_s11, 4  ;;  %s3554_s19 = smov [#allocation5]   ;;  %s391_s18 = int_to_ptr.hbm [resolvable:$true] %s390_s18 }
   0x7   : > { %p3396_p4 = pneg %p3645_p3  ;;  %s392_s20 = sshll.u32 %s3554_s19, 4  ;;  %s393_s20 = int_to_ptr.vmem [resolvable:$true] %s392_s20 }
   0x8   : > { %s3555_s21 = smov 768   ;;  %s3556_s22 = smov 48  }
   0x9   : > { %p3397_p5 = pnand %p3403_p2, %p3396_p4  ;;  %s3557_s23 = smov 64  }
   0xa   : > { %s3558_s24 = smov 4   ;;  %433 = sbr.rel (%p3645_p3) target bundleno = 2028 (0x7ec), region = 72 }
   0xb   : > { %3399 = dma.hbm_to_vmem [thread:$0]  (!%p3397_p5), %s356_s28, 12288, %s358_s15, [#allocation4], %s3555_s21, %s3555_s21, %s3556_s22  }
   0xc   : > { %3402 = dma.hbm_to_vmem [thread:$0]  (!%p3397_p5), %s391_s18, 4096, %s393_s20, [#allocation6], %s3557_s23, %s3557_s23, %s3558_s24  }
   0xf   : > { %3542 = dma.done.wait (%p3403_p2), [#allocation4], 12288  }
  0x10   : > { %3544 = vsyncadd (%p3403_p2), [#allocation4], 4294955008 }
  0x11   : > { %3546 = dma.done.wait (%p3403_p2), [#allocation6], 4096  }
  0x12   : > { %3548 = vsyncadd (%p3403_p2), [#allocation6], 4294963200  ;;  %p491_p6 = scmp.lt.s32.totalorder %s2504_s29, 1  ;;  %v3559_v0 = vmov 0   ;;  %v2857_v2 = vld [vmem:[#allocation3 + $0x2a0] sm:$0xf] }
  0x13   : > { %3426 = vset.pattern.permute.xlu0 %v3559_v0  ;;  %v3306_v3 = vld [vmem:[#allocation3 + $0x2cc] sm:$0xf0]  ;;  %v3300_v4 = vld [vmem:[#allocation3 + $0x2a4] sm:$0xf]  ;;  %v2859_v6 = vld [vmem:[#allocation3 + $0x2d0] sm:$0xf0] }
  0x14   : > { %s4067_s29 = smov (!%p491_p6, %s2504_s29), 1  ;;  %v2858_v5 = vor.u32 %v3306_v3, %v2857_v2  ;;  %v2809_v7 = vld [vmem:[#allocation3 + $0x240] sm:$0xf]  ;;  %v3294_v8 = vld [vmem:[#allocation3 + $0x26c] sm:$0xf0]  ;;  %v2862_v9 = vor.u32 %v3300_v4, %v2859_v6  ;;  %vm539_vm2 = vcmask 130048  }
  0x15   : > { %s3665_s26 = sshll.u32 %s4067_s29, 4  ;;  %v3288_v10 = vld [vmem:[#allocation3 + $0x244] sm:$0xf]  ;;  %v2811_v11 = vld [vmem:[#allocation3 + $0x270] sm:$0xf0]  ;;  %v2810_v12 = vor.u32 %v3294_v8, %v2809_v7  ;;  %s498_s19 = scalar_lea.vmem %s4052_s1, %s4067_s29  ;;  %vm3561_vm6 = vmmov 1  }
  0x16   : > { %s495_s30 = scalar_lea.vmem %s4051_s0, %s3665_s26  ;;  %1165 = vmatpush.bf16.msra.mxu0 %v2858_v5  ;;  %v2761_v14 = vld [vmem:[#allocation3 + $0x1e0] sm:$0xf]  ;;  %v3282_v15 = vld [vmem:[#allocation3 + $0x20c] sm:$0xf0]  ;;  %1179 = vmatpush.bf16.msra.mxu1 %v2862_v9  ;;  %v2814_v16 = vor.u32 %v3288_v10, %v2811_v11  ;;  %v3276_v17 = vld [vmem:[#allocation3 + $0x1e4] sm:$0xf]  ;;  %s3675_s16 = scalar_lea.vmem %s4053_s2, %s3665_s26 }
  0x17   : > { %v521_v1 = vld [vmem:[%s495_s30] sm:$0xff]  ;;  %v522_v13 = vld [vmem:[%s495_s30 + $0x8] sm:$0xff]  ;;  %v3307_v19 = vld [vmem:[#allocation3 + $0x2d4] sm:$0xf0]  ;;  %v2762_v25 = vor.u32 %v3282_v15, %v2761_v14  ;;  %s508_s18 = scalar_lea.vmem %s4064_s13, %s3665_s26 }
  0x18   : > { %524 = vperm.xlu0 %3426, %v521_v1   ;;  %v2865_v18 = vld [vmem:[#allocation3 + $0x2a8] sm:$0xf]  ;;  %v2763_v20 = vld [vmem:[#allocation3 + $0x210] sm:$0xf0]  ;;  %v3301_v22 = vld [vmem:[#allocation3 + $0x2ac] sm:$0xf] }
  0x19   : > { %v2866_v21 = vor.u32 %v3307_v19, %v2865_v18  ;;  %v2867_v23 = vld [vmem:[#allocation3 + $0x2d8] sm:$0xf0]  ;;  %v2817_v26 = vld [vmem:[#allocation3 + $0x248] sm:$0xf]  ;;  %v3295_v27 = vld [vmem:[#allocation3 + $0x274] sm:$0xf0]  ;;  %v2766_v29 = vor.u32 %v3276_v17, %v2763_v20 }
  0x1a   : > { %v2870_v24 = vor.u32 %v3301_v22, %v2867_v23  ;;  %1166 = vmatpush.bf16.msra.mxu0 %v2810_v12  ;;  %v3289_v28 = vld [vmem:[#allocation3 + $0x24c] sm:$0xf]  ;;  %1180 = vmatpush.bf16.msra.mxu1 %v2814_v16  ;;  %v2713_v30 = vld [vmem:[#allocation3 + $0x180] sm:$0xf]  ;;  %v3270_v31 = vld [vmem:[#allocation3 + $0x1ac] sm:$0xf0]  ;;  %v2818_v32 = vor.u32 %v3295_v27, %v2817_v26 }
  0x1b   : > { %1193 = vmatpush.bf16.msra.mxu2 %v2866_v21  ;;  %v2819_v33 = vld [vmem:[#allocation3 + $0x278] sm:$0xf0]  ;;  %v3264_v34 = vld [vmem:[#allocation3 + $0x184] sm:$0xf]  ;;  %v2715_v35 = vld [vmem:[#allocation3 + $0x1b0] sm:$0xf0]  ;;  %v2714_v41 = vor.u32 %v3270_v31, %v2713_v30 }
  0x1c   : > { %1207 = vmatpush.bf16.msra.mxu3 %v2870_v24  ;;  %v2822_v36 = vor.u32 %v3289_v28, %v2819_v33  ;;  %v2769_v37 = vld [vmem:[#allocation3 + $0x1e8] sm:$0xf]  ;;  %v3283_v38 = vld [vmem:[#allocation3 + $0x214] sm:$0xf0]  ;;  %v3277_v39 = vld [vmem:[#allocation3 + $0x1ec] sm:$0xf]  ;;  %v2718_v44 = vor.u32 %v3264_v34, %v2715_v35 }
  0x1d   : > { %v2771_v40 = vld [vmem:[#allocation3 + $0x218] sm:$0xf0]  ;;  %v2665_v42 = vld [vmem:[#allocation3 + $0x120] sm:$0xf]  ;;  %v2770_v43 = vor.u32 %v3283_v38, %v2769_v37  ;;  %v3258_v45 = vld [vmem:[#allocation3 + $0x14c] sm:$0xf0] }
  0x1e   : > { %1167 = vmatpush.bf16.msra.mxu0 %v2762_v25  ;;  %1181 = vmatpush.bf16.msra.mxu1 %v2766_v29  ;;  %v2721_v46 = vld [vmem:[#allocation3 + $0x188] sm:$0xf]  ;;  %v3271_v47 = vld [vmem:[#allocation3 + $0x1b4] sm:$0xf0]  ;;  %v3252_v48 = vld [vmem:[#allocation3 + $0x124] sm:$0xf]  ;;  %v2774_v50 = vor.u32 %v3277_v39, %v2771_v40  ;;  %v2666_v53 = vor.u32 %v3258_v45, %v2665_v42 }
  0x1f   : > { %1194 = vmatpush.bf16.msra.mxu2 %v2818_v32  ;;  %v2667_v49 = vld [vmem:[#allocation3 + $0x150] sm:$0xf0]  ;;  %v3265_v51 = vld [vmem:[#allocation3 + $0x18c] sm:$0xf]  ;;  %v2723_v52 = vld [vmem:[#allocation3 + $0x1b8] sm:$0xf0]  ;;  %v2722_v55 = vor.u32 %v3271_v47, %v2721_v46 }
  0x20   : > { %527 = vperm.xlu0 %3426, %v522_v13   ;;  %1208 = vmatpush.bf16.msra.mxu3 %v2822_v36  ;;  %v2617_v54 = vld [vmem:[#allocation3 + $0xc0] sm:$0xf]  ;;  %v2670_v56 = vor.u32 %v3252_v48, %v2667_v49  ;;  %v3246_v57 = vld [vmem:[#allocation3 + $0xec] sm:$0xf0]  ;;  %v2673_v58 = vld [vmem:[#allocation3 + $0x128] sm:$0xf]  ;;  %v2726_v62 = vor.u32 %v3265_v51, %v2723_v52 }
  0x21   : > { %v3259_v59 = vld [vmem:[#allocation3 + $0x154] sm:$0xf0]  ;;  %v3240_v60 = vld [vmem:[#allocation3 + $0xc4] sm:$0xf]  ;;  %v2619_v61 = vld [vmem:[#allocation3 + $0xf0] sm:$0xf0]  ;;  %v2618_v2 = vor.u32 %v3246_v57, %v2617_v54 }
  0x22   : > { %1168 = vmatpush.bf16.msra.mxu0 %v2714_v41  ;;  %1182 = vmatpush.bf16.msra.mxu1 %v2718_v44  ;;  %v3253_v63 = vld [vmem:[#allocation3 + $0x12c] sm:$0xf]  ;;  %v2675_v1 = vld [vmem:[#allocation3 + $0x158] sm:$0xf0]  ;;  %v2569_v3 = vld [vmem:[#allocation3 + $0x60] sm:$0xf]  ;;  %v2674_v4 = vor.u32 %v3259_v59, %v2673_v58  ;;  %v2622_v5 = vor.u32 %v3240_v60, %v2619_v61 }
  0x23   : > { %1195 = vmatpush.bf16.msra.mxu2 %v2770_v43  ;;  %v3234_v6 = vld [vmem:[#allocation3 + $0x8c] sm:$0xf0]  ;;  %v2625_v7 = vld [vmem:[#allocation3 + $0xc8] sm:$0xf]  ;;  %v3247_v8 = vld [vmem:[#allocation3 + $0xf4] sm:$0xf0]  ;;  %v2678_v11 = vor.u32 %v3253_v63, %v2675_v1 }
  0x24   : > { %1209 = vmatpush.bf16.msra.mxu3 %v2774_v50  ;;  %v3228_v9 = vld [vmem:[#allocation3 + $0x64] sm:$0xf]  ;;  %v2571_v10 = vld [vmem:[#allocation3 + $0x90] sm:$0xf0]  ;;  %v3241_v12 = vld [vmem:[#allocation3 + $0xcc] sm:$0xf]  ;;  %v2570_v14 = vor.u32 %v3234_v6, %v2569_v3  ;;  %v2626_v18 = vor.u32 %v3247_v8, %v2625_v7 }
  0x25   : > { %v2627_v13 = vld [vmem:[#allocation3 + $0xf8] sm:$0xf0]  ;;  %v2521_v15 = vld [vmem:[#allocation3] sm:$0xf]  ;;  %v3222_v16 = vld [vmem:[#allocation3 + $0x2c] sm:$0xf0]  ;;  %v2574_v19 = vor.u32 %v3228_v9, %v2571_v10 }
  0x26   : > { %1169 = vmatpush.bf16.msra.mxu0 %v2666_v53  ;;  %1183 = vmatpush.bf16.msra.mxu1 %v2670_v56  ;;  %v3216_v17 = vld [vmem:[#allocation3 + $0x4] sm:$0xf]  ;;  %v2523_v20 = vld [vmem:[#allocation3 + $0x30] sm:$0xf0]  ;;  %v2577_v21 = vld [vmem:[#allocation3 + $0x68] sm:$0xf]  ;;  %v2630_v26 = vor.u32 %v3241_v12, %v2627_v13  ;;  %v2522_v32 = vor.u32 %v3222_v16, %v2521_v15 }
  0x27   : > { %1196 = vmatpush.bf16.msra.mxu2 %v2722_v55  ;;  %v3235_v22 = vld [vmem:[#allocation3 + $0x94] sm:$0xf0]  ;;  %v2873_v23 = vld [vmem:[#allocation3 + $0x2b0] sm:$0xf]  ;;  %v3308_v24 = vld [vmem:[#allocation3 + $0x2dc] sm:$0xf0]  ;;  %v2526_v35 = vor.u32 %v3216_v17, %v2523_v20 }
  0x28   : > { %1210 = vmatpush.bf16.msra.mxu3 %v2726_v62  ;;  %v3302_v25 = vld [vmem:[#allocation3 + $0x2b4] sm:$0xf]  ;;  %v2875_v27 = vld [vmem:[#allocation3 + $0x2e0] sm:$0xf0]  ;;  %v3229_v28 = vld [vmem:[#allocation3 + $0x6c] sm:$0xf]  ;;  %v2578_v34 = vor.u32 %v3235_v22, %v2577_v21  ;;  %v2874_v36 = vor.u32 %v3308_v24, %v2873_v23 }
  0x29   : > { %v2579_v29 = vld [vmem:[#allocation3 + $0x98] sm:$0xf0]  ;;  %v510_v30 = vld [vmem:[%s3675_s16] sm:$0xff]  ;;  %v511_v31 = vld [vmem:[%s3675_s16 + $0x8] sm:$0xff]  ;;  %v2878_v40 = vor.u32 %v3302_v25, %v2875_v27 }
  0x2a   : > { %1170 = vmatpush.bf16.msra.mxu0 %v2618_v2  ;;  %1184 = vmatpush.bf16.msra.mxu1 %v2622_v5  ;;  %v2825_v33 = vld [vmem:[#allocation3 + $0x250] sm:$0xf]  ;;  %v3296_v37 = vld [vmem:[#allocation3 + $0x27c] sm:$0xf0]  ;;  %v2529_v38 = vld [vmem:[#allocation3 + $0x8] sm:$0xf]  ;;  %v2582_v42 = vor.u32 %v3229_v28, %v2579_v29  ;;  %v3679_v45 = vpack.c.bf16 %v511_v31, %v510_v30 }
  0x2b   : > { %1197 = vmatpush.bf16.msra.mxu2 %v2674_v4  ;;  %v3223_v39 = vld [vmem:[#allocation3 + $0x34] sm:$0xf0]  ;;  %v3290_v41 = vld [vmem:[#allocation3 + $0x254] sm:$0xf]  ;;  %v3309_v44 = vld [vmem:[#allocation3 + $0x2e4] sm:$0xf0]  ;;  %v2826_v52 = vor.u32 %v3296_v37, %v2825_v33 }
  0x2c   : > { %1211 = vmatpush.bf16.msra.mxu3 %v2678_v11  ;;  %v2881_v43 = vld [vmem:[#allocation3 + $0x2b8] sm:$0xf]  ;;  %v2827_v46 = vld [vmem:[#allocation3 + $0x280] sm:$0xf0]  ;;  %v3217_v47 = vld [vmem:[#allocation3 + $0xc] sm:$0xf]  ;;  %v2530_v49 = vor.u32 %v3223_v39, %v2529_v38 }
  0x2d   : > { %v2531_v48 = vld [vmem:[#allocation3 + $0x38] sm:$0xf0]  ;;  %v2883_v51 = vld [vmem:[#allocation3 + $0x2e8] sm:$0xf0]  ;;  %v2777_v53 = vld [vmem:[#allocation3 + $0x1f0] sm:$0xf]  ;;  %v2882_v54 = vor.u32 %v3309_v44, %v2881_v43  ;;  %v2830_v55 = vor.u32 %v3290_v41, %v2827_v46 }
  0x2e   : > { %1171 = vmatpush.bf16.msra.mxu0 %v2570_v14  ;;  %1185 = vmatpush.bf16.msra.mxu1 %v2574_v19  ;;  %v3303_v50 = vld [vmem:[#allocation3 + $0x2bc] sm:$0xf]  ;;  %v3284_v56 = vld [vmem:[#allocation3 + $0x21c] sm:$0xf0]  ;;  %v2534_v57 = vor.u32 %v3217_v47, %v2531_v48  ;;  %v2833_v58 = vld [vmem:[#allocation3 + $0x258] sm:$0xf] }
  0x2f   : > { %1198 = vmatpush.bf16.msra.mxu2 %v2626_v18  ;;  %v3297_v59 = vld [vmem:[#allocation3 + $0x284] sm:$0xf0]  ;;  %v3278_v60 = vld [vmem:[#allocation3 + $0x1f4] sm:$0xf]  ;;  %v2779_v61 = vld [vmem:[#allocation3 + $0x220] sm:$0xf0]  ;;  %v2886_v62 = vor.u32 %v3303_v50, %v2883_v51  ;;  %v2778_v2 = vor.u32 %v3284_v56, %v2777_v53 }
  0x30   : > { %1212 = vmatpush.bf16.msra.mxu3 %v2630_v26  ;;  %v3291_v63 = vld [vmem:[#allocation3 + $0x25c] sm:$0xf]  ;;  %v2835_v1 = vld [vmem:[#allocation3 + $0x288] sm:$0xf0]  ;;  %v2729_v3 = vld [vmem:[#allocation3 + $0x190] sm:$0xf]  ;;  %v2834_v4 = vor.u32 %v3297_v59, %v2833_v58  ;;  %v2782_v5 = vor.u32 %v3278_v60, %v2779_v61 }
  0x31   : > { %v3272_v6 = vld [vmem:[#allocation3 + $0x1bc] sm:$0xf0]  ;;  %v2785_v7 = vld [vmem:[#allocation3 + $0x1f8] sm:$0xf]  ;;  %v3285_v8 = vld [vmem:[#allocation3 + $0x224] sm:$0xf0]  ;;  %v2838_v11 = vor.u32 %v3291_v63, %v2835_v1 }
  0x32   : > { %1172 = vmatpush.bf16.msra.mxu0 %v2522_v32  ;;  %1186 = vmatpush.bf16.msra.mxu1 %v2526_v35  ;;  %v3266_v9 = vld [vmem:[#allocation3 + $0x194] sm:$0xf]  ;;  %v2731_v10 = vld [vmem:[#allocation3 + $0x1c0] sm:$0xf0]  ;;  %v3279_v12 = vld [vmem:[#allocation3 + $0x1fc] sm:$0xf]  ;;  %v2730_v14 = vor.u32 %v3272_v6, %v2729_v3  ;;  %v2786_v16 = vor.u32 %v3285_v8, %v2785_v7 }
  0x33   : > { %1199 = vmatpush.bf16.msra.mxu2 %v2578_v34  ;;  %v2787_v13 = vld [vmem:[#allocation3 + $0x228] sm:$0xf0]  ;;  %v2681_v15 = vld [vmem:[#allocation3 + $0x130] sm:$0xf]  ;;  %v2734_v17 = vor.u32 %v3266_v9, %v2731_v10  ;;  %v3260_v18 = vld [vmem:[#allocation3 + $0x15c] sm:$0xf0]  ;;  %v512_v10 = vlaneseq }
  0x34   : > { %1213 = vmatpush.bf16.msra.mxu3 %v2582_v42  ;;  %v2737_v19 = vld [vmem:[#allocation3 + $0x198] sm:$0xf]  ;;  %v3273_v20 = vld [vmem:[#allocation3 + $0x1c4] sm:$0xf0]  ;;  %v3254_v21 = vld [vmem:[#allocation3 + $0x134] sm:$0xf]  ;;  %v2790_v23 = vor.u32 %v3279_v12, %v2787_v13  ;;  %v2682_v28 = vor.u32 %v3260_v18, %v2681_v15 }
  0x35   : > { %1173 = vmatmul.bf16.vlgmr.msra.gmra.mxu0 %v3679_v45  ;;  %1187 = vmatmul.bf16.vlgmr.msra.gmra.mxu1 %v3679_v45  ;;  %v2683_v22 = vld [vmem:[#allocation3 + $0x160] sm:$0xf0]  ;;  %v3267_v24 = vld [vmem:[#allocation3 + $0x19c] sm:$0xf]  ;;  %v2633_v25 = vld [vmem:[#allocation3 + $0xd0] sm:$0xf]  ;;  %v2738_v29 = vor.u32 %v3273_v20, %v2737_v19 }
  0x36   : > { %1221 = vmatpush.bf16.msrb.mxu0 %v2874_v36  ;;  %1235 = vmatpush.bf16.msrb.mxu1 %v2878_v40  ;;  %v3248_v26 = vld [vmem:[#allocation3 + $0xfc] sm:$0xf0]  ;;  %v2739_v27 = vld [vmem:[#allocation3 + $0x1c8] sm:$0xf0]  ;;  %v2686_v30 = vor.u32 %v3254_v21, %v2683_v22  ;;  %v2689_v31 = vld [vmem:[#allocation3 + $0x138] sm:$0xf] }
  0x37   : > { %1200 = vmatpush.bf16.msra.mxu2 %v2530_v49  ;;  %v3261_v32 = vld [vmem:[#allocation3 + $0x164] sm:$0xf0]  ;;  %v3242_v33 = vld [vmem:[#allocation3 + $0xd4] sm:$0xf]  ;;  %v2635_v34 = vld [vmem:[#allocation3 + $0x100] sm:$0xf0]  ;;  %v2742_v35 = vor.u32 %v3267_v24, %v2739_v27  ;;  %v2634_v38 = vor.u32 %v3248_v26, %v2633_v25 }
  0x38   : > { %1214 = vmatpush.bf16.msra.mxu3 %v2534_v57  ;;  %v3255_v36 = vld [vmem:[#allocation3 + $0x13c] sm:$0xf]  ;;  %v2691_v37 = vld [vmem:[#allocation3 + $0x168] sm:$0xf0]  ;;  %v2585_v39 = vld [vmem:[#allocation3 + $0x70] sm:$0xf]  ;;  %v2690_v40 = vor.u32 %v3261_v32, %v2689_v31  ;;  %v2638_v41 = vor.u32 %v3242_v33, %v2635_v34 }
  0x39   : > { %v3236_v42 = vld [vmem:[#allocation3 + $0x9c] sm:$0xf0]  ;;  %v2641_v43 = vld [vmem:[#allocation3 + $0xd8] sm:$0xf]  ;;  %v3249_v44 = vld [vmem:[#allocation3 + $0x104] sm:$0xf0]  ;;  %v2694_v48 = vor.u32 %v3255_v36, %v2691_v37 }
  0x3a   : > { %1222 = vmatpush.bf16.msrb.mxu0 %v2826_v52  ;;  %1236 = vmatpush.bf16.msrb.mxu1 %v2830_v55  ;;  %v3230_v46 = vld [vmem:[#allocation3 + $0x74] sm:$0xf]  ;;  %v2587_v47 = vld [vmem:[#allocation3 + $0xa0] sm:$0xf0]  ;;  %v3243_v49 = vld [vmem:[#allocation3 + $0xdc] sm:$0xf]  ;;  %v2586_v51 = vor.u32 %v3236_v42, %v2585_v39  ;;  %v2642_v53 = vor.u32 %v3249_v44, %v2641_v43 }
  0x3b   : > { %1249 = vmatpush.bf16.msrb.mxu2 %v2882_v54  ;;  %1215 = vmatmul.bf16.vlgmr.msra.gmra.mxu3 %v3679_v45  ;;  %v2643_v50 = vld [vmem:[#allocation3 + $0x108] sm:$0xf0]  ;;  %v2537_v52 = vld [vmem:[#allocation3 + $0x10] sm:$0xf]  ;;  %v2590_v54 = vor.u32 %v3230_v46, %v2587_v47  ;;  %v3224_v55 = vld [vmem:[#allocation3 + $0x3c] sm:$0xf0] }
  0x3c   : > { %1263 = vmatpush.bf16.msrb.mxu3 %v2886_v62  ;;  %1201 = vmatmul.bf16.vlgmr.msra.gmra.mxu2 %v3679_v45  ;;  %v2593_v56 = vld [vmem:[#allocation3 + $0x78] sm:$0xf]  ;;  %v3237_v57 = vld [vmem:[#allocation3 + $0xa4] sm:$0xf0]  ;;  %v3218_v58 = vld [vmem:[#allocation3 + $0x14] sm:$0xf]  ;;  %v2646_v60 = vor.u32 %v3243_v49, %v2643_v50  ;;  %v2538_v63 = vor.u32 %v3224_v55, %v2537_v52 }
  0x3d   : > { %v2539_v59 = vld [vmem:[#allocation3 + $0x40] sm:$0xf0]  ;;  %v3231_v61 = vld [vmem:[#allocation3 + $0x7c] sm:$0xf]  ;;  %v2595_v62 = vld [vmem:[#allocation3 + $0xa8] sm:$0xf0]  ;;  %v2594_v1 = vor.u32 %v3237_v57, %v2593_v56 }
  0x3e   : > { %1223 = vmatpush.bf16.msrb.mxu0 %v2778_v2  ;;  %1237 = vmatpush.bf16.msrb.mxu1 %v2782_v5  ;;  %v2542_v2 = vor.u32 %v3218_v58, %v2539_v59  ;;  %v2545_v3 = vld [vmem:[#allocation3 + $0x18] sm:$0xf]  ;;  %v2598_v5 = vor.u32 %v3231_v61, %v2595_v62  ;;  %v3219_v6 = vld [vmem:[#allocation3 + $0x1c] sm:$0xf]  ;;  %v2547_v7 = vld [vmem:[#allocation3 + $0x48] sm:$0xf0] }
  0x3f   : > { %1250 = vmatpush.bf16.msrb.mxu2 %v2834_v4  ;;  %v3225_v4 = vld [vmem:[#allocation3 + $0x44] sm:$0xf0]  ;;  %v2550_v9 = vor.u32 %v3219_v6, %v2547_v7  ;;  %v516_v12 = vand.u32 127, %v512_v10  ;;  %v3560_v19 = vmov 0.0   ;;  %v2891_v31 = vld [vmem:[#allocation3 + $0x2f0] sm:$0xf0] }
  0x40   : > { %1264 = vmatpush.bf16.msrb.mxu3 %v2838_v11  ;;  %v2546_v8 = vor.u32 %v3225_v4, %v2545_v3  ;;  %v513_v11 = vshrl.u32 %v512_v10, 7  ;;  %v2841_v33 = vld [vmem:[#allocation3 + $0x260] sm:$0xf]  ;;  %v3298_v34 = vld [vmem:[#allocation3 + $0x28c] sm:$0xf0] }
  0x41   : > { %v2842_v36 = vor.u32 %v3298_v34, %v2841_v33  ;;  %v2843_v37 = vld [vmem:[#allocation3 + $0x290] sm:$0xf0]  ;;  %v2793_v39 = vld [vmem:[#allocation3 + $0x200] sm:$0xf]  ;;  %v3274_v47 = vld [vmem:[#allocation3 + $0x1cc] sm:$0xf0] }
  0x42   : > { %1224 = vmatpush.bf16.msrb.mxu0 %v2730_v14  ;;  %1238 = vmatpush.bf16.msrb.mxu1 %v2734_v17  ;;  %vm517_vm0 = vcmp.gt.s32.totalorder %v516_v12, %v513_v11  ;;  %v3427_v14 = vld [vmem:[%s498_s19] ss:$0 sm:$0xff]  ;;  %v514_v15 = vadd.s32 8, %v513_v11  ;;  %v2795_v43 = vld [vmem:[#allocation3 + $0x230] sm:$0xf0] }
  0x43   : > { %1251 = vmatpush.bf16.msrb.mxu2 %v2786_v16  ;;  %v519_v13 = vsel %vm517_vm0, 1, %v3559_v0  ;;  %v2745_v46 = vld [vmem:[#allocation3 + $0x1a0] sm:$0xf]  ;;  %v2747_v50 = vld [vmem:[#allocation3 + $0x1d0] sm:$0xf0] }
  0x44   : > { %1265 = vmatpush.bf16.msrb.mxu3 %v2790_v23  ;;  %vm518_vm1 = vcmp.gt.s32.totalorder %v516_v12, %v514_v15  ;;  %v2746_v49 = vor.u32 %v3274_v47, %v2745_v46  ;;  %v3262_v52 = vld [vmem:[#allocation3 + $0x16c] sm:$0xf0]  ;;  %v2699_v55 = vld [vmem:[#allocation3 + $0x170] sm:$0xf0]  ;;  %v2649_v58 = vld [vmem:[#allocation3 + $0xe0] sm:$0xf] }
  0x45   : > { %v520_v21 = vsel %vm518_vm1, 1, %v3559_v0  ;;  %v3304_v0 = vld [vmem:[#allocation3 + $0x2c4] sm:$0xf]  ;;  %v3250_v59 = vld [vmem:[#allocation3 + $0x10c] sm:$0xf0] }
  0x46   : > { %1225 = vmatpush.bf16.msrb.mxu0 %v2682_v28  ;;  %1239 = vmatpush.bf16.msrb.mxu1 %v2686_v30  ;;  %v2889_v28 = vld [vmem:[#allocation3 + $0x2c0] sm:$0xf]  ;;  %v2894_v32 = vor.u32 %v3304_v0, %v2891_v31  ;;  %v2650_v61 = vor.u32 %v3250_v59, %v2649_v58  ;;  %v2651_v62 = vld [vmem:[#allocation3 + $0x110] sm:$0xf0]  ;;  %v3238_v3 = vld [vmem:[#allocation3 + $0xac] sm:$0xf0] }
  0x47   : > { %1252 = vmatpush.bf16.msrb.mxu2 %v2738_v29  ;;  %v3310_v29 = vld [vmem:[#allocation3 + $0x2ec] sm:$0xf0]  ;;  %v3232_v4 = vld [vmem:[#allocation3 + $0x84] sm:$0xf]  ;;  %v2603_v6 = vld [vmem:[#allocation3 + $0xb0] sm:$0xf0] }
  0x48   : > { %1266 = vmatpush.bf16.msrb.mxu3 %v2742_v35  ;;  %v2890_v30 = vor.u32 %v3310_v29, %v2889_v28  ;;  %v3292_v35 = vld [vmem:[#allocation3 + $0x264] sm:$0xf]  ;;  %v2606_v7 = vor.u32 %v3232_v4, %v2603_v6  ;;  %v2553_v10 = vld [vmem:[#allocation3 + $0x20] sm:$0xf]  ;;  %v3226_v11 = vld [vmem:[#allocation3 + $0x4c] sm:$0xf0] }
  0x49   : > { %v3220_v12 = vld [vmem:[#allocation3 + $0x24] sm:$0xf] }
  0x4a   : > { %1226 = vmatpush.bf16.msrb.mxu0 %v2634_v38  ;;  %1240 = vmatpush.bf16.msrb.mxu1 %v2638_v41  ;;  %v2846_v38 = vor.u32 %v3292_v35, %v2843_v37  ;;  %v3280_v41 = vld [vmem:[#allocation3 + $0x204] sm:$0xf] }
  0x4b   : > { %1253 = vmatpush.bf16.msrb.mxu2 %v2690_v40  ;;  %v3286_v40 = vld [vmem:[#allocation3 + $0x22c] sm:$0xf0]  ;;  %v2798_v44 = vor.u32 %v3280_v41, %v2795_v43 }
  0x4c   : > { %1267 = vmatpush.bf16.msrb.mxu3 %v2694_v48  ;;  %v2794_v42 = vor.u32 %v3286_v40, %v2793_v39  ;;  %v3268_v48 = vld [vmem:[#allocation3 + $0x1a4] sm:$0xf] }
  0x4e   : > { %1227 = vmatpush.bf16.msrb.mxu0 %v2586_v51  ;;  %1241 = vmatpush.bf16.msrb.mxu1 %v2590_v54  ;;  %v2697_v51 = vld [vmem:[#allocation3 + $0x140] sm:$0xf]  ;;  %v3256_v54 = vld [vmem:[#allocation3 + $0x144] sm:$0xf] }
  0x4f   : > { %1254 = vmatpush.bf16.msrb.mxu2 %v2642_v53  ;;  %v2750_v53 = vor.u32 %v3268_v48, %v2747_v50  ;;  %v2698_v56 = vor.u32 %v3262_v52, %v2697_v51  ;;  %v2702_v57 = vor.u32 %v3256_v54, %v2699_v55 }
  0x50   : > { %1268 = vmatpush.bf16.msrb.mxu3 %v2646_v60  ;;  %v3244_v60 = vld [vmem:[#allocation3 + $0xe4] sm:$0xf] }
  0x52   : > { %1228 = vmatpush.bf16.msrb.mxu0 %v2538_v63  ;;  %1242 = vmatpush.bf16.msrb.mxu1 %v2542_v2  ;;  %v2654_v63 = vor.u32 %v3244_v60, %v2651_v62  ;;  %v2601_v2 = vld [vmem:[#allocation3 + $0x80] sm:$0xf] }
  0x53   : > { %1255 = vmatpush.bf16.msrb.mxu2 %v2594_v1  ;;  %v3717_v1 = vld [vmem:[%s4055_s4] sm:$0xff] }
  0x54   : > { %1269 = vmatpush.bf16.msrb.mxu3 %v2598_v5  ;;  %v2602_v5 = vor.u32 %v3238_v3, %v2601_v2  ;;  %v665_v40 = vperm.slane %v3717_v1, 4  ;;  %v666_v41 = vperm.slane %v3717_v1, 5  ;;  %v667_v48 = vperm.slane %v3717_v1, 6 }
  0x55   : > { %1229 = vmatmul.bf16.vlgmr.msrb.gmra.mxu0 %v3679_v45  ;;  %1243 = vmatmul.bf16.vlgmr.msrb.gmra.mxu1 %v3679_v45  ;;  %v668_v52 = vperm.slane %v3717_v1, 7 }
  0x56   : > { %1277 = vmatpush.bf16.msra.mxu0 %v2890_v30  ;;  %1291 = vmatpush.bf16.msra.mxu1 %v2894_v32  ;;  %v664_v30 = vperm.slane %v3717_v1, 3 }
  0x57   : > { %1256 = vmatpush.bf16.msrb.mxu2 %v2546_v8  ;;  %v661_v8 = vperm.slane %v3717_v1, 0 }
  0x58   : > { %1270 = vmatpush.bf16.msrb.mxu3 %v2550_v9  ;;  %v662_v9 = vperm.slane %v3717_v1, 1 }
  0x5a   : > { %1257 = vmatmul.bf16.vlgmr.msrb.gmra.mxu2 %v3679_v45  ;;  %1278 = vmatpush.bf16.msra.mxu0 %v2842_v36 }
  0x5b   : > { %1271 = vmatmul.bf16.vlgmr.msrb.gmra.mxu3 %v3679_v45  ;;  %1292 = vmatpush.bf16.msra.mxu1 %v2846_v38 }
  0x5e   : > { %1279 = vmatpush.bf16.msra.mxu0 %v2794_v42 }
  0x5f   : > { %1293 = vmatpush.bf16.msra.mxu1 %v2798_v44 }
  0x62   : > { %1280 = vmatpush.bf16.msra.mxu0 %v2746_v49 }
  0x63   : > { %1294 = vmatpush.bf16.msra.mxu1 %v2750_v53 }
  0x66   : > { %1281 = vmatpush.bf16.msra.mxu0 %v2698_v56 }
  0x67   : > { %1295 = vmatpush.bf16.msra.mxu1 %v2702_v57 }
  0x6a   : > { %1282 = vmatpush.bf16.msra.mxu0 %v2650_v61 }
  0x6b   : > { %1296 = vmatpush.bf16.msra.mxu1 %v2654_v63 }
  0x6e   : > { %1283 = vmatpush.bf16.msra.mxu0 %v2602_v5 }
  0x6f   : > { %1297 = vmatpush.bf16.msra.mxu1 %v2606_v7 }
  0x8a   : > { %v525_v16 = vpop.permute.xlu0 %524 }
  0x8b   : > { %v529_v17 = vadd.s32 %v525_v16, %v519_v13  ;;  %v2554_v13 = vor.u32 %v3226_v11, %v2553_v10 }
  0x8d   : > { %v3699_v18 = vadd.s32 %v3427_v14, %v529_v17  ;;  %1284 = vmatpush.bf16.msra.mxu0 %v2554_v13 }
  0x8f   : > { %vm535_vm3 = vcmp.gt.s32.totalorder %v3699_v18, 0 }
  0x90   : > { %v537_v20 = vsel %vm535_vm3, 1.0, %v3560_v19  ;;  %1285 = vmatmul.bf16.vlgmr.msra.gmra.mxu0 %v3679_v45 }
  0x91   : > { %v540_v22 = vsel %vm539_vm2, %v537_v20, inf }
  0x92   : > { %541 = vmin.xlane.f32.xlu1 %v540_v22  ;;  %v528_v23 = vpop.permute.xlu0 %527 }
  0x93   : > { %v530_v24 = vadd.s32 %v528_v23, %v520_v21 }
  0x95   : > { %v3707_v25 = vadd.s32 %v3427_v14, %v530_v24  ;;  %v2555_v14 = vld [vmem:[#allocation3 + $0x50] sm:$0xf0]  ;;  %v663_v24 = vperm.slane %v3717_v1, 2 }
  0x96   : > { %v2558_v16 = vor.u32 %v3220_v12, %v2555_v14 }
  0x97   : > { %vm536_vm4 = vcmp.gt.s32.totalorder %v3707_v25, 0 }
  0x98   : > { %v538_v26 = vsel %vm536_vm4, 1.0, %v3560_v19  ;;  %1298 = vmatpush.bf16.msra.mxu1 %v2558_v16  ;;  %v3311_v16 = vld [vmem:[#allocation3 + $0x2f4] sm:$0xf0] }
  0x99   : > { %v543_v27 = vsel %vm539_vm2, %v538_v26, inf }
  0x9a   : > { %544 = vmin.xlane.f32.xlu1 %v543_v27 }
  0x9b   : > { %1299 = vmatmul.bf16.vlgmr.msra.gmra.mxu1 %v3679_v45 }
  0xb2   : > { %v1174_v15 = vpop.f32.mrf.mxu0  ;;  %v1188_v20 = vpop.f32.mrf.mxu1 }
  0xb3   : > { %v1175_v17 = vadd.f32 %v1174_v15, %v661_v8  ;;  %v1189_v21 = vadd.f32 %v1188_v20, %v662_v9  ;;  %v2897_v15 = vld [vmem:[#allocation3 + $0x2c8] sm:$0xf] }
  0xb4   : > { %v2898_v20 = vor.u32 %v3311_v16, %v2897_v15  ;;  %v2561_v15 = vld [vmem:[#allocation3 + $0x28] sm:$0xf]  ;;  %v3227_v16 = vld [vmem:[#allocation3 + $0x54] sm:$0xf0] }
  0xb5   : > { %v1333_v22 = vpack.c.bf16 %v1189_v21, %v1175_v17  ;;  %v3305_v17 = vld [vmem:[#allocation3 + $0x2cc] sm:$0xf]  ;;  %v2899_v21 = vld [vmem:[#allocation3 + $0x2f8] sm:$0xf0] }
  0xb6   : > { %1305 = vmatpush.bf16.msra.mxu2 %v2898_v20  ;;  %v2562_v20 = vor.u32 %v3227_v16, %v2561_v15 }
  0xb7   : > { %1345 = vst [vmem:[#allocation2] sm:$0xff] %v1333_v22  ;;  %v2849_v22 = vld [vmem:[#allocation3 + $0x268] sm:$0xf] }
  0xba   : > { %v1176_v23 = vpop.f32.mrf.mxu0  ;;  %v1190_v27 = vpop.f32.mrf.mxu1 }
  0xbb   : > { %v1177_v26 = vadd.f32 %v1176_v23, %v661_v8  ;;  %v1191_v28 = vadd.f32 %v1190_v27, %v662_v9  ;;  %v3299_v23 = vld [vmem:[#allocation3 + $0x294] sm:$0xf0]  ;;  %v2851_v27 = vld [vmem:[#allocation3 + $0x298] sm:$0xf0] }
  0xbd   : > { %v1339_v0 = vpack.c.bf16 %v1191_v28, %v1177_v26  ;;  %v3293_v26 = vld [vmem:[#allocation3 + $0x26c] sm:$0xf] }
  0xbe   : > { %v1216_v32 = vpop.f32.mrf.mxu3  ;;  %v2905_v8 = vld [vmem:[#allocation2] sm:$0xf]  ;;  %v2913_v10 = vld [vmem:[#allocation2 + $0x4] sm:$0xf] }
  0xbf   : > { %v1202_v29 = vpop.f32.mrf.mxu2  ;;  %1351 = vst [vmem:[#allocation2 + $0x30] sm:$0xff] %v1339_v0  ;;  %v1217_v33 = vadd.f32 %v1216_v32, %v664_v30  ;;  %v2854_v0 = vor.u32 %v3293_v26, %v2851_v27 }
  0xc0   : > { %v1203_v31 = vadd.f32 %v1202_v29, %v663_v24  ;;  %v2850_v29 = vor.u32 %v3299_v23, %v2849_v22 }
  0xc2   : > { %v1334_v34 = vpack.c.bf16 %v1217_v33, %v1203_v31  ;;  %1306 = vmatpush.bf16.msra.mxu2 %v2850_v29 }
  0xc4   : > { %1346 = vst [vmem:[#allocation2 + $0x8] sm:$0xff] %v1334_v34  ;;  %v2801_v34 = vld [vmem:[#allocation3 + $0x208] sm:$0xf] }
  0xc6   : > { %v1218_v37 = vpop.f32.mrf.mxu3  ;;  %v3312_v9 = vld [vmem:[#allocation2 + $0x2c] sm:$0xf0]  ;;  %v3315_v11 = vld [vmem:[#allocation2 + $0x30] sm:$0xf0] }
  0xc7   : > { %v1204_v35 = vpop.f32.mrf.mxu2  ;;  %v1219_v38 = vadd.f32 %v1218_v37, %v664_v30  ;;  %v2906_v13 = vor.u32 %v3312_v9, %v2905_v8  ;;  %v2914_v14 = vor.u32 %v3315_v11, %v2913_v10  ;;  %v2609_v9 = vld [vmem:[#allocation3 + $0x88] sm:$0xf]  ;;  %v3239_v10 = vld [vmem:[#allocation3 + $0xb4] sm:$0xf0]  ;;  %v3233_v11 = vld [vmem:[#allocation3 + $0x8c] sm:$0xf] }
  0xc8   : > { %v1205_v36 = vadd.f32 %v1204_v35, %v663_v24  ;;  %v2902_v24 = vor.u32 %v3305_v17, %v2899_v21  ;;  %v3287_v35 = vld [vmem:[#allocation3 + $0x234] sm:$0xf0]  ;;  %v3221_v17 = vld [vmem:[#allocation3 + $0x2c] sm:$0xf]  ;;  %v2563_v21 = vld [vmem:[#allocation3 + $0x58] sm:$0xf0] }
  0xc9   : > { %v2802_v37 = vor.u32 %v3287_v35, %v2801_v34 }
  0xca   : > { %v1340_v39 = vpack.c.bf16 %v1219_v38, %v1205_v36  ;;  %1319 = vmatpush.bf16.msra.mxu3 %v2902_v24  ;;  %v3281_v36 = vld [vmem:[#allocation3 + $0x20c] sm:$0xf]  ;;  %v2803_v38 = vld [vmem:[#allocation3 + $0x238] sm:$0xf0]  ;;  %v2566_v24 = vor.u32 %v3221_v17, %v2563_v21 }
  0xcb   : > { %v2931_v31 = vld [vmem:[#allocation2 + $0x8] sm:$0xf]  ;;  %1307 = vmatpush.bf16.msra.mxu2 %v2802_v37 }
  0xcc   : > { %1352 = vst [vmem:[#allocation2 + $0x38] sm:$0xff] %v1340_v39  ;;  %v2753_v39 = vld [vmem:[#allocation3 + $0x1a8] sm:$0xf] }
  0xce   : > { %1320 = vmatpush.bf16.msra.mxu3 %v2854_v0  ;;  %v3562_v0 = vmov 0.17677669  }
  0xd2   : > { %v1230_v42 = vpop.f32.mrf.mxu0  ;;  %v1244_v44 = vpop.f32.mrf.mxu1 }
  0xd3   : > { %v1231_v43 = vadd.f32 %v1230_v42, %v665_v40  ;;  %v1245_v46 = vadd.f32 %v1244_v44, %v666_v41  ;;  %v3318_v32 = vld [vmem:[#allocation2 + $0x34] sm:$0xf0]  ;;  %v3269_v42 = vld [vmem:[#allocation3 + $0x1ac] sm:$0xf]  ;;  %v3321_v21 = vld [vmem:[#allocation2 + $0x38] sm:$0xf0] }
  0xd4   : > { %v2932_v33 = vor.u32 %v3318_v32, %v2931_v31 }
  0xd5   : > { %v1335_v47 = vpack.c.bf16 %v1245_v46, %v1231_v43  ;;  %v2755_v43 = vld [vmem:[#allocation3 + $0x1d8] sm:$0xf0] }
  0xd6   : > { %v2758_v46 = vor.u32 %v3269_v42, %v2755_v43 }
  0xd7   : > { %1347 = vst [vmem:[#allocation2 + $0x10] sm:$0xff] %v1335_v47  ;;  %v2705_v47 = vld [vmem:[#allocation3 + $0x148] sm:$0xf] }
  0xda   : > { %v1232_v49 = vpop.f32.mrf.mxu0  ;;  %v1246_v51 = vpop.f32.mrf.mxu1 }
  0xdb   : > { %v1233_v50 = vadd.f32 %v1232_v49, %v665_v40  ;;  %v1247_v53 = vadd.f32 %v1246_v51, %v666_v41  ;;  %v3275_v40 = vld [vmem:[#allocation3 + $0x1d4] sm:$0xf0]  ;;  %v2806_v41 = vor.u32 %v3281_v36, %v2803_v38  ;;  %v3257_v49 = vld [vmem:[#allocation3 + $0x14c] sm:$0xf]  ;;  %v2707_v51 = vld [vmem:[#allocation3 + $0x178] sm:$0xf0] }
  0xdc   : > { %v2754_v44 = vor.u32 %v3275_v40, %v2753_v39 }
  0xdd   : > { %v1258_v54 = vpop.f32.mrf.mxu2  ;;  %v1341_v56 = vpack.c.bf16 %v1247_v53, %v1233_v50  ;;  %1321 = vmatpush.bf16.msra.mxu3 %v2806_v41  ;;  %v3251_v53 = vld [vmem:[#allocation3 + $0x114] sm:$0xf0] }
  0xde   : > { %v1259_v55 = vadd.f32 %v1258_v54, %v667_v48  ;;  %v1272_v57 = vpop.f32.mrf.mxu3  ;;  %v2909_v62 = vld [vmem:[#allocation2 + $0x10] sm:$0xf]  ;;  %v2917_v3 = vld [vmem:[#allocation2 + $0x14] sm:$0xf]  ;;  %1308 = vmatpush.bf16.msra.mxu2 %v2754_v44  ;;  %v2710_v54 = vor.u32 %v3257_v49, %v2707_v51 }
  0xdf   : > { %v1273_v58 = vadd.f32 %v1272_v57, %v668_v52  ;;  %1353 = vst [vmem:[#allocation2 + $0x40] sm:$0xff] %v1341_v56  ;;  %v2659_v56 = vld [vmem:[#allocation3 + $0x118] sm:$0xf0] }
  0xe1   : > { %v1336_v59 = vpack.c.bf16 %v1273_v58, %v1259_v55  ;;  %1322 = vmatpush.bf16.msra.mxu3 %v2758_v46  ;;  %v3245_v55 = vld [vmem:[#allocation3 + $0xec] sm:$0xf] }
  0xe2   : > { %v2662_v58 = vor.u32 %v3245_v55, %v2659_v56 }
  0xe3   : > { %1348 = vst [vmem:[#allocation2 + $0x18] sm:$0xff] %v1336_v59  ;;  %v3732_v59 = vld [vmem:[%s4055_s4 + $0x8] sm:$0xf] }
  0xe5   : > { %v1260_v60 = vpop.f32.mrf.mxu2  ;;  %1323 = vmatpush.bf16.msra.mxu3 %v2710_v54 }
  0xe6   : > { %v1261_v61 = vadd.f32 %v1260_v60, %v667_v48  ;;  %v1274_v63 = vpop.f32.mrf.mxu3  ;;  %v3313_v2 = vld [vmem:[#allocation2 + $0x3c] sm:$0xf0]  ;;  %v3316_v4 = vld [vmem:[#allocation2 + $0x40] sm:$0xf0]  ;;  %v3263_v48 = vld [vmem:[#allocation3 + $0x174] sm:$0xf0] }
  0xe7   : > { %v1275_v5 = vadd.f32 %v1274_v63, %v668_v52  ;;  %v2910_v6 = vor.u32 %v3313_v2, %v2909_v62  ;;  %v2918_v7 = vor.u32 %v3316_v4, %v2917_v3  ;;  %v2706_v50 = vor.u32 %v3263_v48, %v2705_v47  ;;  %v2657_v52 = vld [vmem:[#allocation3 + $0xe8] sm:$0xf] }
  0xe8   : > { %v2658_v57 = vor.u32 %v3251_v53, %v2657_v52  ;;  %v669_v60 = vperm.slane %v3732_v59, 0 }
  0xe9   : > { %v1342_v1 = vpack.c.bf16 %v1275_v5, %v1261_v61  ;;  %1384 = vmatpush.bf16.xpose.msrb.mxu0 %v2910_v6  ;;  %1446 = vmatpush.bf16.xpose.msrb.mxu1 %v2918_v7  ;;  %v670_v61 = vperm.slane %v3732_v59, 1 }
  0xea   : > { %v2935_v12 = vld [vmem:[#allocation2 + $0x18] sm:$0xf]  ;;  %1309 = vmatpush.bf16.msra.mxu2 %v2706_v50  ;;  %1324 = vmatpush.bf16.msra.mxu3 %v2662_v58 }
  0xeb   : > { %1354 = vst [vmem:[#allocation2 + $0x48] sm:$0xff] %v1342_v1 }
  0xee   : > { %1310 = vmatpush.bf16.msra.mxu2 %v2658_v57 }
  0xf0   : > { %1385 = vmatmul.bf16.vlgmr.msrb.gmra.mxu0 %v2906_v13  ;;  %1447 = vmatmul.bf16.vlgmr.msrb.gmra.mxu1 %v2914_v14  ;;  %v2611_v13 = vld [vmem:[#allocation3 + $0xb8] sm:$0xf0] }
  0xf1   : > { %v2614_v14 = vor.u32 %v3233_v11, %v2611_v13 }
  0xf2   : > { %v3319_v28 = vld [vmem:[#allocation2 + $0x44] sm:$0xf0] }
  0xf3   : > { %v2936_v30 = vor.u32 %v3319_v28, %v2935_v12  ;;  %v2610_v12 = vor.u32 %v3239_v10, %v2609_v9  ;;  %1325 = vmatpush.bf16.msra.mxu3 %v2614_v14 }
  0xf5   : > { %1554 = vmatpush.bf16.xpose.msra.mxu0 %v2936_v30  ;;  %1311 = vmatpush.bf16.msra.mxu2 %v2610_v12 }
  0xf7   : > { %1326 = vmatpush.bf16.msra.mxu3 %v2566_v24 }
  0xf9   : > { %1312 = vmatpush.bf16.msra.mxu2 %v2562_v20 }
  0xfa   : > { %1327 = vmatmul.bf16.vlgmr.msra.gmra.mxu3 %v3679_v45 }
  0xfc   : > { %1313 = vmatmul.bf16.vlgmr.msra.gmra.mxu2 %v3679_v45 }
 0x100   : > { %1555 = vmatmul.bf16.vlgmr.msra.gmra.mxu0 %v2932_v33 }
 0x105   : > { %v542_v30 = vpop.xlane.xlu1 %541 }
 0x106   : > { %vm546_vm5 = vcmp.gt.f32.partialorder %v542_v30, 0.0 }
 0x107   : > { %vm548_vm7 = vmxor %vm546_vm5, %vm3561_vm6  ;;  %v3738_v31 = vsel %vm546_vm5, 0.0, %v3562_v0 }
 0x108   : > { %vm554_vm8 = vmand %vm535_vm3, %vm548_vm7 }
 0x109   : > { %v3744_v35 = vsel %vm554_vm8, -inf, %v3560_v19 }
 0x10d   : > { %v1286_v62 = vpop.f32.mrf.mxu0  ;;  %v545_v32 = vpop.xlane.xlu1 %544 }
 0x10e   : > { %v1287_v63 = vadd.f32 %v1286_v62, %v669_v60  ;;  %vm547_vm9 = vcmp.gt.f32.partialorder %v545_v32, 0.0 }
 0x10f   : > { %vm549_vm10 = vmxor %vm547_vm9, %vm3561_vm6  ;;  %v3750_v37 = vsel %vm547_vm9, 0.0, %v3562_v0 }
 0x110   : > { %vm555_vm11 = vmand %vm536_vm4, %vm549_vm10 }
 0x111   : > { %v3754_v39 = vsel %vm555_vm11, -inf, %v3560_v19 }
 0x115   : > { %v1288_v5 = vpop.f32.mrf.mxu0 }
 0x116   : > { %v1289_v6 = vadd.f32 %v1288_v5, %v669_v60  ;;  %v2948_v60 = vld [vmem:[#allocation2 + $0x1c] sm:$0xf] }
 0x118   : > { %v1300_v2 = vpop.f32.mrf.mxu1 }
 0x119   : > { %v1301_v3 = vadd.f32 %v1300_v2, %v670_v61  ;;  %v671_v2 = vperm.slane %v3732_v59, 2 }
 0x11b   : > { %v1337_v4 = vpack.c.bf16 %v1301_v3, %v1287_v63 }
 0x11d   : > { %1349 = vst [vmem:[#allocation2 + $0x20] sm:$0xff] %v1337_v4  ;;  %v672_v4 = vperm.slane %v3732_v59, 3  ;;  %v2944_v59 = vld [vmem:[#allocation2 + $0xc] sm:$0xf] }
 0x120   : > { %v1302_v7 = vpop.f32.mrf.mxu1 }
 0x121   : > { %v1303_v1 = vadd.f32 %v1302_v7, %v670_v61  ;;  %v3322_v61 = vld [vmem:[#allocation2 + $0x48] sm:$0xf0] }
 0x122   : > { %v2949_v62 = vor.u32 %v3322_v61, %v2948_v60 }
 0x123   : > { %v1343_v8 = vpack.c.bf16 %v1303_v1, %v1289_v6 }
 0x124   : > { %v2921_v22 = vld [vmem:[#allocation2 + $0x24] sm:$0xf]  ;;  %v2926_v23 = vld [vmem:[#allocation2 + $0x20] sm:$0xf] }
 0x125   : > { %1355 = vst [vmem:[#allocation2 + $0x50] sm:$0xff] %v1343_v8 }
 0x12c   : > { %v3317_v26 = vld [vmem:[#allocation2 + $0x50] sm:$0xf0]  ;;  %v3314_v27 = vld [vmem:[#allocation2 + $0x4c] sm:$0xf0] }
 0x12d   : > { %v2922_v28 = vor.u32 %v3317_v26, %v2921_v22  ;;  %v2927_v29 = vor.u32 %v3314_v27, %v2926_v23  ;;  %v2945_v22 = vor.u32 %v3321_v21, %v2944_v59 }
 0x12f   : > { %1496 = vmatpush.bf16.msrb.mxu2 %v2922_v28  ;;  %1519 = vmatpush.bf16.msrb.mxu3 %v2927_v29 }
 0x133   : > { %1641 = vmatpush.bf16.xpose.msra.mxu2 %v2949_v62 }
 0x16d   : > { %v1448_v33 = vpop.f32.mrf.mxu1  ;;  %v1386_v40 = vpop.f32.mrf.mxu0 }
 0x16e   : > { %v1453_v34 = vmul.f32 %v1448_v33, %v3738_v31  ;;  %v1391_v42 = vmul.f32 %v1386_v40, %v3738_v31 }
 0x170   : > { %v1455_v45 = vadd.f32 %v1453_v34, %v3744_v35  ;;  %v3760_v44 = vadd.f32 %v1391_v42, %v3744_v35 }
 0x172   : > { %v1457_v36 = vsel %vm539_vm2, %v1455_v45, -inf  ;;  %v1395_v25 = vsel %vm539_vm2, %v3760_v44, -inf }
 0x173   : > { %1458 = vmax.xlane.f32.xlu2 %v1457_v36 }
 0x175   : > { %v1450_v18 = vpop.f32.mrf.mxu1  ;;  %v1388_v53 = vpop.f32.mrf.mxu0 }
 0x176   : > { %v1454_v38 = vmul.f32 %v1450_v18, %v3750_v37  ;;  %v1392_v55 = vmul.f32 %v1388_v53, %v3750_v37 }
 0x178   : > { %v1456_v41 = vadd.f32 %v1454_v38, %v3754_v39  ;;  %v3768_v57 = vadd.f32 %v1392_v55, %v3754_v39 }
 0x17a   : > { %v1460_v43 = vsel %vm539_vm2, %v1456_v41, -inf  ;;  %v1398_v58 = vsel %vm539_vm2, %v3768_v57, -inf }
 0x17b   : > { %1461 = vmax.xlane.f32.xlu2 %v1460_v43 }
 0x17d   : > { %v1328_v5 = vpop.f32.mrf.mxu3  ;;  %v1556_v32 = vpop.f32.mrf.mxu0 }
 0x17e   : > { %v1329_v7 = vadd.f32 %v1328_v5, %v672_v4  ;;  %v1561_v38 = vmul.f32 %v1556_v32, %v3738_v31 }
 0x17f   : > { %v1314_v3 = vpop.f32.mrf.mxu2 }
 0x180   : > { %v1315_v6 = vadd.f32 %v1314_v3, %v671_v2 }
 0x182   : > { %v1338_v8 = vpack.c.bf16 %v1329_v7, %v1315_v6 }
 0x183   : > { %1396 = vmax.xlane.f32.xlu2 %v1395_v25 }
 0x184   : > { %1350 = vst [vmem:[#allocation2 + $0x28] sm:$0xff] %v1338_v8 }
 0x185   : > { %v1330_v10 = vpop.f32.mrf.mxu3 }
 0x186   : > { %v1331_v13 = vadd.f32 %v1330_v10, %v672_v4 }
 0x187   : > { %v1316_v9 = vpop.f32.mrf.mxu2 }
 0x188   : > { %v1317_v12 = vadd.f32 %v1316_v9, %v671_v2 }
 0x18a   : > { %v1344_v15 = vpack.c.bf16 %v1331_v13, %v1317_v12 }
 0x18b   : > { %v2939_v23 = vld [vmem:[#allocation2 + $0x28] sm:$0xf]  ;;  %v2952_v26 = vld [vmem:[#allocation2 + $0x2c] sm:$0xf] }
 0x18c   : > { %1356 = vst [vmem:[#allocation2 + $0x58] sm:$0xff] %v1344_v15 }
 0x193   : > { %v3320_v24 = vld [vmem:[#allocation2 + $0x54] sm:$0xf0]  ;;  %v3323_v28 = vld [vmem:[#allocation2 + $0x58] sm:$0xf0] }
 0x194   : > { %v2940_v27 = vor.u32 %v3320_v24, %v2939_v23  ;;  %v2953_v29 = vor.u32 %v3323_v28, %v2952_v26 }
 0x196   : > { %1604 = vmatpush.bf16.msra.mxu1 %v2940_v27  ;;  %1691 = vmatpush.bf16.msra.mxu3 %v2953_v29 }
 0x1e6   : > { %v1459_v46 = vpop.xlane.xlu2 %1458 }
 0x1e7   : > { %v1463_v47 = vsub.f32 %v1455_v45, %v1459_v46  ;;  %v1563_v46 = vadd.f32 %v1561_v38, %v3744_v35 }
 0x1e9   : > { %v1465_v48 = vmul.f32 1.442695, %v1463_v47  ;;  %v1558_v47 = vpop.f32.mrf.mxu0 }
 0x1eb   : > { %3433 = vpow2.f32 %v1465_v48 }
 0x1ee   : > { %v1462_v19 = vpop.xlane.xlu2 %1461 }
 0x1ef   : > { %v1464_v49 = vsub.f32 %v1456_v41, %v1462_v19 }
 0x1f1   : > { %v3434_v50 = vpop.eup %3433  ;;  %v1467_v51 = vmul.f32 1.442695, %v1464_v49 }
 0x1f2   : > { %v1469_v52 = vsel %vm539_vm2, %v3434_v50, 0.0 }
 0x1f3   : > { %3435 = vpow2.f32 %v1467_v51  ;;  %1470 = vadd.xlane.f32.xlu0 %v1469_v52 }
 0x1f6   : > { %v1397_v34 = vpop.xlane.xlu2 %1396 }
 0x1f7   : > { %v1401_v18 = vsub.f32 %v3760_v44, %v1397_v34  ;;  %v1562_v44 = vmul.f32 %v1558_v47, %v3750_v37 }
 0x1f9   : > { %v3436_v54 = vpop.eup %3435  ;;  %v1403_v41 = vmul.f32 1.442695, %v1401_v18  ;;  %v1564_v51 = vadd.f32 %v1562_v44, %v3754_v39 }
 0x1fa   : > { %v1472_v56 = vsel %vm539_vm2, %v3436_v54, 0.0 }
 0x1fb   : > { %1473 = vadd.xlane.f32.xlu1 %v1472_v56  ;;  %v1568_v53 = vsel %vm539_vm2, %v1564_v51, -inf }
 0x203   : > { %1399 = vmax.xlane.f32.xlu1 %v1398_v58 }
 0x266   : > { %v1471_v63 = vpop.xlane.xlu0 %1470 }
 0x267   : > { %3437 = vrcp.f32 %v1471_v63 }
 0x26d   : > { %v3438_v11 = vpop.eup %3437 }
 0x26e   : > { %v1474_v1 = vpop.xlane.xlu1 %1473  ;;  %v1477_v16 = vmul.f32 %v3438_v11, %v3434_v50 }
 0x26f   : > { %3439 = vrcp.f32 %v1474_v1 }
 0x270   : > { %3441 = vpow2.f32 %v1403_v41 }
 0x275   : > { %v3440_v14 = vpop.eup %3439 }
 0x276   : > { %v1478_v17 = vmul.f32 %v3440_v14, %v3436_v54  ;;  %v1400_v43 = vpop.xlane.xlu1 %1399  ;;  %v3442_v52 = vpop.eup %3441 }
 0x277   : > { %v1402_v19 = vsub.f32 %v3768_v57, %v1400_v43 }
 0x278   : > { %v1479_v20 = vpack.c.bf16 %v1478_v17, %v1477_v16 }
 0x279   : > { %v1405_v50 = vmul.f32 1.442695, %v1402_v19 }
 0x27a   : > { %2923 = vmatmul.msk.bf16.vlgmr.msrb.gmra.mxu2 %vm539_vm2, %v1479_v20 }
 0x27b   : > { %3443 = vpow2.f32 %v1405_v50 }
 0x281   : > { %v3444_v54 = vpop.eup %3443 }
 0x28a   : > { %1642 = vmatmul.bf16.vlgmr.msra.gmra.mxu2 %v2945_v22 }
 0x2fd   : > { %v3775_v30 = vpop.f32.mrf.mxu2 }
 0x305   : > { %v3777_v0 = vpop.f32.mrf.mxu2 }
 0x30d   : > { %v1643_v33 = vpop.f32.mrf.mxu2 }
 0x30e   : > { %v1648_v45 = vmul.f32 %v1643_v33, %v3738_v31  ;;  %v1565_v31 = vsel %vm539_vm2, %v1563_v46, -inf }
 0x310   : > { %v1650_v36 = vadd.f32 %v1648_v45, %v3744_v35  ;;  %v1407_v35 = vsel %vm539_vm2, %v3442_v52, 0.0 }
 0x312   : > { %v1652_v40 = vsel %vm539_vm2, %v1650_v36, -inf }
 0x313   : > { %1653 = vmax.xlane.f32.xlu2 %v1652_v40 }
 0x315   : > { %v1645_v42 = vpop.f32.mrf.mxu2 }
 0x316   : > { %v1649_v25 = vmul.f32 %v1645_v42, %v3750_v37  ;;  %v1410_v37 = vsel %vm539_vm2, %v3444_v54, 0.0 }
 0x318   : > { %v1651_v48 = vadd.f32 %v1649_v25, %v3754_v39 }
 0x31a   : > { %v1655_v49 = vsel %vm539_vm2, %v1651_v48, -inf }
 0x31b   : > { %1566 = vmax.xlane.f32.xlu2 %v1565_v31  ;;  %1656 = vmax.xlane.f32.xlu1 %v1655_v49 }
 0x323   : > { %1408 = vadd.xlane.f32.xlu2 %v1407_v35  ;;  %1569 = vmax.xlane.f32.xlu1 %v1568_v53  ;;  %v3563_v53 = vmov 128.0  }
 0x32b   : > { %1411 = vadd.xlane.f32.xlu1 %v1410_v37 }
 0x386   : > { %v1654_v55 = vpop.xlane.xlu2 %1653 }
 0x387   : > { %v1658_v56 = vsub.f32 %v1650_v36, %v1654_v55 }
 0x389   : > { %v1660_v57 = vmul.f32 1.442695, %v1658_v56 }
 0x38b   : > { %3445 = vpow2.f32 %v1660_v57 }
 0x38e   : > { %v1567_v58 = vpop.xlane.xlu2 %1566  ;;  %v1657_v60 = vpop.xlane.xlu1 %1656 }
 0x38f   : > { %v1571_v61 = vsub.f32 %v1563_v46, %v1567_v58  ;;  %v1659_v39 = vsub.f32 %v1651_v48, %v1657_v60  ;;  %v3475_v48 = vld [vmem:[%s3675_s16] sm:$0xff] }
 0x391   : > { %v3446_v62 = vpop.eup %3445  ;;  %v1573_v63 = vmul.f32 1.442695, %v1571_v61  ;;  %v1662_v2 = vmul.f32 1.442695, %v1659_v39 }
 0x392   : > { %v1664_v3 = vsel %vm539_vm2, %v3446_v62, 0.0 }
 0x393   : > { %3447 = vpow2.f32 %v1573_v63  ;;  %1665 = vadd.xlane.f32.xlu2 %v1664_v3  ;;  %v3069_v3 = vld [vmem:[%s4060_s9 + $0xe0] sm:$0xf] }
 0x394   : > { %3449 = vpow2.f32 %v1662_v2 }
 0x396   : > { %v1570_v4 = vpop.xlane.xlu1 %1569  ;;  %v1409_v8 = vpop.xlane.xlu2 %1408 }
 0x397   : > { %v1572_v5 = vsub.f32 %v1564_v51, %v1570_v4  ;;  %v3354_v4 = vld [vmem:[%s4060_s9 + $0xec] sm:$0xf0] }
 0x399   : > { %v3448_v6 = vpop.eup %3447  ;;  %v1575_v7 = vmul.f32 1.442695, %v1572_v5  ;;  %v3352_v5 = vld [vmem:[%s4060_s9 + $0xe4] sm:$0xf] }
 0x39a   : > { %v3450_v1 = vpop.eup %3449  ;;  %v1577_v9 = vsel %vm539_vm2, %v3448_v6, 0.0 }
 0x39b   : > { %3451 = vpow2.f32 %v1575_v7  ;;  %1578 = vadd.xlane.f32.xlu2 %v1577_v9  ;;  %v1667_v10 = vsel %vm539_vm2, %v3450_v1, 0.0  ;;  %v3071_v7 = vld [vmem:[%s4060_s9 + $0xf0] sm:$0xf0] }
 0x39c   : > { %1668 = vadd.xlane.f32.xlu1 %v1667_v10  ;;  %3453 = vrcp.f32 %v1409_v8  ;;  %v3355_v8 = vld [vmem:[%s4060_s9 + $0xf4] sm:$0xf0]  ;;  %v3074_v9 = vor.u32 %v3352_v5, %v3071_v7  ;;  %v2997_v7 = vld [vmem:[%s4060_s9 + $0x48] sm:$0xf] }
 0x39e   : > { %v1412_v11 = vpop.xlane.xlu1 %1411  ;;  %1980 = vmatpush.bf16.msrb.mxu1 %v3074_v9 }
 0x39f   : > { %3455 = vrcp.f32 %v1412_v11  ;;  %v3353_v11 = vld [vmem:[%s4060_s9 + $0xec] sm:$0xf] }
 0x3a1   : > { %v3452_v12 = vpop.eup %3451 }
 0x3a2   : > { %v1580_v13 = vsel %vm539_vm2, %v3452_v12, 0.0  ;;  %v3454_v14 = vpop.eup %3453 }
 0x3a3   : > { %1581 = vadd.xlane.f32.xlu0 %v1580_v13  ;;  %v1415_v16 = vmul.f32 %v3454_v14, %v3442_v52  ;;  %v3476_v52 = vld [vmem:[%s3675_s16 + $0x8] sm:$0xff]  ;;  %v3053_v14 = vld [vmem:[%s4060_s9 + $0xc0] sm:$0xf] }
 0x3a5   : > { %v3456_v15 = vpop.eup %3455 }
 0x3a6   : > { %v1416_v17 = vmul.f32 %v3456_v15, %v3444_v54  ;;  %v3350_v15 = vld [vmem:[%s4060_s9 + $0xcc] sm:$0xf0] }
 0x3a8   : > { %v1417_v20 = vpack.c.bf16 %v1416_v17, %v1415_v16  ;;  %v3348_v16 = vld [vmem:[%s4060_s9 + $0xc4] sm:$0xf]  ;;  %v3054_v17 = vor.u32 %v3350_v15, %v3053_v14  ;;  %v3330_v14 = vld [vmem:[%s4060_s9 + $0x2c] sm:$0xf0] }
 0x3a9   : > { %v3328_v15 = vld [vmem:[%s4060_s9 + $0x24] sm:$0xf] }
 0x3aa   : > { %2928 = vmatmul.msk.bf16.vlgmr.msrb.gmra.mxu3 %vm539_vm2, %v1417_v20  ;;  %v3055_v20 = vld [vmem:[%s4060_s9 + $0xd0] sm:$0xf0] }
 0x406   : > { %v1666_v59 = vpop.xlane.xlu2 %1665 }
 0x407   : > { %3457 = vrcp.f32 %v1666_v59  ;;  %v3061_v59 = vld [vmem:[%s4060_s9 + $0xc8] sm:$0xf] }
 0x40d   : > { %v3458_v23 = vpop.eup %3457 }
 0x40e   : > { %v1579_v22 = vpop.xlane.xlu2 %1578  ;;  %v1672_v27 = vmul.f32 %v3458_v23, %v3446_v62 }
 0x40f   : > { %v1669_v21 = vpop.xlane.xlu1 %1668 }
 0x410   : > { %3459 = vrcp.f32 %v1669_v21  ;;  %v3351_v21 = vld [vmem:[%s4060_s9 + $0xd4] sm:$0xf0] }
 0x411   : > { %3461 = vrcp.f32 %v1579_v22  ;;  %v3058_v22 = vor.u32 %v3348_v16, %v3055_v20  ;;  %v3062_v23 = vor.u32 %v3351_v21, %v3061_v59  ;;  %v2981_v20 = vld [vmem:[%s4060_s9 + $0x28] sm:$0xf]  ;;  %v3331_v59 = vld [vmem:[%s4060_s9 + $0x34] sm:$0xf0] }
 0x413   : > { %1981 = vmatpush.bf16.msrb.mxu1 %v3058_v22 }
 0x416   : > { %v3460_v24 = vpop.eup %3459  ;;  %v1582_v26 = vpop.xlane.xlu0 %1581 }
 0x417   : > { %v1673_v28 = vmul.f32 %v3460_v24, %v3450_v1  ;;  %3463 = vrcp.f32 %v1582_v26  ;;  %v3462_v32 = vpop.eup %3461  ;;  %v3077_v1 = vld [vmem:[%s4060_s9 + $0xe8] sm:$0xf]  ;;  %v3349_v24 = vld [vmem:[%s4060_s9 + $0xcc] sm:$0xf]  ;;  %v3063_v26 = vld [vmem:[%s4060_s9 + $0xd8] sm:$0xf0] }
 0x418   : > { %v1585_v34 = vmul.f32 %v3462_v32, %v3448_v6  ;;  %3465 = vrcp.f32 %v3563_v53  ;;  %v3070_v6 = vor.u32 %v3354_v4, %v3069_v3  ;;  %v3078_v10 = vor.u32 %v3355_v8, %v3077_v1  ;;  %v3344_v32 = vld [vmem:[%s4060_s9 + $0xa4] sm:$0xf]  ;;  %v3338_v53 = vld [vmem:[%s4060_s9 + $0x6c] sm:$0xf0]  ;;  %v3335_v1 = vld [vmem:[%s4060_s9 + $0x54] sm:$0xf0] }
 0x419   : > { %v1674_v29 = vpack.c.bf16 %v1673_v28, %v1672_v27  ;;  %v3066_v27 = vor.u32 %v3349_v24, %v3063_v26  ;;  %v3037_v28 = vld [vmem:[%s4060_s9 + $0xa0] sm:$0xf]  ;;  %v3334_v3 = vld [vmem:[%s4060_s9 + $0x4c] sm:$0xf0]  ;;  %v3332_v4 = vld [vmem:[%s4060_s9 + $0x44] sm:$0xf]  ;;  %v2998_v9 = vor.u32 %v3335_v1, %v2997_v7 }
 0x41a   : > { %1966 = vmatpush.bf16.msrb.mxu0 %v3070_v6  ;;  %1994 = vmatpush.bf16.msrb.mxu2 %v3078_v10  ;;  %v2991_v6 = vld [vmem:[%s4060_s9 + $0x50] sm:$0xf0]  ;;  %v3333_v10 = vld [vmem:[%s4060_s9 + $0x4c] sm:$0xf]  ;;  %v2983_v26 = vld [vmem:[%s4060_s9 + $0x38] sm:$0xf0] }
 0x41b   : > { %2954 = vmatmul.msk.bf16.vlgmr.msra.gmra.mxu3 %vm539_vm2, %v1674_v29  ;;  %v3346_v29 = vld [vmem:[%s4060_s9 + $0xac] sm:$0xf0]  ;;  %v2994_v8 = vor.u32 %v3332_v4, %v2991_v6  ;;  %v3329_v24 = vld [vmem:[%s4060_s9 + $0x2c] sm:$0xf] }
 0x41d   : > { %v3464_v33 = vpop.eup %3463 }
 0x41e   : > { %v1586_v45 = vmul.f32 %v3464_v33, %v3452_v12  ;;  %v3079_v12 = vld [vmem:[%s4060_s9 + $0xf8] sm:$0xf0]  ;;  %1967 = vmatpush.bf16.msrb.mxu0 %v3054_v17  ;;  %1995 = vmatpush.bf16.msrb.mxu2 %v3062_v23  ;;  %v3038_v33 = vor.u32 %v3346_v29, %v3037_v28  ;;  %v2975_v17 = vld [vmem:[%s4060_s9 + $0x30] sm:$0xf0]  ;;  %v2982_v23 = vor.u32 %v3331_v59, %v2981_v20 }
 0x41f   : > { %v3082_v13 = vor.u32 %v3353_v11, %v3079_v12  ;;  %v2999_v11 = vld [vmem:[%s4060_s9 + $0x58] sm:$0xf0]  ;;  %v2978_v22 = vor.u32 %v3328_v15, %v2975_v17  ;;  %v2986_v29 = vor.u32 %v3329_v24, %v2983_v26 }
 0x420   : > { %v1587_v36 = vpack.c.bf16 %v1586_v45, %v1585_v34  ;;  %v3039_v34 = vld [vmem:[%s4060_s9 + $0xb0] sm:$0xf0]  ;;  %v3045_v45 = vld [vmem:[%s4060_s9 + $0xa8] sm:$0xf]  ;;  %v3002_v12 = vor.u32 %v3333_v10, %v2999_v11  ;;  %v3359_v20 = vld [vmem:[#allocation5 + $0x18] sm:$0xff] }
 0x421   : > { %2008 = vmatpush.bf16.msrb.mxu3 %v3082_v13  ;;  %v2973_v13 = vld [vmem:[%s4060_s9 + $0x20] sm:$0xf]  ;;  %v3367_v59 = vld [vmem:[#allocation5 + $0x58] sm:$0xff] }
 0x422   : > { %2941 = vmatmul.msk.bf16.vlgmr.msra.gmra.mxu1 %vm539_vm2, %v1587_v36  ;;  %v3347_v36 = vld [vmem:[%s4060_s9 + $0xb4] sm:$0xf0]  ;;  %1968 = vmatpush.bf16.msrb.mxu0 %v3038_v33  ;;  %v2974_v16 = vor.u32 %v3330_v14, %v2973_v13  ;;  %v3324_v33 = vld [vmem:[%s4060_s9 + $0x4] sm:$0xf]  ;;  %v3429_v14 = vld [vmem:[%s4057_s6] ss:$0 sm:$0xff] }
 0x423   : > { %v3375_v24 = vld [vmem:[#allocation5 + $0x98] sm:$0xff] }
 0x424   : > { %v3383_v26 = vld [vmem:[#allocation5 + $0xd8] sm:$0xff] }
 0x425   : > { %2009 = vmatpush.bf16.msrb.mxu3 %v3066_v27  ;;  %v2957_v27 = vld [vmem:[%s4060_s9] sm:$0xf] }
 0x42d   : > { %v1521_v18 = vpop.f32.mrf.mxu3 }
 0x42e   : > { %v1522_v40 = vadd.f32 %v1521_v18, %v3775_v30  ;;  %v3466_v30 = vpop.eup %3465  ;;  %v3042_v18 = vor.u32 %v3344_v32, %v3039_v34  ;;  %v3326_v32 = vld [vmem:[%s4060_s9 + $0xc] sm:$0xf0]  ;;  %v2959_v34 = vld [vmem:[%s4060_s9 + $0x10] sm:$0xf0] }
 0x42f   : > { %v1711_v54 = vmul.f32 128.0, %v3466_v30  ;;  %vm1715_vm12 = vweird.f32 %v3466_v30 }
 0x430   : > { %1982 = vmatpush.bf16.msrb.mxu1 %v3042_v18  ;;  %v2965_v18 = vld [vmem:[%s4060_s9 + $0x8] sm:$0xf] }
 0x431   : > { %v1712_v37 = vsub.f32 1.0, %v1711_v54 }
 0x433   : > { %v1713_v55 = vmul.f32 %v3466_v30, %v1712_v37  ;;  %v3007_v37 = vld [vmem:[%s4060_s9 + $0x70] sm:$0xf0] }
 0x435   : > { %v1523_v38 = vpop.f32.mrf.mxu3  ;;  %v1714_v56 = vadd.f32 %v3466_v30, %v1713_v55  ;;  %v3013_v55 = vld [vmem:[%s4060_s9 + $0x68] sm:$0xf] }
 0x436   : > { %v1524_v47 = vadd.f32 %v1523_v38, %v3777_v0  ;;  %v3046_v38 = vor.u32 %v3347_v36, %v3045_v45  ;;  %v2958_v45 = vor.u32 %v3326_v32, %v2957_v27  ;;  %v2962_v36 = vor.u32 %v3324_v33, %v2959_v34  ;;  %v3357_v27 = vld [vmem:[#allocation5 + $0x8] sm:$0xff]  ;;  %v3382_v32 = vld [vmem:[#allocation5 + $0xd0] sm:$0xff]  ;;  %v3356_v33 = vld [vmem:[#allocation5] sm:$0xff] }
 0x437   : > { %v3806_v0 = vsel %vm1715_vm12, %v3466_v30, %v1714_v56  ;;  %v3336_v30 = vld [vmem:[%s4060_s9 + $0x64] sm:$0xf]  ;;  %v3339_v56 = vld [vmem:[%s4060_s9 + $0x74] sm:$0xf0] }
 0x438   : > { %1996 = vmatpush.bf16.msrb.mxu2 %v3046_v38  ;;  %v3327_v38 = vld [vmem:[%s4060_s9 + $0x14] sm:$0xf0]  ;;  %v3364_v34 = vld [vmem:[#allocation5 + $0x40] sm:$0xff] }
 0x49e   : > { %v1693_v41 = vpop.f32.mrf.mxu3 }
 0x49f   : > { %v1606_v42 = vpop.f32.mrf.mxu1 }
 0x4a0   : > { %v1611_v43 = vadd.f32 %v1606_v42, %v1522_v40  ;;  %v3345_v40 = vld [vmem:[%s4060_s9 + $0xac] sm:$0xf] }
 0x4a2   : > { %v1698_v25 = vadd.f32 %v1693_v41, %v1611_v43  ;;  %v3047_v41 = vld [vmem:[%s4060_s9 + $0xb8] sm:$0xf0]  ;;  %v3021_v43 = vld [vmem:[%s4060_s9 + $0x80] sm:$0xf] }
 0x4a3   : > { %v3050_v42 = vor.u32 %v3345_v40, %v3047_v41  ;;  %v3325_v40 = vld [vmem:[%s4060_s9 + $0xc] sm:$0xf] }
 0x4a4   : > { %v1700_v46 = vmul.f32 0.25, %v1698_v25  ;;  %v3342_v25 = vld [vmem:[%s4060_s9 + $0x8c] sm:$0xf0] }
 0x4a5   : > { %2010 = vmatpush.bf16.msrb.mxu3 %v3050_v42  ;;  %v2966_v42 = vor.u32 %v3327_v38, %v2965_v18  ;;  %v3372_v18 = vld [vmem:[#allocation5 + $0x80] sm:$0xff] }
 0x4a6   : > { %v1702_v19 = vadd.f32 %v3475_v48, %v1700_v46  ;;  %v1695_v49 = vpop.f32.mrf.mxu3  ;;  %v3340_v46 = vld [vmem:[%s4060_s9 + $0x84] sm:$0xf]  ;;  %v3023_v48 = vld [vmem:[%s4060_s9 + $0x90] sm:$0xf0] }
 0x4a7   : > { %v1608_v44 = vpop.f32.mrf.mxu1  ;;  %v3380_v38 = vld [vmem:[#allocation5 + $0xc0] sm:$0xff] }
 0x4a8   : > { %v1612_v31 = vadd.f32 %v1608_v44, %v1524_v47  ;;  %1706 = vadd.xlane.f32.xlu1 %v1702_v19  ;;  %v3022_v47 = vor.u32 %v3342_v25, %v3021_v43  ;;  %v3343_v44 = vld [vmem:[%s4060_s9 + $0x94] sm:$0xf0]  ;;  %v2967_v43 = vld [vmem:[%s4060_s9 + $0x18] sm:$0xf0] }
 0x4a9   : > { %v2970_v25 = vor.u32 %v3325_v40, %v2967_v43  ;;  %v1796_v40 = vld [vmem:[%s4061_s10] sm:$0xf] }
 0x4aa   : > { %v1699_v50 = vadd.f32 %v1695_v49, %v1612_v31  ;;  %v3026_v31 = vor.u32 %v3340_v46, %v3023_v48  ;;  %1969 = vmatpush.bf16.msrb.mxu0 %v3022_v47  ;;  %v3363_v47 = vld [vmem:[#allocation5 + $0x38] sm:$0xff]  ;;  %v1798_v43 = vperm.slane %v1796_v40, 0 }
 0x4ab   : > { %v3371_v48 = vld [vmem:[#allocation5 + $0x78] sm:$0xff] }
 0x4ac   : > { %v1701_v51 = vmul.f32 0.25, %v1699_v50  ;;  %v3341_v50 = vld [vmem:[%s4060_s9 + $0x8c] sm:$0xf]  ;;  %1983 = vmatpush.bf16.msrb.mxu1 %v3026_v31  ;;  %v3387_v31 = vld [vmem:[#allocation5 + $0xf8] sm:$0xff] }
 0x4ae   : > { %v1703_v35 = vadd.f32 %v3476_v52, %v1701_v51  ;;  %v3031_v51 = vld [vmem:[%s4060_s9 + $0x98] sm:$0xf0] }
 0x4af   : > { %v3034_v52 = vor.u32 %v3341_v50, %v3031_v51  ;;  %v3370_v50 = vld [vmem:[#allocation5 + $0x70] sm:$0xff] }
 0x4b0   : > { %1708 = vadd.xlane.f32.xlu2 %v1703_v35 }
 0x4b1   : > { %2011 = vmatpush.bf16.msrb.mxu3 %v3034_v52 }
 0x51b   : > { %v1707_v57 = vpop.xlane.xlu1 %1706 }
 0x51c   : > { %v1717_v58 = vmul.f32 %v3806_v0, %v1707_v57  ;;  %v3010_v57 = vor.u32 %v3336_v30, %v3007_v37  ;;  %v3361_v37 = vld [vmem:[#allocation5 + $0x28] sm:$0xff] }
 0x51e   : > { %v3809_v60 = vsub.f32 %v1702_v19, %v1717_v58  ;;  %v3029_v19 = vld [vmem:[%s4060_s9 + $0x88] sm:$0xf]  ;;  %v3014_v58 = vor.u32 %v3339_v56, %v3013_v55  ;;  %1984 = vmatpush.bf16.msrb.mxu1 %v3010_v57 }
 0x51f   : > { %v3030_v49 = vor.u32 %v3343_v44, %v3029_v19  ;;  %v3379_v44 = vld [vmem:[#allocation5 + $0xb8] sm:$0xff]  ;;  %v3369_v55 = vld [vmem:[#allocation5 + $0x68] sm:$0xff] }
 0x520   : > { %v1721_v61 = vmul.f32 %v3809_v60, %v3809_v60  ;;  %v3377_v56 = vld [vmem:[#allocation5 + $0xa8] sm:$0xff] }
 0x521   : > { %1997 = vmatpush.bf16.msrb.mxu2 %v3030_v49  ;;  %v3362_v49 = vld [vmem:[#allocation5 + $0x30] sm:$0xff]  ;;  %v3385_v57 = vld [vmem:[#allocation5 + $0xe8] sm:$0xff] }
 0x522   : > { %1723 = vadd.xlane.f32.xlu0 %v1721_v61  ;;  %v3337_v61 = vld [vmem:[%s4060_s9 + $0x6c] sm:$0xf]  ;;  %1985 = vmatpush.bf16.msrb.mxu1 %v2994_v8 }
 0x523   : > { %v1709_v39 = vpop.xlane.xlu2 %1708 }
 0x524   : > { %v1718_v62 = vmul.f32 %v3806_v0, %v1709_v39  ;;  %v3015_v39 = vld [vmem:[%s4060_s9 + $0x78] sm:$0xf0] }
 0x525   : > { %1998 = vmatpush.bf16.msrb.mxu2 %v3014_v58 }
 0x526   : > { %v3814_v63 = vsub.f32 %v1703_v35, %v1718_v62  ;;  %v3005_v35 = vld [vmem:[%s4060_s9 + $0x60] sm:$0xf]  ;;  %v3018_v62 = vor.u32 %v3337_v61, %v3015_v39  ;;  %1986 = vmatpush.bf16.msrb.mxu1 %v2978_v22  ;;  %v3358_v22 = vld [vmem:[#allocation5 + $0x10] sm:$0xff] }
 0x527   : > { %v3006_v54 = vor.u32 %v3338_v53, %v3005_v35  ;;  %v3378_v35 = vld [vmem:[#allocation5 + $0xb0] sm:$0xff]  ;;  %v3360_v39 = vld [vmem:[#allocation5 + $0x20] sm:$0xff] }
 0x528   : > { %v1722_v2 = vmul.f32 %v3814_v63, %v3814_v63  ;;  %2012 = vmatpush.bf16.msrb.mxu3 %v3018_v62  ;;  %v3386_v53 = vld [vmem:[#allocation5 + $0xf0] sm:$0xff]  ;;  %v3368_v62 = vld [vmem:[#allocation5 + $0x60] sm:$0xff] }
 0x529   : > { %1970 = vmatpush.bf16.msrb.mxu0 %v3006_v54  ;;  %1999 = vmatpush.bf16.msrb.mxu2 %v2998_v9  ;;  %v3428_v9 = vld [vmem:[%s4056_s5] ss:$0 sm:$0xff] }
 0x52a   : > { %1725 = vadd.xlane.f32.xlu1 %v1722_v2  ;;  %v2989_v2 = vld [vmem:[%s4060_s9 + $0x40] sm:$0xf]  ;;  %1987 = vmatpush.bf16.msrb.mxu1 %v2962_v36  ;;  %v3381_v36 = vld [vmem:[#allocation5 + $0xc8] sm:$0xff] }
 0x52b   : > { %v2990_v5 = vor.u32 %v3334_v3, %v2989_v2 }
 0x52c   : > { %2013 = vmatpush.bf16.msrb.mxu3 %v3002_v12 }
 0x52d   : > { %1971 = vmatpush.bf16.msrb.mxu0 %v2990_v5  ;;  %2000 = vmatpush.bf16.msrb.mxu2 %v2982_v23  ;;  %v3366_v23 = vld [vmem:[#allocation5 + $0x50] sm:$0xff] }
 0x52e   : > { %2308 = vmatpush.bf16.msra.mxu1 %v3371_v48 }
 0x530   : > { %2014 = vmatpush.bf16.msrb.mxu3 %v2986_v29  ;;  %v3374_v29 = vld [vmem:[#allocation5 + $0x90] sm:$0xff] }
 0x531   : > { %1972 = vmatpush.bf16.msrb.mxu0 %v2974_v16  ;;  %2001 = vmatpush.bf16.msrb.mxu2 %v2966_v42 }
 0x532   : > { %2309 = vmatpush.bf16.msra.mxu1 %v3370_v50 }
 0x534   : > { %2015 = vmatpush.bf16.msrb.mxu3 %v2970_v25  ;;  %v1799_v25 = vperm.slane %v1796_v40, 1 }
 0x535   : > { %1973 = vmatpush.bf16.msrb.mxu0 %v2958_v45  ;;  %2322 = vmatpush.bf16.msra.mxu2 %v3379_v44  ;;  %v3373_v45 = vld [vmem:[#allocation5 + $0x88] sm:$0xff] }
 0x536   : > { %2310 = vmatpush.bf16.msra.mxu1 %v3369_v55 }
 0x538   : > { %2336 = vmatpush.bf16.msra.mxu3 %v3387_v31 }
 0x539   : > { %2294 = vmatpush.bf16.msra.mxu0 %v3363_v47  ;;  %2323 = vmatpush.bf16.msra.mxu2 %v3378_v35 }
 0x53a   : > { %2311 = vmatpush.bf16.msra.mxu1 %v3368_v62 }
 0x53c   : > { %2337 = vmatpush.bf16.msra.mxu3 %v3386_v53 }
 0x53d   : > { %2295 = vmatpush.bf16.msra.mxu0 %v3362_v49  ;;  %2324 = vmatpush.bf16.msra.mxu2 %v3377_v56 }
 0x53e   : > { %2312 = vmatpush.bf16.msra.mxu1 %v3367_v59 }
 0x540   : > { %2338 = vmatpush.bf16.msra.mxu3 %v3385_v57 }
 0x541   : > { %2296 = vmatpush.bf16.msra.mxu0 %v3361_v37 }
 0x542   : > { %2313 = vmatpush.bf16.msra.mxu1 %v3366_v23 }
 0x545   : > { %2297 = vmatpush.bf16.msra.mxu0 %v3360_v39 }
 0x549   : > { %2298 = vmatpush.bf16.msra.mxu0 %v3359_v20 }
 0x54d   : > { %2299 = vmatpush.bf16.msra.mxu0 %v3358_v22 }
 0x551   : > { %2300 = vmatpush.bf16.msra.mxu0 %v3357_v27 }
 0x555   : > { %2301 = vmatpush.bf16.msra.mxu0 %v3356_v33 }
 0x595   : > { %v1724_v21 = vpop.xlane.xlu0 %1723 }
 0x596   : > { %v1727_v28 = vmul.f32 %v1724_v21, %v3806_v0  ;;  %v3384_v21 = vld [vmem:[#allocation5 + $0xe0] sm:$0xff] }
 0x597   : > { %2339 = vmatpush.bf16.msra.mxu3 %v3384_v21 }
 0x598   : > { %v1729_v41 = vadd.f32 1e-05, %v1727_v28  ;;  %v3365_v28 = vld [vmem:[#allocation5 + $0x48] sm:$0xff] }
 0x599   : > { %2314 = vmatpush.bf16.msra.mxu1 %v3365_v28 }
 0x59a   : > { %3467 = vrsqrt.f32 %v1729_v41  ;;  %vm1737_vm14 = vweird.f32 %v1729_v41 }
 0x59b   : > { %2340 = vmatpush.bf16.msra.mxu3 %v3383_v26 }
 0x59d   : > { %v1726_v46 = vpop.xlane.xlu1 %1725  ;;  %2315 = vmatpush.bf16.msra.mxu1 %v3364_v34 }
 0x59e   : > { %v1728_v19 = vmul.f32 %v1726_v46, %v3806_v0 }
 0x59f   : > { %2341 = vmatpush.bf16.msra.mxu3 %v3382_v32 }
 0x5a0   : > { %v3468_v51 = vpop.eup %3467  ;;  %v1730_v52 = vadd.f32 1e-05, %v1728_v19 }
 0x5a1   : > { %v1732_v30 = vmul.f32 %v3468_v51, %v1729_v41  ;;  %vm1738_vm13 = vweird.f32 %v3468_v51 }
 0x5a2   : > { %3469 = vrsqrt.f32 %v1730_v52  ;;  %vm1739_vm15 = vmor %vm1737_vm14, %vm1738_vm13  ;;  %vm1747_vm1 = vweird.f32 %v1730_v52 }
 0x5a3   : > { %v1733_v54 = vmul.f32 %v3468_v51, %v1732_v30  ;;  %2342 = vmatpush.bf16.msra.mxu3 %v3381_v36 }
 0x5a5   : > { %v1734_v58 = vmul.f32 0.5, %v1733_v54 }
 0x5a7   : > { %v1735_v61 = vsub.f32 1.5, %v1734_v58  ;;  %2343 = vmatpush.bf16.msra.mxu3 %v3380_v38 }
 0x5a8   : > { %v3470_v2 = vpop.eup %3469 }
 0x5a9   : > { %v1736_v3 = vmul.f32 %v3468_v51, %v1735_v61  ;;  %v1742_v4 = vmul.f32 %v3470_v2, %v1730_v52  ;;  %vm1748_vm0 = vweird.f32 %v3470_v2  ;;  %v1801_v52 = vperm.slane %v1796_v40, 3 }
 0x5aa   : > { %vm1749_vm2 = vmor %vm1747_vm1, %vm1748_vm0 }
 0x5ab   : > { %v1743_v5 = vmul.f32 %v3470_v2, %v1742_v4  ;;  %v1740_v6 = vsel %vm1739_vm15, %v3468_v51, %v1736_v3  ;;  %v1800_v51 = vperm.slane %v1796_v40, 2 }
 0x5ac   : > { %v1751_v8 = vmul.f32 %v1740_v6, %v3809_v60 }
 0x5ad   : > { %v1744_v7 = vmul.f32 0.5, %v1743_v5 }
 0x5ae   : > { %v1756_v13 = vmul.f32 %v3428_v9, %v1751_v8  ;;  %v3430_v8 = vld [vmem:[%s4063_s12] ss:$0 sm:$0xff] }
 0x5af   : > { %v1745_v1 = vsub.f32 1.5, %v1744_v7 }
 0x5b0   : > { %v4020_v16 = vadd.f32 %v3429_v14, %v1756_v13 }
 0x5b1   : > { %v1746_v10 = vmul.f32 %v3470_v2, %v1745_v1 }
 0x5b3   : > { %v1750_v11 = vsel %vm1749_vm2, %v3470_v2, %v1746_v10 }
 0x5b4   : > { %v1752_v12 = vmul.f32 %v1750_v11, %v3814_v63  ;;  %v3376_v63 = vld [vmem:[#allocation5 + $0xa0] sm:$0xff] }
 0x5b5   : > { %2325 = vmatpush.bf16.msra.mxu2 %v3376_v63 }
 0x5b6   : > { %v1757_v15 = vmul.f32 %v3428_v9, %v1752_v12 }
 0x5b8   : > { %v4022_v17 = vadd.f32 %v3429_v14, %v1757_v15 }
 0x5b9   : > { %2326 = vmatpush.bf16.msra.mxu2 %v3375_v24 }
 0x5ba   : > { %v1763_v60 = vpack.c.bf16 %v4022_v17, %v4020_v16 }
 0x5bc   : > { %1974 = vmatmul.bf16.vlgmr.msrb.gmra.mxu0 %v1763_v60  ;;  %1988 = vmatmul.bf16.vlgmr.msrb.gmra.mxu1 %v1763_v60 }
 0x5bd   : > { %2002 = vmatmul.bf16.vlgmr.msrb.gmra.mxu2 %v1763_v60  ;;  %2016 = vmatmul.bf16.vlgmr.msrb.gmra.mxu3 %v1763_v60 }
 0x5be   : > { %2327 = vmatpush.bf16.msra.mxu2 %v3374_v29 }
 0x5c2   : > { %2328 = vmatpush.bf16.msra.mxu2 %v3373_v45 }
 0x5c6   : > { %2329 = vmatpush.bf16.msra.mxu2 %v3372_v18 }
 0x639   : > { %v1975_v41 = vpop.f32.mrf.mxu0  ;;  %v1989_v42 = vpop.f32.mrf.mxu1 }
 0x63a   : > { %v1976_v46 = vadd.f32 %v1975_v41, %v1798_v43  ;;  %v1990_v47 = vadd.f32 %v1989_v42, %v1799_v25 }
 0x63c   : > { %v2022_v35 = vmax.f32 %v1976_v46, 0.0  ;;  %v2023_v53 = vmax.f32 %v1990_v47, 0.0 }
 0x640   : > { %v2003_v48 = vpop.f32.mrf.mxu2  ;;  %v2017_v19 = vpop.f32.mrf.mxu3 }
 0x641   : > { %v1977_v44 = vpop.f32.mrf.mxu0  ;;  %v1991_v31 = vpop.f32.mrf.mxu1  ;;  %v2004_v56 = vadd.f32 %v2003_v48, %v1800_v51  ;;  %v2018_v57 = vadd.f32 %v2017_v19, %v1801_v52 }
 0x642   : > { %v1978_v49 = vadd.f32 %v1977_v44, %v1798_v43  ;;  %v1992_v50 = vadd.f32 %v1991_v31, %v1799_v25 }
 0x643   : > { %v2024_v2 = vmax.f32 %v2004_v56, 0.0  ;;  %v2025_v3 = vmax.f32 %v2018_v57, 0.0 }
 0x644   : > { %v2026_v30 = vmax.f32 %v1978_v49, 0.0  ;;  %v2027_v54 = vmax.f32 %v1992_v50, 0.0  ;;  %v3431_v49 = vld [vmem:[%s4058_s7] ss:$0 sm:$0xff] }
 0x646   : > { %v2030_v37 = vpack.c.bf16 %v2026_v30, %v2022_v35  ;;  %v2031_v55 = vpack.c.bf16 %v2027_v54, %v2023_v53 }
 0x648   : > { %v2005_v58 = vpop.f32.mrf.mxu2  ;;  %v2019_v61 = vpop.f32.mrf.mxu3  ;;  %2302 = vmatmul.bf16.vlgmr.msra.gmra.mxu0 %v2030_v37  ;;  %2316 = vmatmul.bf16.vlgmr.msra.gmra.mxu1 %v2031_v55 }
 0x649   : > { %v2006_v39 = vadd.f32 %v2005_v58, %v1800_v51  ;;  %v2020_v62 = vadd.f32 %v2019_v61, %v1801_v52  ;;  %v3432_v51 = vld [vmem:[%s4059_s8] ss:$0 sm:$0xff] }
 0x64b   : > { %v2028_v4 = vmax.f32 %v2006_v39, 0.0  ;;  %v2029_v5 = vmax.f32 %v2020_v62, 0.0 }
 0x64d   : > { %v2032_v6 = vpack.c.bf16 %v2028_v4, %v2024_v2  ;;  %v2033_v7 = vpack.c.bf16 %v2029_v5, %v2025_v3 }
 0x64f   : > { %2330 = vmatmul.bf16.vlgmr.msra.gmra.mxu2 %v2032_v6  ;;  %2344 = vmatmul.bf16.vlgmr.msra.gmra.mxu3 %v2033_v7 }
 0x6c5   : > { %v2303_v1 = vpop.f32.mrf.mxu0  ;;  %v2317_v10 = vpop.f32.mrf.mxu1 }
 0x6c6   : > { %v2304_v9 = vadd.f32 %v3430_v8, %v2303_v1 }
 0x6c8   : > { %v2318_v11 = vadd.f32 %v2317_v10, %v2304_v9 }
 0x6cd   : > { %v2305_v12 = vpop.f32.mrf.mxu0  ;;  %v2319_v63 = vpop.f32.mrf.mxu1 }
 0x6ce   : > { %v2306_v60 = vadd.f32 %v3430_v8, %v2305_v12 }
 0x6d0   : > { %v2320_v21 = vadd.f32 %v2319_v63, %v2306_v60 }
 0x6d2   : > { %v2331_v13 = vpop.f32.mrf.mxu2  ;;  %v2345_v14 = vpop.f32.mrf.mxu3 }
 0x6d3   : > { %v2332_v15 = vadd.f32 %v2331_v13, %v2318_v11 }
 0x6d5   : > { %v2346_v20 = vadd.f32 %v2345_v14, %v2332_v15 }
 0x6d7   : > { %v2350_v59 = vadd.f32 %v2346_v20, %v4020_v16 }
 0x6d9   : > { %2354 = vadd.xlane.f32.xlu2 %v2350_v59 }
 0x6da   : > { %v2333_v22 = vpop.f32.mrf.mxu2  ;;  %v2347_v24 = vpop.f32.mrf.mxu3 }
 0x6db   : > { %v2334_v23 = vadd.f32 %v2333_v22, %v2320_v21 }
 0x6dd   : > { %v2348_v26 = vadd.f32 %v2347_v24, %v2334_v23 }
 0x6df   : > { %v2351_v27 = vadd.f32 %v2348_v26, %v4022_v17 }
 0x6e1   : > { %2356 = vadd.xlane.f32.xlu0 %v2351_v27 }
 0x74c   : > { %v2355_v28 = vpop.xlane.xlu2 %2354 }
 0x74d   : > { %v2358_v29 = vmul.f32 %v2355_v28, %v3806_v0 }
 0x74f   : > { %v2360_v32 = vsub.f32 %v2350_v59, %v2358_v29 }
 0x751   : > { %v2362_v33 = vmul.f32 %v2360_v32, %v2360_v32 }
 0x753   : > { %2364 = vadd.xlane.f32.xlu1 %v2362_v33 }
 0x754   : > { %v2357_v34 = vpop.xlane.xlu0 %2356 }
 0x755   : > { %v2359_v45 = vmul.f32 %v2357_v34, %v3806_v0 }
 0x757   : > { %v2361_v16 = vsub.f32 %v2351_v27, %v2359_v45 }
 0x759   : > { %v2363_v36 = vmul.f32 %v2361_v16, %v2361_v16 }
 0x75b   : > { %2366 = vadd.xlane.f32.xlu2 %v2363_v36 }
 0x7c6   : > { %v2365_v18 = vpop.xlane.xlu1 %2364 }
 0x7c7   : > { %v2368_v38 = vmul.f32 %v2365_v18, %v3806_v0 }
 0x7c9   : > { %v2370_v40 = vadd.f32 1e-05, %v2368_v38 }
 0x7cb   : > { %3471 = vrsqrt.f32 %v2370_v40  ;;  %vm2378_vm4 = vweird.f32 %v2370_v40 }
 0x7ce   : > { %v2367_v41 = vpop.xlane.xlu2 %2366 }
 0x7cf   : > { %v2369_v17 = vmul.f32 %v2367_v41, %v3806_v0 }
 0x7d1   : > { %v3472_v42 = vpop.eup %3471  ;;  %v2371_v43 = vadd.f32 1e-05, %v2369_v17 }
 0x7d2   : > { %v2373_v25 = vmul.f32 %v3472_v42, %v2370_v40  ;;  %vm2379_vm3 = vweird.f32 %v3472_v42 }
 0x7d3   : > { %3473 = vrsqrt.f32 %v2371_v43  ;;  %vm2380_vm5 = vmor %vm2378_vm4, %vm2379_vm3  ;;  %vm2388_vm7 = vweird.f32 %v2371_v43 }
 0x7d4   : > { %v2374_v46 = vmul.f32 %v3472_v42, %v2373_v25 }
 0x7d6   : > { %v2375_v47 = vmul.f32 0.5, %v2374_v46 }
 0x7d8   : > { %v2376_v48 = vsub.f32 1.5, %v2375_v47 }
 0x7d9   : > { %v3474_v19 = vpop.eup %3473 }
 0x7da   : > { %v2377_v44 = vmul.f32 %v3472_v42, %v2376_v48  ;;  %v2383_v31 = vmul.f32 %v3474_v19, %v2371_v43  ;;  %vm2389_vm6 = vweird.f32 %v3474_v19 }
 0x7db   : > { %vm2390_vm8 = vmor %vm2388_vm7, %vm2389_vm6 }
 0x7dc   : > { %v2381_v50 = vsel %vm2380_vm5, %v3472_v42, %v2377_v44  ;;  %v2384_v0 = vmul.f32 %v3474_v19, %v2383_v31 }
 0x7dd   : > { %v2392_v52 = vmul.f32 %v2381_v50, %v2360_v32 }
 0x7de   : > { %v2385_v35 = vmul.f32 0.5, %v2384_v0 }
 0x7df   : > { %v2397_v53 = vmul.f32 %v3431_v49, %v2392_v52 }
 0x7e0   : > { %v2386_v30 = vsub.f32 1.5, %v2385_v35 }
 0x7e1   : > { %v2402_v54 = vadd.f32 %v3432_v51, %v2397_v53 }
 0x7e2   : > { %v2387_v37 = vmul.f32 %v3474_v19, %v2386_v30 }
 0x7e3   : > { %2404 = vst [vmem:[%s508_s18] sm:$0xff] %v2402_v54 }
 0x7e4   : > { %v2391_v55 = vsel %vm2390_vm8, %v3474_v19, %v2387_v37 }
 0x7e5   : > { %v2393_v56 = vmul.f32 %v2391_v55, %v2361_v16 }
 0x7e7   : > { %v2398_v57 = vmul.f32 %v3431_v49, %v2393_v56 }
 0x7e9   : > { %v2403_v58 = vadd.f32 %v3432_v51, %v2398_v57 }
 0x7eb   : > { %2405 = vst [vmem:[%s508_s18 + $0x8] sm:$0xff] %v2403_v58 }
 0x7ec PF: > { %s25_s25 = sadd.s32 1, %s3551_s25  }
 0x7ed   : > { %p22_p7 = scmp.ge.s32.totalorder %s25_s25, 4  }
 0x7ef   :  { %24 = sbr.rel (!%p22_p7) target bundleno = 2 (0x2), region = 128 }
 0x7f4   :  { %2427 = vsyncpa [#allocation4], 1 }
 0x7f5   :  { %2429 = vsyncpa [#allocation4 + $0x1], 1 }
 0x7f6   :  { %2430 = vsyncpa [#allocation6], 1 }

// kernel: transformer_forward.4
= control target key start
LH: loop header
LB: loop body
LE: loop exit
PB: predicated region body
PF: predicated region fallthrough
CT: control target
= control target key end

     0   :  { %s3954_s0 = inlined_call_operand.vmem [shape: s32[2,16,1], index: 0, kind: input, shape index: {}]   ;;  %s3955_s1 = inlined_call_operand.vmem [shape: s32[2,1,16], index: 1, kind: input, shape index: {}]   ;;  %s3956_s2 = inlined_call_operand.vmem [shape: f32[2,16,128], index: 2, kind: input, shape index: {}]   ;;  %s3957_s3 = inlined_call_operand.hbm [shape: bf16[128,1536], index: 3, kind: input, shape index: {}]   ;;  %s3958_s4 = inlined_call_operand.vmem [shape: f32[1,1536], index: 4, kind: input, shape index: {}]   ;;  %s3959_s5 = inlined_call_operand.vmem [shape: f32[1,128], index: 5, kind: input, shape index: {}]   ;;  %s3960_s6 = inlined_call_operand.vmem [shape: f32[1,128], index: 6, kind: input, shape index: {}]   ;;  %s3961_s7 = inlined_call_operand.vmem [shape: f32[1,128], index: 7, kind: input, shape index: {}]   ;;  %s3962_s8 = inlined_call_operand.vmem [shape: f32[1,128], index: 8, kind: input, shape index: {}]   ;;  %s3963_s9 = inlined_call_operand.hbm [shape: bf16[128,512], index: 9, kind: input, shape index: {}]   ;;  %s3964_s10 = inlined_call_operand.vmem [shape: f32[1,512], index: 10, kind: input, shape index: {}]   ;;  %s3965_s11 = inlined_call_operand.hbm [shape: bf16[512,128], index: 11, kind: input, shape index: {}]   ;;  %s3966_s12 = inlined_call_operand.vmem [shape: f32[1,128], index: 12, kind: input, shape index: {}]   ;;  %s3967_s13 = inlined_call_operand.vmem [shape: f32[2,16,128], index: 13, kind: output, shape index: {}]  }
   0x1   :  { %3969 = sst [smem:[#allocation11_spill]] %s3957_s3 }
   0x2   :  { %3970 = sst [smem:[#allocation12_spill]] %s3963_s9 }
   0x3   :  { %18 = vsyncpa [#allocation4], 0 }
   0x4   :  { %19 = vsyncpa [#allocation6], 0  ;;  %s3706_s25 = smov 0  }
   0x5 LB: > { %3971 = sst [smem:[#allocation10_spill]] %s3620_s25  ;;  %s3715_s29 = sadd.s32 4294967295, %s3620_s25   ;;  %s3620_s25 = sphi %s3706_s25, %s25_s25  }
   0x6   : > { %s3972_s9 = sld [smem:[#allocation12_spill]]  ;;  %p2531_p0 = scmp.ge.s32.totalorder %s3620_s25, 1 }
   0x7   : > { %p344_p1 = scmp.lt.s32.totalorder %s3620_s25, 3  ;;  %p3437_p2 = scmp.eq.s32.totalorder %s3715_s29, 0 }
   0x8   : > { %s3622_s14 = smov [#allocation5]   ;;  %s3974_s3 = sld [smem:[#allocation11_spill]] }
   0x9   : > { %p3720_p3 = pnand %p2531_p0, %p344_p1  ;;  %s386_s15 = sshll.u32 %s3622_s14, 4  ;;  %s387_s15 = int_to_ptr.vmem [resolvable:$true] %s386_s15 }
   0xa   : > { %s3623_s20 = smov [#allocation3]   ;;  %s3624_s22 = smov 256  }
   0xb   : > { %p3427_p4 = pneg %p3720_p3  ;;  %s357_s21 = sshll.u32 %s3623_s20, 4  ;;  %s358_s21 = int_to_ptr.vmem [resolvable:$true] %s357_s21 }
   0xc   : > { %s384_s28 = sshll.u32 %s3972_s9, 4  ;;  %s3625_s23 = smov 16   ;;  %s385_s28 = int_to_ptr.hbm [resolvable:$true] %s384_s28 }
   0xd   : > { %p3731_p5 = pnand %p3437_p2, %p3427_p4  ;;  %s401_s27 = sshll.u32 %s3965_s11, 4  ;;  %s402_s27 = int_to_ptr.hbm [resolvable:$true] %s401_s27 }
   0xe   : > { %s355_s18 = sshll.u32 %s3974_s3, 4  ;;  %s3626_s14 = smov 768   ;;  %s356_s18 = int_to_ptr.hbm [resolvable:$true] %s355_s18 }
   0xf   : > { %3433 = dma.hbm_to_vmem [thread:$0]  (!%p3731_p5), %s385_s28, 4096, %s387_s15, [#allocation6], %s3624_s22, %s3624_s22, %s3625_s23  }
  0x10   : > { %s3627_s16 = smov 48   ;;  %s3628_s17 = smov [#allocation7]  }
  0x11   : > { %3430 = dma.hbm_to_vmem [thread:$0]  (!%p3731_p5), %s356_s18, 12288, %s358_s21, [#allocation4], %s3626_s14, %s3626_s14, %s3627_s16  }
  0x12   : > { %s403_s3 = sshll.u32 %s3628_s17, 4  ;;  %s3629_s9 = smov 64   ;;  %s404_s3 = int_to_ptr.vmem [resolvable:$true] %s403_s3 }
  0x13   : > { %s3630_s25 = smov 4   ;;  %444 = sbr.rel (%p3720_p3) target bundleno = 2037 (0x7f5), region = 72 }
  0x14   : > { %3436 = dma.hbm_to_vmem [thread:$0]  (!%p3731_p5), %s402_s27, 4096, %s404_s3, [#allocation6], %s3629_s9, %s3629_s9, %s3630_s25  }
  0x18   : > { %3611 = dma.done.wait (%p3437_p2), [#allocation4], 12288  }
  0x19   : > { %3613 = vsyncadd (%p3437_p2), [#allocation4], 4294955008 }
  0x1a   : > { %3615 = dma.done.wait (%p3437_p2), [#allocation6], 8192  }
  0x1b   : > { %3617 = vsyncadd (%p3437_p2), [#allocation6], 4294959104  ;;  %p507_p6 = scmp.lt.s32.totalorder %s3715_s29, 1  ;;  %v3631_v0 = vmov 0   ;;  %v2884_v2 = vld [vmem:[#allocation3 + $0x2a0] sm:$0xf] }
  0x1c   : > { %3465 = vset.pattern.permute.xlu0 %v3631_v0  ;;  %v3333_v3 = vld [vmem:[#allocation3 + $0x2cc] sm:$0xf0]  ;;  %v3327_v4 = vld [vmem:[#allocation3 + $0x2a4] sm:$0xf]  ;;  %v2886_v6 = vld [vmem:[#allocation3 + $0x2d0] sm:$0xf0] }
  0x1d   : > { %s3978_s29 = smov (!%p507_p6, %s3715_s29), 1  ;;  %v2885_v5 = vor.u32 %v3333_v3, %v2884_v2  ;;  %v2836_v7 = vld [vmem:[#allocation3 + $0x240] sm:$0xf]  ;;  %v3321_v8 = vld [vmem:[#allocation3 + $0x26c] sm:$0xf0]  ;;  %v2889_v9 = vor.u32 %v3327_v4, %v2886_v6  ;;  %vm555_vm2 = vcmask 130048  }
  0x1e   : > { %s3760_s3 = sshll.u32 %s3978_s29, 4  ;;  %v3315_v10 = vld [vmem:[#allocation3 + $0x244] sm:$0xf]  ;;  %v2838_v11 = vld [vmem:[#allocation3 + $0x270] sm:$0xf0]  ;;  %v2837_v12 = vor.u32 %v3321_v8, %v2836_v7  ;;  %s514_s21 = scalar_lea.vmem %s3955_s1, %s3978_s29  ;;  %vm3633_vm6 = vmmov 1  }
  0x1f   : > { %s511_s28 = scalar_lea.vmem %s3954_s0, %s3760_s3  ;;  %1181 = vmatpush.bf16.msra.mxu0 %v2885_v5  ;;  %v2788_v14 = vld [vmem:[#allocation3 + $0x1e0] sm:$0xf]  ;;  %v3309_v15 = vld [vmem:[#allocation3 + $0x20c] sm:$0xf0]  ;;  %1195 = vmatpush.bf16.msra.mxu1 %v2889_v9  ;;  %v2841_v16 = vor.u32 %v3315_v10, %v2838_v11  ;;  %v3303_v17 = vld [vmem:[#allocation3 + $0x1e4] sm:$0xf]  ;;  %s3770_s18 = scalar_lea.vmem %s3956_s2, %s3760_s3 }
  0x20   : > { %v537_v1 = vld [vmem:[%s511_s28] sm:$0xff]  ;;  %v538_v13 = vld [vmem:[%s511_s28 + $0x8] sm:$0xff]  ;;  %v3334_v19 = vld [vmem:[#allocation3 + $0x2d4] sm:$0xf0]  ;;  %v2789_v25 = vor.u32 %v3309_v15, %v2788_v14  ;;  %s524_s29 = scalar_lea.vmem %s3967_s13, %s3760_s3 }
  0x21   : > { %540 = vperm.xlu0 %3465, %v537_v1   ;;  %v2892_v18 = vld [vmem:[#allocation3 + $0x2a8] sm:$0xf]  ;;  %v2790_v20 = vld [vmem:[#allocation3 + $0x210] sm:$0xf0]  ;;  %v3328_v22 = vld [vmem:[#allocation3 + $0x2ac] sm:$0xf] }
  0x22   : > { %v2893_v21 = vor.u32 %v3334_v19, %v2892_v18  ;;  %v2894_v23 = vld [vmem:[#allocation3 + $0x2d8] sm:$0xf0]  ;;  %v2844_v26 = vld [vmem:[#allocation3 + $0x248] sm:$0xf]  ;;  %v3322_v27 = vld [vmem:[#allocation3 + $0x274] sm:$0xf0]  ;;  %v2793_v29 = vor.u32 %v3303_v17, %v2790_v20 }
  0x23   : > { %v2897_v24 = vor.u32 %v3328_v22, %v2894_v23  ;;  %1182 = vmatpush.bf16.msra.mxu0 %v2837_v12  ;;  %v3316_v28 = vld [vmem:[#allocation3 + $0x24c] sm:$0xf]  ;;  %1196 = vmatpush.bf16.msra.mxu1 %v2841_v16  ;;  %v2740_v30 = vld [vmem:[#allocation3 + $0x180] sm:$0xf]  ;;  %v3297_v31 = vld [vmem:[#allocation3 + $0x1ac] sm:$0xf0]  ;;  %v2845_v32 = vor.u32 %v3322_v27, %v2844_v26 }
  0x24   : > { %1209 = vmatpush.bf16.msra.mxu2 %v2893_v21  ;;  %v2846_v33 = vld [vmem:[#allocation3 + $0x278] sm:$0xf0]  ;;  %v3291_v34 = vld [vmem:[#allocation3 + $0x184] sm:$0xf]  ;;  %v2742_v35 = vld [vmem:[#allocation3 + $0x1b0] sm:$0xf0]  ;;  %v2741_v41 = vor.u32 %v3297_v31, %v2740_v30 }
  0x25   : > { %1223 = vmatpush.bf16.msra.mxu3 %v2897_v24  ;;  %v2849_v36 = vor.u32 %v3316_v28, %v2846_v33  ;;  %v2796_v37 = vld [vmem:[#allocation3 + $0x1e8] sm:$0xf]  ;;  %v3310_v38 = vld [vmem:[#allocation3 + $0x214] sm:$0xf0]  ;;  %v3304_v39 = vld [vmem:[#allocation3 + $0x1ec] sm:$0xf]  ;;  %v2745_v44 = vor.u32 %v3291_v34, %v2742_v35 }
  0x26   : > { %v2798_v40 = vld [vmem:[#allocation3 + $0x218] sm:$0xf0]  ;;  %v2692_v42 = vld [vmem:[#allocation3 + $0x120] sm:$0xf]  ;;  %v2797_v43 = vor.u32 %v3310_v38, %v2796_v37  ;;  %v3285_v45 = vld [vmem:[#allocation3 + $0x14c] sm:$0xf0] }
  0x27   : > { %1183 = vmatpush.bf16.msra.mxu0 %v2789_v25  ;;  %1197 = vmatpush.bf16.msra.mxu1 %v2793_v29  ;;  %v2748_v46 = vld [vmem:[#allocation3 + $0x188] sm:$0xf]  ;;  %v3298_v47 = vld [vmem:[#allocation3 + $0x1b4] sm:$0xf0]  ;;  %v3279_v48 = vld [vmem:[#allocation3 + $0x124] sm:$0xf]  ;;  %v2801_v50 = vor.u32 %v3304_v39, %v2798_v40  ;;  %v2693_v53 = vor.u32 %v3285_v45, %v2692_v42 }
  0x28   : > { %1210 = vmatpush.bf16.msra.mxu2 %v2845_v32  ;;  %v2694_v49 = vld [vmem:[#allocation3 + $0x150] sm:$0xf0]  ;;  %v3292_v51 = vld [vmem:[#allocation3 + $0x18c] sm:$0xf]  ;;  %v2750_v52 = vld [vmem:[#allocation3 + $0x1b8] sm:$0xf0]  ;;  %v2749_v55 = vor.u32 %v3298_v47, %v2748_v46 }
  0x29   : > { %543 = vperm.xlu0 %3465, %v538_v13   ;;  %1224 = vmatpush.bf16.msra.mxu3 %v2849_v36  ;;  %v2644_v54 = vld [vmem:[#allocation3 + $0xc0] sm:$0xf]  ;;  %v2697_v56 = vor.u32 %v3279_v48, %v2694_v49  ;;  %v3273_v57 = vld [vmem:[#allocation3 + $0xec] sm:$0xf0]  ;;  %v2700_v58 = vld [vmem:[#allocation3 + $0x128] sm:$0xf]  ;;  %v2753_v62 = vor.u32 %v3292_v51, %v2750_v52 }
  0x2a   : > { %v3286_v59 = vld [vmem:[#allocation3 + $0x154] sm:$0xf0]  ;;  %v3267_v60 = vld [vmem:[#allocation3 + $0xc4] sm:$0xf]  ;;  %v2646_v61 = vld [vmem:[#allocation3 + $0xf0] sm:$0xf0]  ;;  %v2645_v2 = vor.u32 %v3273_v57, %v2644_v54 }
  0x2b   : > { %1184 = vmatpush.bf16.msra.mxu0 %v2741_v41  ;;  %1198 = vmatpush.bf16.msra.mxu1 %v2745_v44  ;;  %v3280_v63 = vld [vmem:[#allocation3 + $0x12c] sm:$0xf]  ;;  %v2702_v1 = vld [vmem:[#allocation3 + $0x158] sm:$0xf0]  ;;  %v2596_v3 = vld [vmem:[#allocation3 + $0x60] sm:$0xf]  ;;  %v2701_v4 = vor.u32 %v3286_v59, %v2700_v58  ;;  %v2649_v5 = vor.u32 %v3267_v60, %v2646_v61 }
  0x2c   : > { %1211 = vmatpush.bf16.msra.mxu2 %v2797_v43  ;;  %v3261_v6 = vld [vmem:[#allocation3 + $0x8c] sm:$0xf0]  ;;  %v2652_v7 = vld [vmem:[#allocation3 + $0xc8] sm:$0xf]  ;;  %v3274_v8 = vld [vmem:[#allocation3 + $0xf4] sm:$0xf0]  ;;  %v2705_v11 = vor.u32 %v3280_v63, %v2702_v1 }
  0x2d   : > { %1225 = vmatpush.bf16.msra.mxu3 %v2801_v50  ;;  %v3255_v9 = vld [vmem:[#allocation3 + $0x64] sm:$0xf]  ;;  %v2598_v10 = vld [vmem:[#allocation3 + $0x90] sm:$0xf0]  ;;  %v3268_v12 = vld [vmem:[#allocation3 + $0xcc] sm:$0xf]  ;;  %v2597_v14 = vor.u32 %v3261_v6, %v2596_v3  ;;  %v2653_v18 = vor.u32 %v3274_v8, %v2652_v7 }
  0x2e   : > { %v2654_v13 = vld [vmem:[#allocation3 + $0xf8] sm:$0xf0]  ;;  %v2548_v15 = vld [vmem:[#allocation3] sm:$0xf]  ;;  %v3249_v16 = vld [vmem:[#allocation3 + $0x2c] sm:$0xf0]  ;;  %v2601_v19 = vor.u32 %v3255_v9, %v2598_v10 }
  0x2f   : > { %1185 = vmatpush.bf16.msra.mxu0 %v2693_v53  ;;  %1199 = vmatpush.bf16.msra.mxu1 %v2697_v56  ;;  %v3243_v17 = vld [vmem:[#allocation3 + $0x4] sm:$0xf]  ;;  %v2550_v20 = vld [vmem:[#allocation3 + $0x30] sm:$0xf0]  ;;  %v2604_v21 = vld [vmem:[#allocation3 + $0x68] sm:$0xf]  ;;  %v2657_v26 = vor.u32 %v3268_v12, %v2654_v13  ;;  %v2549_v32 = vor.u32 %v3249_v16, %v2548_v15 }
  0x30   : > { %1212 = vmatpush.bf16.msra.mxu2 %v2749_v55  ;;  %v3262_v22 = vld [vmem:[#allocation3 + $0x94] sm:$0xf0]  ;;  %v2900_v23 = vld [vmem:[#allocation3 + $0x2b0] sm:$0xf]  ;;  %v3335_v24 = vld [vmem:[#allocation3 + $0x2dc] sm:$0xf0]  ;;  %v2553_v35 = vor.u32 %v3243_v17, %v2550_v20 }
  0x31   : > { %1226 = vmatpush.bf16.msra.mxu3 %v2753_v62  ;;  %v3329_v25 = vld [vmem:[#allocation3 + $0x2b4] sm:$0xf]  ;;  %v2902_v27 = vld [vmem:[#allocation3 + $0x2e0] sm:$0xf0]  ;;  %v3256_v28 = vld [vmem:[#allocation3 + $0x6c] sm:$0xf]  ;;  %v2605_v34 = vor.u32 %v3262_v22, %v2604_v21  ;;  %v2901_v36 = vor.u32 %v3335_v24, %v2900_v23 }
  0x32   : > { %v2606_v29 = vld [vmem:[#allocation3 + $0x98] sm:$0xf0]  ;;  %v526_v30 = vld [vmem:[%s3770_s18] sm:$0xff]  ;;  %v527_v31 = vld [vmem:[%s3770_s18 + $0x8] sm:$0xff]  ;;  %v2905_v40 = vor.u32 %v3329_v25, %v2902_v27 }
  0x33   : > { %1186 = vmatpush.bf16.msra.mxu0 %v2645_v2  ;;  %1200 = vmatpush.bf16.msra.mxu1 %v2649_v5  ;;  %v2852_v33 = vld [vmem:[#allocation3 + $0x250] sm:$0xf]  ;;  %v3323_v37 = vld [vmem:[#allocation3 + $0x27c] sm:$0xf0]  ;;  %v2556_v38 = vld [vmem:[#allocation3 + $0x8] sm:$0xf]  ;;  %v2609_v42 = vor.u32 %v3256_v28, %v2606_v29  ;;  %v3774_v45 = vpack.c.bf16 %v527_v31, %v526_v30 }
  0x34   : > { %1213 = vmatpush.bf16.msra.mxu2 %v2701_v4  ;;  %v3250_v39 = vld [vmem:[#allocation3 + $0x34] sm:$0xf0]  ;;  %v3317_v41 = vld [vmem:[#allocation3 + $0x254] sm:$0xf]  ;;  %v3336_v44 = vld [vmem:[#allocation3 + $0x2e4] sm:$0xf0]  ;;  %v2853_v52 = vor.u32 %v3323_v37, %v2852_v33 }
  0x35   : > { %1227 = vmatpush.bf16.msra.mxu3 %v2705_v11  ;;  %v2908_v43 = vld [vmem:[#allocation3 + $0x2b8] sm:$0xf]  ;;  %v2854_v46 = vld [vmem:[#allocation3 + $0x280] sm:$0xf0]  ;;  %v3244_v47 = vld [vmem:[#allocation3 + $0xc] sm:$0xf]  ;;  %v2557_v49 = vor.u32 %v3250_v39, %v2556_v38 }
  0x36   : > { %v2558_v48 = vld [vmem:[#allocation3 + $0x38] sm:$0xf0]  ;;  %v2910_v51 = vld [vmem:[#allocation3 + $0x2e8] sm:$0xf0]  ;;  %v2804_v53 = vld [vmem:[#allocation3 + $0x1f0] sm:$0xf]  ;;  %v2909_v54 = vor.u32 %v3336_v44, %v2908_v43  ;;  %v2857_v55 = vor.u32 %v3317_v41, %v2854_v46 }
  0x37   : > { %1187 = vmatpush.bf16.msra.mxu0 %v2597_v14  ;;  %1201 = vmatpush.bf16.msra.mxu1 %v2601_v19  ;;  %v3330_v50 = vld [vmem:[#allocation3 + $0x2bc] sm:$0xf]  ;;  %v3311_v56 = vld [vmem:[#allocation3 + $0x21c] sm:$0xf0]  ;;  %v2561_v57 = vor.u32 %v3244_v47, %v2558_v48  ;;  %v2860_v58 = vld [vmem:[#allocation3 + $0x258] sm:$0xf] }
  0x38   : > { %1214 = vmatpush.bf16.msra.mxu2 %v2653_v18  ;;  %v3324_v59 = vld [vmem:[#allocation3 + $0x284] sm:$0xf0]  ;;  %v3305_v60 = vld [vmem:[#allocation3 + $0x1f4] sm:$0xf]  ;;  %v2806_v61 = vld [vmem:[#allocation3 + $0x220] sm:$0xf0]  ;;  %v2913_v62 = vor.u32 %v3330_v50, %v2910_v51  ;;  %v2805_v2 = vor.u32 %v3311_v56, %v2804_v53 }
  0x39   : > { %1228 = vmatpush.bf16.msra.mxu3 %v2657_v26  ;;  %v3318_v63 = vld [vmem:[#allocation3 + $0x25c] sm:$0xf]  ;;  %v2862_v1 = vld [vmem:[#allocation3 + $0x288] sm:$0xf0]  ;;  %v2756_v3 = vld [vmem:[#allocation3 + $0x190] sm:$0xf]  ;;  %v2861_v4 = vor.u32 %v3324_v59, %v2860_v58  ;;  %v2809_v5 = vor.u32 %v3305_v60, %v2806_v61 }
  0x3a   : > { %v3299_v6 = vld [vmem:[#allocation3 + $0x1bc] sm:$0xf0]  ;;  %v2812_v7 = vld [vmem:[#allocation3 + $0x1f8] sm:$0xf]  ;;  %v3312_v8 = vld [vmem:[#allocation3 + $0x224] sm:$0xf0]  ;;  %v2865_v11 = vor.u32 %v3318_v63, %v2862_v1 }
  0x3b   : > { %1188 = vmatpush.bf16.msra.mxu0 %v2549_v32  ;;  %1202 = vmatpush.bf16.msra.mxu1 %v2553_v35  ;;  %v3293_v9 = vld [vmem:[#allocation3 + $0x194] sm:$0xf]  ;;  %v2758_v10 = vld [vmem:[#allocation3 + $0x1c0] sm:$0xf0]  ;;  %v3306_v12 = vld [vmem:[#allocation3 + $0x1fc] sm:$0xf]  ;;  %v2757_v14 = vor.u32 %v3299_v6, %v2756_v3  ;;  %v2813_v16 = vor.u32 %v3312_v8, %v2812_v7 }
  0x3c   : > { %1215 = vmatpush.bf16.msra.mxu2 %v2605_v34  ;;  %v2814_v13 = vld [vmem:[#allocation3 + $0x228] sm:$0xf0]  ;;  %v2708_v15 = vld [vmem:[#allocation3 + $0x130] sm:$0xf]  ;;  %v2761_v17 = vor.u32 %v3293_v9, %v2758_v10  ;;  %v3287_v18 = vld [vmem:[#allocation3 + $0x15c] sm:$0xf0]  ;;  %v528_v10 = vlaneseq }
  0x3d   : > { %1229 = vmatpush.bf16.msra.mxu3 %v2609_v42  ;;  %v2764_v19 = vld [vmem:[#allocation3 + $0x198] sm:$0xf]  ;;  %v3300_v20 = vld [vmem:[#allocation3 + $0x1c4] sm:$0xf0]  ;;  %v3281_v21 = vld [vmem:[#allocation3 + $0x134] sm:$0xf]  ;;  %v2817_v23 = vor.u32 %v3306_v12, %v2814_v13  ;;  %v2709_v28 = vor.u32 %v3287_v18, %v2708_v15 }
  0x3e   : > { %1189 = vmatmul.bf16.vlgmr.msra.gmra.mxu0 %v3774_v45  ;;  %1203 = vmatmul.bf16.vlgmr.msra.gmra.mxu1 %v3774_v45  ;;  %v2710_v22 = vld [vmem:[#allocation3 + $0x160] sm:$0xf0]  ;;  %v3294_v24 = vld [vmem:[#allocation3 + $0x19c] sm:$0xf]  ;;  %v2660_v25 = vld [vmem:[#allocation3 + $0xd0] sm:$0xf]  ;;  %v2765_v29 = vor.u32 %v3300_v20, %v2764_v19 }
  0x3f   : > { %1237 = vmatpush.bf16.msrb.mxu0 %v2901_v36  ;;  %1251 = vmatpush.bf16.msrb.mxu1 %v2905_v40  ;;  %v3275_v26 = vld [vmem:[#allocation3 + $0xfc] sm:$0xf0]  ;;  %v2766_v27 = vld [vmem:[#allocation3 + $0x1c8] sm:$0xf0]  ;;  %v2713_v30 = vor.u32 %v3281_v21, %v2710_v22  ;;  %v2716_v31 = vld [vmem:[#allocation3 + $0x138] sm:$0xf] }
  0x40   : > { %1216 = vmatpush.bf16.msra.mxu2 %v2557_v49  ;;  %v3288_v32 = vld [vmem:[#allocation3 + $0x164] sm:$0xf0]  ;;  %v3269_v33 = vld [vmem:[#allocation3 + $0xd4] sm:$0xf]  ;;  %v2662_v34 = vld [vmem:[#allocation3 + $0x100] sm:$0xf0]  ;;  %v2769_v35 = vor.u32 %v3294_v24, %v2766_v27  ;;  %v2661_v38 = vor.u32 %v3275_v26, %v2660_v25 }
  0x41   : > { %1230 = vmatpush.bf16.msra.mxu3 %v2561_v57  ;;  %v3282_v36 = vld [vmem:[#allocation3 + $0x13c] sm:$0xf]  ;;  %v2718_v37 = vld [vmem:[#allocation3 + $0x168] sm:$0xf0]  ;;  %v2612_v39 = vld [vmem:[#allocation3 + $0x70] sm:$0xf]  ;;  %v2717_v40 = vor.u32 %v3288_v32, %v2716_v31  ;;  %v2665_v41 = vor.u32 %v3269_v33, %v2662_v34 }
  0x42   : > { %v3263_v42 = vld [vmem:[#allocation3 + $0x9c] sm:$0xf0]  ;;  %v2668_v43 = vld [vmem:[#allocation3 + $0xd8] sm:$0xf]  ;;  %v3276_v44 = vld [vmem:[#allocation3 + $0x104] sm:$0xf0]  ;;  %v2721_v48 = vor.u32 %v3282_v36, %v2718_v37 }
  0x43   : > { %1238 = vmatpush.bf16.msrb.mxu0 %v2853_v52  ;;  %1252 = vmatpush.bf16.msrb.mxu1 %v2857_v55  ;;  %v3257_v46 = vld [vmem:[#allocation3 + $0x74] sm:$0xf]  ;;  %v2614_v47 = vld [vmem:[#allocation3 + $0xa0] sm:$0xf0]  ;;  %v3270_v49 = vld [vmem:[#allocation3 + $0xdc] sm:$0xf]  ;;  %v2613_v51 = vor.u32 %v3263_v42, %v2612_v39  ;;  %v2669_v53 = vor.u32 %v3276_v44, %v2668_v43 }
  0x44   : > { %1265 = vmatpush.bf16.msrb.mxu2 %v2909_v54  ;;  %1231 = vmatmul.bf16.vlgmr.msra.gmra.mxu3 %v3774_v45  ;;  %v2670_v50 = vld [vmem:[#allocation3 + $0x108] sm:$0xf0]  ;;  %v2564_v52 = vld [vmem:[#allocation3 + $0x10] sm:$0xf]  ;;  %v2617_v54 = vor.u32 %v3257_v46, %v2614_v47  ;;  %v3251_v55 = vld [vmem:[#allocation3 + $0x3c] sm:$0xf0] }
  0x45   : > { %1279 = vmatpush.bf16.msrb.mxu3 %v2913_v62  ;;  %1217 = vmatmul.bf16.vlgmr.msra.gmra.mxu2 %v3774_v45  ;;  %v2620_v56 = vld [vmem:[#allocation3 + $0x78] sm:$0xf]  ;;  %v3264_v57 = vld [vmem:[#allocation3 + $0xa4] sm:$0xf0]  ;;  %v3245_v58 = vld [vmem:[#allocation3 + $0x14] sm:$0xf]  ;;  %v2673_v60 = vor.u32 %v3270_v49, %v2670_v50  ;;  %v2565_v63 = vor.u32 %v3251_v55, %v2564_v52 }
  0x46   : > { %v2566_v59 = vld [vmem:[#allocation3 + $0x40] sm:$0xf0]  ;;  %v3258_v61 = vld [vmem:[#allocation3 + $0x7c] sm:$0xf]  ;;  %v2622_v62 = vld [vmem:[#allocation3 + $0xa8] sm:$0xf0]  ;;  %v2621_v1 = vor.u32 %v3264_v57, %v2620_v56 }
  0x47   : > { %1239 = vmatpush.bf16.msrb.mxu0 %v2805_v2  ;;  %1253 = vmatpush.bf16.msrb.mxu1 %v2809_v5  ;;  %v2569_v2 = vor.u32 %v3245_v58, %v2566_v59  ;;  %v2572_v3 = vld [vmem:[#allocation3 + $0x18] sm:$0xf]  ;;  %v2625_v5 = vor.u32 %v3258_v61, %v2622_v62  ;;  %v3246_v6 = vld [vmem:[#allocation3 + $0x1c] sm:$0xf]  ;;  %v2574_v7 = vld [vmem:[#allocation3 + $0x48] sm:$0xf0] }
  0x48   : > { %1266 = vmatpush.bf16.msrb.mxu2 %v2861_v4  ;;  %v3252_v4 = vld [vmem:[#allocation3 + $0x44] sm:$0xf0]  ;;  %v2577_v9 = vor.u32 %v3246_v6, %v2574_v7  ;;  %v532_v12 = vand.u32 127, %v528_v10  ;;  %v3632_v19 = vmov 0.0   ;;  %v2918_v31 = vld [vmem:[#allocation3 + $0x2f0] sm:$0xf0] }
  0x49   : > { %1280 = vmatpush.bf16.msrb.mxu3 %v2865_v11  ;;  %v2573_v8 = vor.u32 %v3252_v4, %v2572_v3  ;;  %v529_v11 = vshrl.u32 %v528_v10, 7  ;;  %v2868_v33 = vld [vmem:[#allocation3 + $0x260] sm:$0xf]  ;;  %v3325_v34 = vld [vmem:[#allocation3 + $0x28c] sm:$0xf0] }
  0x4a   : > { %v2869_v36 = vor.u32 %v3325_v34, %v2868_v33  ;;  %v2870_v37 = vld [vmem:[#allocation3 + $0x290] sm:$0xf0]  ;;  %v2820_v39 = vld [vmem:[#allocation3 + $0x200] sm:$0xf]  ;;  %v3301_v47 = vld [vmem:[#allocation3 + $0x1cc] sm:$0xf0] }
  0x4b   : > { %1240 = vmatpush.bf16.msrb.mxu0 %v2757_v14  ;;  %1254 = vmatpush.bf16.msrb.mxu1 %v2761_v17  ;;  %vm533_vm0 = vcmp.gt.s32.totalorder %v532_v12, %v529_v11  ;;  %v3466_v14 = vld [vmem:[%s514_s21] ss:$0 sm:$0xff]  ;;  %v530_v15 = vadd.s32 8, %v529_v11  ;;  %v2822_v43 = vld [vmem:[#allocation3 + $0x230] sm:$0xf0] }
  0x4c   : > { %1267 = vmatpush.bf16.msrb.mxu2 %v2813_v16  ;;  %v535_v13 = vsel %vm533_vm0, 1, %v3631_v0  ;;  %v2772_v46 = vld [vmem:[#allocation3 + $0x1a0] sm:$0xf]  ;;  %v2774_v50 = vld [vmem:[#allocation3 + $0x1d0] sm:$0xf0] }
  0x4d   : > { %1281 = vmatpush.bf16.msrb.mxu3 %v2817_v23  ;;  %vm534_vm1 = vcmp.gt.s32.totalorder %v532_v12, %v530_v15  ;;  %v2773_v49 = vor.u32 %v3301_v47, %v2772_v46  ;;  %v3289_v52 = vld [vmem:[#allocation3 + $0x16c] sm:$0xf0]  ;;  %v2726_v55 = vld [vmem:[#allocation3 + $0x170] sm:$0xf0]  ;;  %v2676_v58 = vld [vmem:[#allocation3 + $0xe0] sm:$0xf] }
  0x4e   : > { %v536_v21 = vsel %vm534_vm1, 1, %v3631_v0  ;;  %v3331_v0 = vld [vmem:[#allocation3 + $0x2c4] sm:$0xf]  ;;  %v3277_v59 = vld [vmem:[#allocation3 + $0x10c] sm:$0xf0] }
  0x4f   : > { %1241 = vmatpush.bf16.msrb.mxu0 %v2709_v28  ;;  %1255 = vmatpush.bf16.msrb.mxu1 %v2713_v30  ;;  %v2916_v28 = vld [vmem:[#allocation3 + $0x2c0] sm:$0xf]  ;;  %v2921_v32 = vor.u32 %v3331_v0, %v2918_v31  ;;  %v2677_v61 = vor.u32 %v3277_v59, %v2676_v58  ;;  %v2678_v62 = vld [vmem:[#allocation3 + $0x110] sm:$0xf0]  ;;  %v3265_v3 = vld [vmem:[#allocation3 + $0xac] sm:$0xf0] }
  0x50   : > { %1268 = vmatpush.bf16.msrb.mxu2 %v2765_v29  ;;  %v3337_v29 = vld [vmem:[#allocation3 + $0x2ec] sm:$0xf0]  ;;  %v3259_v4 = vld [vmem:[#allocation3 + $0x84] sm:$0xf]  ;;  %v2630_v6 = vld [vmem:[#allocation3 + $0xb0] sm:$0xf0] }
  0x51   : > { %1282 = vmatpush.bf16.msrb.mxu3 %v2769_v35  ;;  %v2917_v30 = vor.u32 %v3337_v29, %v2916_v28  ;;  %v3319_v35 = vld [vmem:[#allocation3 + $0x264] sm:$0xf]  ;;  %v2633_v7 = vor.u32 %v3259_v4, %v2630_v6  ;;  %v2580_v10 = vld [vmem:[#allocation3 + $0x20] sm:$0xf]  ;;  %v3253_v11 = vld [vmem:[#allocation3 + $0x4c] sm:$0xf0] }
  0x52   : > { %v3247_v12 = vld [vmem:[#allocation3 + $0x24] sm:$0xf] }
  0x53   : > { %1242 = vmatpush.bf16.msrb.mxu0 %v2661_v38  ;;  %1256 = vmatpush.bf16.msrb.mxu1 %v2665_v41  ;;  %v2873_v38 = vor.u32 %v3319_v35, %v2870_v37  ;;  %v3307_v41 = vld [vmem:[#allocation3 + $0x204] sm:$0xf] }
  0x54   : > { %1269 = vmatpush.bf16.msrb.mxu2 %v2717_v40  ;;  %v3313_v40 = vld [vmem:[#allocation3 + $0x22c] sm:$0xf0]  ;;  %v2825_v44 = vor.u32 %v3307_v41, %v2822_v43 }
  0x55   : > { %1283 = vmatpush.bf16.msrb.mxu3 %v2721_v48  ;;  %v2821_v42 = vor.u32 %v3313_v40, %v2820_v39  ;;  %v3295_v48 = vld [vmem:[#allocation3 + $0x1a4] sm:$0xf] }
  0x57   : > { %1243 = vmatpush.bf16.msrb.mxu0 %v2613_v51  ;;  %1257 = vmatpush.bf16.msrb.mxu1 %v2617_v54  ;;  %v2724_v51 = vld [vmem:[#allocation3 + $0x140] sm:$0xf]  ;;  %v3283_v54 = vld [vmem:[#allocation3 + $0x144] sm:$0xf] }
  0x58   : > { %1270 = vmatpush.bf16.msrb.mxu2 %v2669_v53  ;;  %v2777_v53 = vor.u32 %v3295_v48, %v2774_v50  ;;  %v2725_v56 = vor.u32 %v3289_v52, %v2724_v51  ;;  %v2729_v57 = vor.u32 %v3283_v54, %v2726_v55 }
  0x59   : > { %1284 = vmatpush.bf16.msrb.mxu3 %v2673_v60  ;;  %v3271_v60 = vld [vmem:[#allocation3 + $0xe4] sm:$0xf] }
  0x5b   : > { %1244 = vmatpush.bf16.msrb.mxu0 %v2565_v63  ;;  %1258 = vmatpush.bf16.msrb.mxu1 %v2569_v2  ;;  %v2681_v63 = vor.u32 %v3271_v60, %v2678_v62  ;;  %v2628_v2 = vld [vmem:[#allocation3 + $0x80] sm:$0xf] }
  0x5c   : > { %1271 = vmatpush.bf16.msrb.mxu2 %v2621_v1  ;;  %v3812_v1 = vld [vmem:[%s3958_s4] sm:$0xff] }
  0x5d   : > { %1285 = vmatpush.bf16.msrb.mxu3 %v2625_v5  ;;  %v2629_v5 = vor.u32 %v3265_v3, %v2628_v2  ;;  %v681_v40 = vperm.slane %v3812_v1, 4  ;;  %v682_v41 = vperm.slane %v3812_v1, 5  ;;  %v683_v48 = vperm.slane %v3812_v1, 6 }
  0x5e   : > { %1245 = vmatmul.bf16.vlgmr.msrb.gmra.mxu0 %v3774_v45  ;;  %1259 = vmatmul.bf16.vlgmr.msrb.gmra.mxu1 %v3774_v45  ;;  %v684_v52 = vperm.slane %v3812_v1, 7 }
  0x5f   : > { %1293 = vmatpush.bf16.msra.mxu0 %v2917_v30  ;;  %1307 = vmatpush.bf16.msra.mxu1 %v2921_v32  ;;  %v680_v30 = vperm.slane %v3812_v1, 3 }
  0x60   : > { %1272 = vmatpush.bf16.msrb.mxu2 %v2573_v8  ;;  %v677_v8 = vperm.slane %v3812_v1, 0 }
  0x61   : > { %1286 = vmatpush.bf16.msrb.mxu3 %v2577_v9  ;;  %v678_v9 = vperm.slane %v3812_v1, 1 }
  0x63   : > { %1273 = vmatmul.bf16.vlgmr.msrb.gmra.mxu2 %v3774_v45  ;;  %1294 = vmatpush.bf16.msra.mxu0 %v2869_v36 }
  0x64   : > { %1287 = vmatmul.bf16.vlgmr.msrb.gmra.mxu3 %v3774_v45  ;;  %1308 = vmatpush.bf16.msra.mxu1 %v2873_v38 }
  0x67   : > { %1295 = vmatpush.bf16.msra.mxu0 %v2821_v42 }
  0x68   : > { %1309 = vmatpush.bf16.msra.mxu1 %v2825_v44 }
  0x6b   : > { %1296 = vmatpush.bf16.msra.mxu0 %v2773_v49 }
  0x6c   : > { %1310 = vmatpush.bf16.msra.mxu1 %v2777_v53 }
  0x6f   : > { %1297 = vmatpush.bf16.msra.mxu0 %v2725_v56 }
  0x70   : > { %1311 = vmatpush.bf16.msra.mxu1 %v2729_v57 }
  0x73   : > { %1298 = vmatpush.bf16.msra.mxu0 %v2677_v61 }
  0x74   : > { %1312 = vmatpush.bf16.msra.mxu1 %v2681_v63 }
  0x77   : > { %1299 = vmatpush.bf16.msra.mxu0 %v2629_v5 }
  0x78   : > { %1313 = vmatpush.bf16.msra.mxu1 %v2633_v7 }
  0x93   : > { %v541_v16 = vpop.permute.xlu0 %540 }
  0x94   : > { %v545_v17 = vadd.s32 %v541_v16, %v535_v13  ;;  %v2581_v13 = vor.u32 %v3253_v11, %v2580_v10 }
  0x96   : > { %v3794_v18 = vadd.s32 %v3466_v14, %v545_v17  ;;  %1300 = vmatpush.bf16.msra.mxu0 %v2581_v13 }
  0x98   : > { %vm551_vm3 = vcmp.gt.s32.totalorder %v3794_v18, 0 }
  0x99   : > { %v553_v20 = vsel %vm551_vm3, 1.0, %v3632_v19  ;;  %1301 = vmatmul.bf16.vlgmr.msra.gmra.mxu0 %v3774_v45 }
  0x9a   : > { %v556_v22 = vsel %vm555_vm2, %v553_v20, inf }
  0x9b   : > { %557 = vmin.xlane.f32.xlu1 %v556_v22  ;;  %v544_v23 = vpop.permute.xlu0 %543 }
  0x9c   : > { %v546_v24 = vadd.s32 %v544_v23, %v536_v21 }
  0x9e   : > { %v3802_v25 = vadd.s32 %v3466_v14, %v546_v24  ;;  %v2582_v14 = vld [vmem:[#allocation3 + $0x50] sm:$0xf0]  ;;  %v679_v24 = vperm.slane %v3812_v1, 2 }
  0x9f   : > { %v2585_v16 = vor.u32 %v3247_v12, %v2582_v14 }
  0xa0   : > { %vm552_vm4 = vcmp.gt.s32.totalorder %v3802_v25, 0 }
  0xa1   : > { %v554_v26 = vsel %vm552_vm4, 1.0, %v3632_v19  ;;  %1314 = vmatpush.bf16.msra.mxu1 %v2585_v16  ;;  %v3338_v16 = vld [vmem:[#allocation3 + $0x2f4] sm:$0xf0] }
  0xa2   : > { %v559_v27 = vsel %vm555_vm2, %v554_v26, inf }
  0xa3   : > { %560 = vmin.xlane.f32.xlu1 %v559_v27 }
  0xa4   : > { %1315 = vmatmul.bf16.vlgmr.msra.gmra.mxu1 %v3774_v45 }
  0xbb   : > { %v1190_v15 = vpop.f32.mrf.mxu0  ;;  %v1204_v20 = vpop.f32.mrf.mxu1 }
  0xbc   : > { %v1191_v17 = vadd.f32 %v1190_v15, %v677_v8  ;;  %v1205_v21 = vadd.f32 %v1204_v20, %v678_v9  ;;  %v2924_v15 = vld [vmem:[#allocation3 + $0x2c8] sm:$0xf] }
  0xbd   : > { %v2925_v20 = vor.u32 %v3338_v16, %v2924_v15  ;;  %v2588_v15 = vld [vmem:[#allocation3 + $0x28] sm:$0xf]  ;;  %v3254_v16 = vld [vmem:[#allocation3 + $0x54] sm:$0xf0] }
  0xbe   : > { %v1349_v22 = vpack.c.bf16 %v1205_v21, %v1191_v17  ;;  %v3332_v17 = vld [vmem:[#allocation3 + $0x2cc] sm:$0xf]  ;;  %v2926_v21 = vld [vmem:[#allocation3 + $0x2f8] sm:$0xf0] }
  0xbf   : > { %1321 = vmatpush.bf16.msra.mxu2 %v2925_v20  ;;  %v2589_v20 = vor.u32 %v3254_v16, %v2588_v15 }
  0xc0   : > { %1361 = vst [vmem:[#allocation2] sm:$0xff] %v1349_v22  ;;  %v2876_v22 = vld [vmem:[#allocation3 + $0x268] sm:$0xf] }
  0xc3   : > { %v1192_v23 = vpop.f32.mrf.mxu0  ;;  %v1206_v27 = vpop.f32.mrf.mxu1 }
  0xc4   : > { %v1193_v26 = vadd.f32 %v1192_v23, %v677_v8  ;;  %v1207_v28 = vadd.f32 %v1206_v27, %v678_v9  ;;  %v3326_v23 = vld [vmem:[#allocation3 + $0x294] sm:$0xf0]  ;;  %v2878_v27 = vld [vmem:[#allocation3 + $0x298] sm:$0xf0] }
  0xc6   : > { %v1355_v0 = vpack.c.bf16 %v1207_v28, %v1193_v26  ;;  %v3320_v26 = vld [vmem:[#allocation3 + $0x26c] sm:$0xf] }
  0xc7   : > { %v1232_v32 = vpop.f32.mrf.mxu3  ;;  %v2932_v8 = vld [vmem:[#allocation2] sm:$0xf]  ;;  %v2940_v10 = vld [vmem:[#allocation2 + $0x4] sm:$0xf] }
  0xc8   : > { %v1218_v29 = vpop.f32.mrf.mxu2  ;;  %1367 = vst [vmem:[#allocation2 + $0x30] sm:$0xff] %v1355_v0  ;;  %v1233_v33 = vadd.f32 %v1232_v32, %v680_v30  ;;  %v2881_v0 = vor.u32 %v3320_v26, %v2878_v27 }
  0xc9   : > { %v1219_v31 = vadd.f32 %v1218_v29, %v679_v24  ;;  %v2877_v29 = vor.u32 %v3326_v23, %v2876_v22 }
  0xcb   : > { %v1350_v34 = vpack.c.bf16 %v1233_v33, %v1219_v31  ;;  %1322 = vmatpush.bf16.msra.mxu2 %v2877_v29 }
  0xcd   : > { %1362 = vst [vmem:[#allocation2 + $0x8] sm:$0xff] %v1350_v34  ;;  %v2828_v34 = vld [vmem:[#allocation3 + $0x208] sm:$0xf] }
  0xcf   : > { %v1234_v37 = vpop.f32.mrf.mxu3  ;;  %v3339_v9 = vld [vmem:[#allocation2 + $0x2c] sm:$0xf0]  ;;  %v3342_v11 = vld [vmem:[#allocation2 + $0x30] sm:$0xf0] }
  0xd0   : > { %v1220_v35 = vpop.f32.mrf.mxu2  ;;  %v1235_v38 = vadd.f32 %v1234_v37, %v680_v30  ;;  %v2933_v13 = vor.u32 %v3339_v9, %v2932_v8  ;;  %v2941_v14 = vor.u32 %v3342_v11, %v2940_v10  ;;  %v2636_v9 = vld [vmem:[#allocation3 + $0x88] sm:$0xf]  ;;  %v3266_v10 = vld [vmem:[#allocation3 + $0xb4] sm:$0xf0]  ;;  %v3260_v11 = vld [vmem:[#allocation3 + $0x8c] sm:$0xf] }
  0xd1   : > { %v1221_v36 = vadd.f32 %v1220_v35, %v679_v24  ;;  %v2929_v24 = vor.u32 %v3332_v17, %v2926_v21  ;;  %v3314_v35 = vld [vmem:[#allocation3 + $0x234] sm:$0xf0]  ;;  %v3248_v17 = vld [vmem:[#allocation3 + $0x2c] sm:$0xf]  ;;  %v2590_v21 = vld [vmem:[#allocation3 + $0x58] sm:$0xf0] }
  0xd2   : > { %v2829_v37 = vor.u32 %v3314_v35, %v2828_v34 }
  0xd3   : > { %v1356_v39 = vpack.c.bf16 %v1235_v38, %v1221_v36  ;;  %1335 = vmatpush.bf16.msra.mxu3 %v2929_v24  ;;  %v3308_v36 = vld [vmem:[#allocation3 + $0x20c] sm:$0xf]  ;;  %v2830_v38 = vld [vmem:[#allocation3 + $0x238] sm:$0xf0]  ;;  %v2593_v24 = vor.u32 %v3248_v17, %v2590_v21 }
  0xd4   : > { %v2958_v31 = vld [vmem:[#allocation2 + $0x8] sm:$0xf]  ;;  %1323 = vmatpush.bf16.msra.mxu2 %v2829_v37 }
  0xd5   : > { %1368 = vst [vmem:[#allocation2 + $0x38] sm:$0xff] %v1356_v39  ;;  %v2780_v39 = vld [vmem:[#allocation3 + $0x1a8] sm:$0xf] }
  0xd7   : > { %1336 = vmatpush.bf16.msra.mxu3 %v2881_v0  ;;  %v3634_v0 = vmov 0.17677669  }
  0xdb   : > { %v1246_v42 = vpop.f32.mrf.mxu0  ;;  %v1260_v44 = vpop.f32.mrf.mxu1 }
  0xdc   : > { %v1247_v43 = vadd.f32 %v1246_v42, %v681_v40  ;;  %v1261_v46 = vadd.f32 %v1260_v44, %v682_v41  ;;  %v3345_v32 = vld [vmem:[#allocation2 + $0x34] sm:$0xf0]  ;;  %v3296_v42 = vld [vmem:[#allocation3 + $0x1ac] sm:$0xf]  ;;  %v3348_v21 = vld [vmem:[#allocation2 + $0x38] sm:$0xf0] }
  0xdd   : > { %v2959_v33 = vor.u32 %v3345_v32, %v2958_v31 }
  0xde   : > { %v1351_v47 = vpack.c.bf16 %v1261_v46, %v1247_v43  ;;  %v2782_v43 = vld [vmem:[#allocation3 + $0x1d8] sm:$0xf0] }
  0xdf   : > { %v2785_v46 = vor.u32 %v3296_v42, %v2782_v43 }
  0xe0   : > { %1363 = vst [vmem:[#allocation2 + $0x10] sm:$0xff] %v1351_v47  ;;  %v2732_v47 = vld [vmem:[#allocation3 + $0x148] sm:$0xf] }
  0xe3   : > { %v1248_v49 = vpop.f32.mrf.mxu0  ;;  %v1262_v51 = vpop.f32.mrf.mxu1 }
  0xe4   : > { %v1249_v50 = vadd.f32 %v1248_v49, %v681_v40  ;;  %v1263_v53 = vadd.f32 %v1262_v51, %v682_v41  ;;  %v3302_v40 = vld [vmem:[#allocation3 + $0x1d4] sm:$0xf0]  ;;  %v2833_v41 = vor.u32 %v3308_v36, %v2830_v38  ;;  %v3284_v49 = vld [vmem:[#allocation3 + $0x14c] sm:$0xf]  ;;  %v2734_v51 = vld [vmem:[#allocation3 + $0x178] sm:$0xf0] }
  0xe5   : > { %v2781_v44 = vor.u32 %v3302_v40, %v2780_v39 }
  0xe6   : > { %v1274_v54 = vpop.f32.mrf.mxu2  ;;  %v1357_v56 = vpack.c.bf16 %v1263_v53, %v1249_v50  ;;  %1337 = vmatpush.bf16.msra.mxu3 %v2833_v41  ;;  %v3278_v53 = vld [vmem:[#allocation3 + $0x114] sm:$0xf0] }
  0xe7   : > { %v1275_v55 = vadd.f32 %v1274_v54, %v683_v48  ;;  %v1288_v57 = vpop.f32.mrf.mxu3  ;;  %v2936_v62 = vld [vmem:[#allocation2 + $0x10] sm:$0xf]  ;;  %v2944_v3 = vld [vmem:[#allocation2 + $0x14] sm:$0xf]  ;;  %1324 = vmatpush.bf16.msra.mxu2 %v2781_v44  ;;  %v2737_v54 = vor.u32 %v3284_v49, %v2734_v51 }
  0xe8   : > { %v1289_v58 = vadd.f32 %v1288_v57, %v684_v52  ;;  %1369 = vst [vmem:[#allocation2 + $0x40] sm:$0xff] %v1357_v56  ;;  %v2686_v56 = vld [vmem:[#allocation3 + $0x118] sm:$0xf0] }
  0xea   : > { %v1352_v59 = vpack.c.bf16 %v1289_v58, %v1275_v55  ;;  %1338 = vmatpush.bf16.msra.mxu3 %v2785_v46  ;;  %v3272_v55 = vld [vmem:[#allocation3 + $0xec] sm:$0xf] }
  0xeb   : > { %v2689_v58 = vor.u32 %v3272_v55, %v2686_v56 }
  0xec   : > { %1364 = vst [vmem:[#allocation2 + $0x18] sm:$0xff] %v1352_v59  ;;  %v3827_v59 = vld [vmem:[%s3958_s4 + $0x8] sm:$0xf] }
  0xee   : > { %v1276_v60 = vpop.f32.mrf.mxu2  ;;  %1339 = vmatpush.bf16.msra.mxu3 %v2737_v54 }
  0xef   : > { %v1277_v61 = vadd.f32 %v1276_v60, %v683_v48  ;;  %v1290_v63 = vpop.f32.mrf.mxu3  ;;  %v3340_v2 = vld [vmem:[#allocation2 + $0x3c] sm:$0xf0]  ;;  %v3343_v4 = vld [vmem:[#allocation2 + $0x40] sm:$0xf0]  ;;  %v3290_v48 = vld [vmem:[#allocation3 + $0x174] sm:$0xf0] }
  0xf0   : > { %v1291_v5 = vadd.f32 %v1290_v63, %v684_v52  ;;  %v2937_v6 = vor.u32 %v3340_v2, %v2936_v62  ;;  %v2945_v7 = vor.u32 %v3343_v4, %v2944_v3  ;;  %v2733_v50 = vor.u32 %v3290_v48, %v2732_v47  ;;  %v2684_v52 = vld [vmem:[#allocation3 + $0xe8] sm:$0xf] }
  0xf1   : > { %v2685_v57 = vor.u32 %v3278_v53, %v2684_v52  ;;  %v685_v60 = vperm.slane %v3827_v59, 0 }
  0xf2   : > { %v1358_v1 = vpack.c.bf16 %v1291_v5, %v1277_v61  ;;  %1400 = vmatpush.bf16.xpose.msrb.mxu0 %v2937_v6  ;;  %1462 = vmatpush.bf16.xpose.msrb.mxu1 %v2945_v7  ;;  %v686_v61 = vperm.slane %v3827_v59, 1 }
  0xf3   : > { %v2962_v12 = vld [vmem:[#allocation2 + $0x18] sm:$0xf]  ;;  %1325 = vmatpush.bf16.msra.mxu2 %v2733_v50  ;;  %1340 = vmatpush.bf16.msra.mxu3 %v2689_v58 }
  0xf4   : > { %1370 = vst [vmem:[#allocation2 + $0x48] sm:$0xff] %v1358_v1 }
  0xf7   : > { %1326 = vmatpush.bf16.msra.mxu2 %v2685_v57 }
  0xf9   : > { %1401 = vmatmul.bf16.vlgmr.msrb.gmra.mxu0 %v2933_v13  ;;  %1463 = vmatmul.bf16.vlgmr.msrb.gmra.mxu1 %v2941_v14  ;;  %v2638_v13 = vld [vmem:[#allocation3 + $0xb8] sm:$0xf0] }
  0xfa   : > { %v2641_v14 = vor.u32 %v3260_v11, %v2638_v13 }
  0xfb   : > { %v3346_v28 = vld [vmem:[#allocation2 + $0x44] sm:$0xf0] }
  0xfc   : > { %v2963_v30 = vor.u32 %v3346_v28, %v2962_v12  ;;  %v2637_v12 = vor.u32 %v3266_v10, %v2636_v9  ;;  %1341 = vmatpush.bf16.msra.mxu3 %v2641_v14 }
  0xfe   : > { %1570 = vmatpush.bf16.xpose.msra.mxu0 %v2963_v30  ;;  %1327 = vmatpush.bf16.msra.mxu2 %v2637_v12 }
 0x100   : > { %1342 = vmatpush.bf16.msra.mxu3 %v2593_v24 }
 0x102   : > { %1328 = vmatpush.bf16.msra.mxu2 %v2589_v20 }
 0x103   : > { %1343 = vmatmul.bf16.vlgmr.msra.gmra.mxu3 %v3774_v45 }
 0x105   : > { %1329 = vmatmul.bf16.vlgmr.msra.gmra.mxu2 %v3774_v45 }
 0x109   : > { %1571 = vmatmul.bf16.vlgmr.msra.gmra.mxu0 %v2959_v33 }
 0x10e   : > { %v558_v30 = vpop.xlane.xlu1 %557 }
 0x10f   : > { %vm562_vm5 = vcmp.gt.f32.partialorder %v558_v30, 0.0 }
 0x110   : > { %vm564_vm7 = vmxor %vm562_vm5, %vm3633_vm6  ;;  %v3833_v31 = vsel %vm562_vm5, 0.0, %v3634_v0 }
 0x111   : > { %vm570_vm8 = vmand %vm551_vm3, %vm564_vm7 }
 0x112   : > { %v3839_v35 = vsel %vm570_vm8, -inf, %v3632_v19 }
 0x116   : > { %v1302_v62 = vpop.f32.mrf.mxu0  ;;  %v561_v32 = vpop.xlane.xlu1 %560 }
 0x117   : > { %v1303_v63 = vadd.f32 %v1302_v62, %v685_v60  ;;  %vm563_vm9 = vcmp.gt.f32.partialorder %v561_v32, 0.0 }
 0x118   : > { %vm565_vm10 = vmxor %vm563_vm9, %vm3633_vm6  ;;  %v3845_v37 = vsel %vm563_vm9, 0.0, %v3634_v0 }
 0x119   : > { %vm571_vm11 = vmand %vm552_vm4, %vm565_vm10 }
 0x11a   : > { %v3849_v39 = vsel %vm571_vm11, -inf, %v3632_v19 }
 0x11e   : > { %v1304_v5 = vpop.f32.mrf.mxu0 }
 0x11f   : > { %v1305_v6 = vadd.f32 %v1304_v5, %v685_v60  ;;  %v2975_v60 = vld [vmem:[#allocation2 + $0x1c] sm:$0xf] }
 0x121   : > { %v1316_v2 = vpop.f32.mrf.mxu1 }
 0x122   : > { %v1317_v3 = vadd.f32 %v1316_v2, %v686_v61  ;;  %v687_v2 = vperm.slane %v3827_v59, 2 }
 0x124   : > { %v1353_v4 = vpack.c.bf16 %v1317_v3, %v1303_v63 }
 0x126   : > { %1365 = vst [vmem:[#allocation2 + $0x20] sm:$0xff] %v1353_v4  ;;  %v688_v4 = vperm.slane %v3827_v59, 3  ;;  %v2971_v59 = vld [vmem:[#allocation2 + $0xc] sm:$0xf] }
 0x129   : > { %v1318_v7 = vpop.f32.mrf.mxu1 }
 0x12a   : > { %v1319_v1 = vadd.f32 %v1318_v7, %v686_v61  ;;  %v3349_v61 = vld [vmem:[#allocation2 + $0x48] sm:$0xf0] }
 0x12b   : > { %v2976_v62 = vor.u32 %v3349_v61, %v2975_v60 }
 0x12c   : > { %v1359_v8 = vpack.c.bf16 %v1319_v1, %v1305_v6 }
 0x12d   : > { %v2948_v22 = vld [vmem:[#allocation2 + $0x24] sm:$0xf]  ;;  %v2953_v23 = vld [vmem:[#allocation2 + $0x20] sm:$0xf] }
 0x12e   : > { %1371 = vst [vmem:[#allocation2 + $0x50] sm:$0xff] %v1359_v8 }
 0x135   : > { %v3344_v26 = vld [vmem:[#allocation2 + $0x50] sm:$0xf0]  ;;  %v3341_v27 = vld [vmem:[#allocation2 + $0x4c] sm:$0xf0] }
 0x136   : > { %v2949_v28 = vor.u32 %v3344_v26, %v2948_v22  ;;  %v2954_v29 = vor.u32 %v3341_v27, %v2953_v23  ;;  %v2972_v22 = vor.u32 %v3348_v21, %v2971_v59 }
 0x138   : > { %1512 = vmatpush.bf16.msrb.mxu2 %v2949_v28  ;;  %1535 = vmatpush.bf16.msrb.mxu3 %v2954_v29 }
 0x13c   : > { %1657 = vmatpush.bf16.xpose.msra.mxu2 %v2976_v62 }
 0x176   : > { %v1464_v33 = vpop.f32.mrf.mxu1  ;;  %v1402_v40 = vpop.f32.mrf.mxu0 }
 0x177   : > { %v1469_v34 = vmul.f32 %v1464_v33, %v3833_v31  ;;  %v1407_v42 = vmul.f32 %v1402_v40, %v3833_v31 }
 0x179   : > { %v1471_v45 = vadd.f32 %v1469_v34, %v3839_v35  ;;  %v3855_v44 = vadd.f32 %v1407_v42, %v3839_v35 }
 0x17b   : > { %v1473_v36 = vsel %vm555_vm2, %v1471_v45, -inf  ;;  %v1411_v25 = vsel %vm555_vm2, %v3855_v44, -inf }
 0x17c   : > { %1474 = vmax.xlane.f32.xlu2 %v1473_v36 }
 0x17e   : > { %v1466_v18 = vpop.f32.mrf.mxu1  ;;  %v1404_v53 = vpop.f32.mrf.mxu0 }
 0x17f   : > { %v1470_v38 = vmul.f32 %v1466_v18, %v3845_v37  ;;  %v1408_v55 = vmul.f32 %v1404_v53, %v3845_v37 }
 0x181   : > { %v1472_v41 = vadd.f32 %v1470_v38, %v3849_v39  ;;  %v3863_v57 = vadd.f32 %v1408_v55, %v3849_v39 }
 0x183   : > { %v1476_v43 = vsel %vm555_vm2, %v1472_v41, -inf  ;;  %v1414_v58 = vsel %vm555_vm2, %v3863_v57, -inf }
 0x184   : > { %1477 = vmax.xlane.f32.xlu2 %v1476_v43 }
 0x186   : > { %v1344_v5 = vpop.f32.mrf.mxu3  ;;  %v1572_v32 = vpop.f32.mrf.mxu0 }
 0x187   : > { %v1345_v7 = vadd.f32 %v1344_v5, %v688_v4  ;;  %v1577_v38 = vmul.f32 %v1572_v32, %v3833_v31 }
 0x188   : > { %v1330_v3 = vpop.f32.mrf.mxu2 }
 0x189   : > { %v1331_v6 = vadd.f32 %v1330_v3, %v687_v2 }
 0x18b   : > { %v1354_v8 = vpack.c.bf16 %v1345_v7, %v1331_v6 }
 0x18c   : > { %1412 = vmax.xlane.f32.xlu2 %v1411_v25 }
 0x18d   : > { %1366 = vst [vmem:[#allocation2 + $0x28] sm:$0xff] %v1354_v8 }
 0x18e   : > { %v1346_v10 = vpop.f32.mrf.mxu3 }
 0x18f   : > { %v1347_v13 = vadd.f32 %v1346_v10, %v688_v4 }
 0x190   : > { %v1332_v9 = vpop.f32.mrf.mxu2 }
 0x191   : > { %v1333_v12 = vadd.f32 %v1332_v9, %v687_v2 }
 0x193   : > { %v1360_v15 = vpack.c.bf16 %v1347_v13, %v1333_v12 }
 0x194   : > { %v2966_v23 = vld [vmem:[#allocation2 + $0x28] sm:$0xf]  ;;  %v2979_v26 = vld [vmem:[#allocation2 + $0x2c] sm:$0xf] }
 0x195   : > { %1372 = vst [vmem:[#allocation2 + $0x58] sm:$0xff] %v1360_v15 }
 0x19c   : > { %v3347_v24 = vld [vmem:[#allocation2 + $0x54] sm:$0xf0]  ;;  %v3350_v28 = vld [vmem:[#allocation2 + $0x58] sm:$0xf0] }
 0x19d   : > { %v2967_v27 = vor.u32 %v3347_v24, %v2966_v23  ;;  %v2980_v29 = vor.u32 %v3350_v28, %v2979_v26 }
 0x19f   : > { %1620 = vmatpush.bf16.msra.mxu1 %v2967_v27  ;;  %1707 = vmatpush.bf16.msra.mxu3 %v2980_v29 }
 0x1ef   : > { %v1475_v46 = vpop.xlane.xlu2 %1474 }
 0x1f0   : > { %v1479_v47 = vsub.f32 %v1471_v45, %v1475_v46  ;;  %v1579_v46 = vadd.f32 %v1577_v38, %v3839_v35 }
 0x1f2   : > { %v1481_v48 = vmul.f32 1.442695, %v1479_v47  ;;  %v1574_v47 = vpop.f32.mrf.mxu0 }
 0x1f4   : > { %3472 = vpow2.f32 %v1481_v48 }
 0x1f7   : > { %v1478_v19 = vpop.xlane.xlu2 %1477 }
 0x1f8   : > { %v1480_v49 = vsub.f32 %v1472_v41, %v1478_v19 }
 0x1fa   : > { %v3473_v50 = vpop.eup %3472  ;;  %v1483_v51 = vmul.f32 1.442695, %v1480_v49 }
 0x1fb   : > { %v1485_v52 = vsel %vm555_vm2, %v3473_v50, 0.0 }
 0x1fc   : > { %3474 = vpow2.f32 %v1483_v51  ;;  %1486 = vadd.xlane.f32.xlu0 %v1485_v52 }
 0x1ff   : > { %v1413_v34 = vpop.xlane.xlu2 %1412 }
 0x200   : > { %v1417_v18 = vsub.f32 %v3855_v44, %v1413_v34  ;;  %v1578_v44 = vmul.f32 %v1574_v47, %v3845_v37 }
 0x202   : > { %v3475_v54 = vpop.eup %3474  ;;  %v1419_v41 = vmul.f32 1.442695, %v1417_v18  ;;  %v1580_v51 = vadd.f32 %v1578_v44, %v3849_v39 }
 0x203   : > { %v1488_v56 = vsel %vm555_vm2, %v3475_v54, 0.0 }
 0x204   : > { %1489 = vadd.xlane.f32.xlu1 %v1488_v56  ;;  %v1584_v53 = vsel %vm555_vm2, %v1580_v51, -inf }
 0x20c   : > { %1415 = vmax.xlane.f32.xlu1 %v1414_v58 }
 0x26f   : > { %v1487_v63 = vpop.xlane.xlu0 %1486 }
 0x270   : > { %3476 = vrcp.f32 %v1487_v63 }
 0x276   : > { %v3477_v11 = vpop.eup %3476 }
 0x277   : > { %v1490_v1 = vpop.xlane.xlu1 %1489  ;;  %v1493_v16 = vmul.f32 %v3477_v11, %v3473_v50 }
 0x278   : > { %3478 = vrcp.f32 %v1490_v1 }
 0x279   : > { %3480 = vpow2.f32 %v1419_v41 }
 0x27e   : > { %v3479_v14 = vpop.eup %3478 }
 0x27f   : > { %v1494_v17 = vmul.f32 %v3479_v14, %v3475_v54  ;;  %v1416_v43 = vpop.xlane.xlu1 %1415  ;;  %v3481_v52 = vpop.eup %3480 }
 0x280   : > { %v1418_v19 = vsub.f32 %v3863_v57, %v1416_v43 }
 0x281   : > { %v1495_v20 = vpack.c.bf16 %v1494_v17, %v1493_v16 }
 0x282   : > { %v1421_v50 = vmul.f32 1.442695, %v1418_v19 }
 0x283   : > { %2950 = vmatmul.msk.bf16.vlgmr.msrb.gmra.mxu2 %vm555_vm2, %v1495_v20 }
 0x284   : > { %3482 = vpow2.f32 %v1421_v50 }
 0x28a   : > { %v3483_v54 = vpop.eup %3482 }
 0x293   : > { %1658 = vmatmul.bf16.vlgmr.msra.gmra.mxu2 %v2972_v22 }
 0x306   : > { %v3870_v30 = vpop.f32.mrf.mxu2 }
 0x30e   : > { %v3872_v0 = vpop.f32.mrf.mxu2 }
 0x316   : > { %v1659_v33 = vpop.f32.mrf.mxu2 }
 0x317   : > { %v1664_v45 = vmul.f32 %v1659_v33, %v3833_v31  ;;  %v1581_v31 = vsel %vm555_vm2, %v1579_v46, -inf }
 0x319   : > { %v1666_v36 = vadd.f32 %v1664_v45, %v3839_v35  ;;  %v1423_v35 = vsel %vm555_vm2, %v3481_v52, 0.0 }
 0x31b   : > { %v1668_v40 = vsel %vm555_vm2, %v1666_v36, -inf }
 0x31c   : > { %1669 = vmax.xlane.f32.xlu2 %v1668_v40 }
 0x31e   : > { %v1661_v42 = vpop.f32.mrf.mxu2 }
 0x31f   : > { %v1665_v25 = vmul.f32 %v1661_v42, %v3845_v37  ;;  %v1426_v37 = vsel %vm555_vm2, %v3483_v54, 0.0 }
 0x321   : > { %v1667_v48 = vadd.f32 %v1665_v25, %v3849_v39 }
 0x323   : > { %v1671_v49 = vsel %vm555_vm2, %v1667_v48, -inf }
 0x324   : > { %1582 = vmax.xlane.f32.xlu2 %v1581_v31  ;;  %1672 = vmax.xlane.f32.xlu1 %v1671_v49 }
 0x32c   : > { %1424 = vadd.xlane.f32.xlu2 %v1423_v35  ;;  %1585 = vmax.xlane.f32.xlu1 %v1584_v53  ;;  %v3635_v53 = vmov 128.0  }
 0x334   : > { %1427 = vadd.xlane.f32.xlu1 %v1426_v37 }
 0x38f   : > { %v1670_v55 = vpop.xlane.xlu2 %1669 }
 0x390   : > { %v1674_v56 = vsub.f32 %v1666_v36, %v1670_v55 }
 0x392   : > { %v1676_v57 = vmul.f32 1.442695, %v1674_v56 }
 0x394   : > { %3484 = vpow2.f32 %v1676_v57 }
 0x397   : > { %v1583_v58 = vpop.xlane.xlu2 %1582  ;;  %v1673_v60 = vpop.xlane.xlu1 %1672 }
 0x398   : > { %v1587_v61 = vsub.f32 %v1579_v46, %v1583_v58  ;;  %v1675_v39 = vsub.f32 %v1667_v48, %v1673_v60  ;;  %v3514_v48 = vld [vmem:[%s3770_s18] sm:$0xff] }
 0x39a   : > { %v3485_v62 = vpop.eup %3484  ;;  %v1589_v63 = vmul.f32 1.442695, %v1587_v61  ;;  %v1678_v2 = vmul.f32 1.442695, %v1675_v39 }
 0x39b   : > { %v1680_v3 = vsel %vm555_vm2, %v3485_v62, 0.0 }
 0x39c   : > { %3486 = vpow2.f32 %v1589_v63  ;;  %1681 = vadd.xlane.f32.xlu2 %v1680_v3  ;;  %v3096_v3 = vld [vmem:[#allocation5 + $0xe0] sm:$0xf] }
 0x39d   : > { %3488 = vpow2.f32 %v1678_v2 }
 0x39f   : > { %v1586_v4 = vpop.xlane.xlu1 %1585  ;;  %v1425_v8 = vpop.xlane.xlu2 %1424 }
 0x3a0   : > { %v1588_v5 = vsub.f32 %v1580_v51, %v1586_v4  ;;  %v3381_v4 = vld [vmem:[#allocation5 + $0xec] sm:$0xf0] }
 0x3a2   : > { %v3487_v6 = vpop.eup %3486  ;;  %v1591_v7 = vmul.f32 1.442695, %v1588_v5  ;;  %v3379_v5 = vld [vmem:[#allocation5 + $0xe4] sm:$0xf] }
 0x3a3   : > { %v3489_v1 = vpop.eup %3488  ;;  %v1593_v9 = vsel %vm555_vm2, %v3487_v6, 0.0 }
 0x3a4   : > { %3490 = vpow2.f32 %v1591_v7  ;;  %1594 = vadd.xlane.f32.xlu2 %v1593_v9  ;;  %v1683_v10 = vsel %vm555_vm2, %v3489_v1, 0.0  ;;  %v3098_v7 = vld [vmem:[#allocation5 + $0xf0] sm:$0xf0] }
 0x3a5   : > { %1684 = vadd.xlane.f32.xlu1 %v1683_v10  ;;  %3492 = vrcp.f32 %v1425_v8  ;;  %v3382_v8 = vld [vmem:[#allocation5 + $0xf4] sm:$0xf0]  ;;  %v3101_v9 = vor.u32 %v3379_v5, %v3098_v7  ;;  %v3024_v7 = vld [vmem:[#allocation5 + $0x48] sm:$0xf] }
 0x3a7   : > { %v1428_v11 = vpop.xlane.xlu1 %1427  ;;  %1996 = vmatpush.bf16.msrb.mxu1 %v3101_v9 }
 0x3a8   : > { %3494 = vrcp.f32 %v1428_v11  ;;  %v3380_v11 = vld [vmem:[#allocation5 + $0xec] sm:$0xf] }
 0x3aa   : > { %v3491_v12 = vpop.eup %3490 }
 0x3ab   : > { %v1596_v13 = vsel %vm555_vm2, %v3491_v12, 0.0  ;;  %v3493_v14 = vpop.eup %3492 }
 0x3ac   : > { %1597 = vadd.xlane.f32.xlu0 %v1596_v13  ;;  %v1431_v16 = vmul.f32 %v3493_v14, %v3481_v52  ;;  %v3515_v52 = vld [vmem:[%s3770_s18 + $0x8] sm:$0xff]  ;;  %v3080_v14 = vld [vmem:[#allocation5 + $0xc0] sm:$0xf] }
 0x3ae   : > { %v3495_v15 = vpop.eup %3494 }
 0x3af   : > { %v1432_v17 = vmul.f32 %v3495_v15, %v3483_v54  ;;  %v3377_v15 = vld [vmem:[#allocation5 + $0xcc] sm:$0xf0] }
 0x3b1   : > { %v1433_v20 = vpack.c.bf16 %v1432_v17, %v1431_v16  ;;  %v3375_v16 = vld [vmem:[#allocation5 + $0xc4] sm:$0xf]  ;;  %v3081_v17 = vor.u32 %v3377_v15, %v3080_v14  ;;  %v3357_v14 = vld [vmem:[#allocation5 + $0x2c] sm:$0xf0] }
 0x3b2   : > { %v3355_v15 = vld [vmem:[#allocation5 + $0x24] sm:$0xf] }
 0x3b3   : > { %2955 = vmatmul.msk.bf16.vlgmr.msrb.gmra.mxu3 %vm555_vm2, %v1433_v20  ;;  %v3082_v20 = vld [vmem:[#allocation5 + $0xd0] sm:$0xf0] }
 0x40f   : > { %v1682_v59 = vpop.xlane.xlu2 %1681 }
 0x410   : > { %3496 = vrcp.f32 %v1682_v59  ;;  %v3088_v59 = vld [vmem:[#allocation5 + $0xc8] sm:$0xf] }
 0x416   : > { %v3497_v23 = vpop.eup %3496 }
 0x417   : > { %v1595_v22 = vpop.xlane.xlu2 %1594  ;;  %v1688_v27 = vmul.f32 %v3497_v23, %v3485_v62 }
 0x418   : > { %v1685_v21 = vpop.xlane.xlu1 %1684 }
 0x419   : > { %3498 = vrcp.f32 %v1685_v21  ;;  %v3378_v21 = vld [vmem:[#allocation5 + $0xd4] sm:$0xf0] }
 0x41a   : > { %3500 = vrcp.f32 %v1595_v22  ;;  %v3085_v22 = vor.u32 %v3375_v16, %v3082_v20  ;;  %v3089_v23 = vor.u32 %v3378_v21, %v3088_v59  ;;  %v3008_v20 = vld [vmem:[#allocation5 + $0x28] sm:$0xf]  ;;  %v3358_v59 = vld [vmem:[#allocation5 + $0x34] sm:$0xf0] }
 0x41c   : > { %1997 = vmatpush.bf16.msrb.mxu1 %v3085_v22 }
 0x41f   : > { %v3499_v24 = vpop.eup %3498  ;;  %v1598_v26 = vpop.xlane.xlu0 %1597 }
 0x420   : > { %v1689_v28 = vmul.f32 %v3499_v24, %v3489_v1  ;;  %3502 = vrcp.f32 %v1598_v26  ;;  %v3501_v32 = vpop.eup %3500  ;;  %v3104_v1 = vld [vmem:[#allocation5 + $0xe8] sm:$0xf]  ;;  %v3376_v24 = vld [vmem:[#allocation5 + $0xcc] sm:$0xf]  ;;  %v3090_v26 = vld [vmem:[#allocation5 + $0xd8] sm:$0xf0] }
 0x421   : > { %v1601_v34 = vmul.f32 %v3501_v32, %v3487_v6  ;;  %3504 = vrcp.f32 %v3635_v53  ;;  %v3097_v6 = vor.u32 %v3381_v4, %v3096_v3  ;;  %v3105_v10 = vor.u32 %v3382_v8, %v3104_v1  ;;  %v3371_v32 = vld [vmem:[#allocation5 + $0xa4] sm:$0xf]  ;;  %v3365_v53 = vld [vmem:[#allocation5 + $0x6c] sm:$0xf0]  ;;  %v3362_v1 = vld [vmem:[#allocation5 + $0x54] sm:$0xf0] }
 0x422   : > { %v1690_v29 = vpack.c.bf16 %v1689_v28, %v1688_v27  ;;  %v3093_v27 = vor.u32 %v3376_v24, %v3090_v26  ;;  %v3064_v28 = vld [vmem:[#allocation5 + $0xa0] sm:$0xf]  ;;  %v3361_v3 = vld [vmem:[#allocation5 + $0x4c] sm:$0xf0]  ;;  %v3359_v4 = vld [vmem:[#allocation5 + $0x44] sm:$0xf]  ;;  %v3025_v9 = vor.u32 %v3362_v1, %v3024_v7 }
 0x423   : > { %1982 = vmatpush.bf16.msrb.mxu0 %v3097_v6  ;;  %2010 = vmatpush.bf16.msrb.mxu2 %v3105_v10  ;;  %v3018_v6 = vld [vmem:[#allocation5 + $0x50] sm:$0xf0]  ;;  %v3360_v10 = vld [vmem:[#allocation5 + $0x4c] sm:$0xf]  ;;  %v3010_v26 = vld [vmem:[#allocation5 + $0x38] sm:$0xf0] }
 0x424   : > { %2981 = vmatmul.msk.bf16.vlgmr.msra.gmra.mxu3 %vm555_vm2, %v1690_v29  ;;  %v3373_v29 = vld [vmem:[#allocation5 + $0xac] sm:$0xf0]  ;;  %v3021_v8 = vor.u32 %v3359_v4, %v3018_v6  ;;  %v3356_v24 = vld [vmem:[#allocation5 + $0x2c] sm:$0xf] }
 0x426   : > { %v3503_v33 = vpop.eup %3502 }
 0x427   : > { %v1602_v45 = vmul.f32 %v3503_v33, %v3491_v12  ;;  %v3106_v12 = vld [vmem:[#allocation5 + $0xf8] sm:$0xf0]  ;;  %1983 = vmatpush.bf16.msrb.mxu0 %v3081_v17  ;;  %2011 = vmatpush.bf16.msrb.mxu2 %v3089_v23  ;;  %v3065_v33 = vor.u32 %v3373_v29, %v3064_v28  ;;  %v3002_v17 = vld [vmem:[#allocation5 + $0x30] sm:$0xf0]  ;;  %v3009_v23 = vor.u32 %v3358_v59, %v3008_v20 }
 0x428   : > { %v3109_v13 = vor.u32 %v3380_v11, %v3106_v12  ;;  %v3026_v11 = vld [vmem:[#allocation5 + $0x58] sm:$0xf0]  ;;  %v3005_v22 = vor.u32 %v3355_v15, %v3002_v17  ;;  %v3013_v29 = vor.u32 %v3356_v24, %v3010_v26 }
 0x429   : > { %v1603_v36 = vpack.c.bf16 %v1602_v45, %v1601_v34  ;;  %v3066_v34 = vld [vmem:[#allocation5 + $0xb0] sm:$0xf0]  ;;  %v3072_v45 = vld [vmem:[#allocation5 + $0xa8] sm:$0xf]  ;;  %v3029_v12 = vor.u32 %v3360_v10, %v3026_v11  ;;  %v3386_v20 = vld [vmem:[#allocation7 + $0x18] sm:$0xff] }
 0x42a   : > { %2024 = vmatpush.bf16.msrb.mxu3 %v3109_v13  ;;  %v3000_v13 = vld [vmem:[#allocation5 + $0x20] sm:$0xf]  ;;  %v3394_v59 = vld [vmem:[#allocation7 + $0x58] sm:$0xff] }
 0x42b   : > { %2968 = vmatmul.msk.bf16.vlgmr.msra.gmra.mxu1 %vm555_vm2, %v1603_v36  ;;  %v3374_v36 = vld [vmem:[#allocation5 + $0xb4] sm:$0xf0]  ;;  %1984 = vmatpush.bf16.msrb.mxu0 %v3065_v33  ;;  %v3001_v16 = vor.u32 %v3357_v14, %v3000_v13  ;;  %v3351_v33 = vld [vmem:[#allocation5 + $0x4] sm:$0xf]  ;;  %v3468_v14 = vld [vmem:[%s3960_s6] ss:$0 sm:$0xff] }
 0x42c   : > { %v3402_v24 = vld [vmem:[#allocation7 + $0x98] sm:$0xff] }
 0x42d   : > { %v3410_v26 = vld [vmem:[#allocation7 + $0xd8] sm:$0xff] }
 0x42e   : > { %2025 = vmatpush.bf16.msrb.mxu3 %v3093_v27  ;;  %v2984_v27 = vld [vmem:[#allocation5] sm:$0xf] }
 0x436   : > { %v1537_v18 = vpop.f32.mrf.mxu3 }
 0x437   : > { %v1538_v40 = vadd.f32 %v1537_v18, %v3870_v30  ;;  %v3505_v30 = vpop.eup %3504  ;;  %v3069_v18 = vor.u32 %v3371_v32, %v3066_v34  ;;  %v3353_v32 = vld [vmem:[#allocation5 + $0xc] sm:$0xf0]  ;;  %v2986_v34 = vld [vmem:[#allocation5 + $0x10] sm:$0xf0] }
 0x438   : > { %v1727_v54 = vmul.f32 128.0, %v3505_v30  ;;  %vm1731_vm12 = vweird.f32 %v3505_v30 }
 0x439   : > { %1998 = vmatpush.bf16.msrb.mxu1 %v3069_v18  ;;  %v2992_v18 = vld [vmem:[#allocation5 + $0x8] sm:$0xf] }
 0x43a   : > { %v1728_v37 = vsub.f32 1.0, %v1727_v54 }
 0x43c   : > { %v1729_v55 = vmul.f32 %v3505_v30, %v1728_v37  ;;  %v3034_v37 = vld [vmem:[#allocation5 + $0x70] sm:$0xf0] }
 0x43e   : > { %v1539_v38 = vpop.f32.mrf.mxu3  ;;  %v1730_v56 = vadd.f32 %v3505_v30, %v1729_v55  ;;  %v3040_v55 = vld [vmem:[#allocation5 + $0x68] sm:$0xf] }
 0x43f   : > { %v1540_v47 = vadd.f32 %v1539_v38, %v3872_v0  ;;  %v3073_v38 = vor.u32 %v3374_v36, %v3072_v45  ;;  %v2985_v45 = vor.u32 %v3353_v32, %v2984_v27  ;;  %v2989_v36 = vor.u32 %v3351_v33, %v2986_v34  ;;  %v3384_v27 = vld [vmem:[#allocation7 + $0x8] sm:$0xff]  ;;  %v3409_v32 = vld [vmem:[#allocation7 + $0xd0] sm:$0xff]  ;;  %v3383_v33 = vld [vmem:[#allocation7] sm:$0xff] }
 0x440   : > { %v3901_v0 = vsel %vm1731_vm12, %v3505_v30, %v1730_v56  ;;  %v3363_v30 = vld [vmem:[#allocation5 + $0x64] sm:$0xf]  ;;  %v3366_v56 = vld [vmem:[#allocation5 + $0x74] sm:$0xf0] }
 0x441   : > { %2012 = vmatpush.bf16.msrb.mxu2 %v3073_v38  ;;  %v3354_v38 = vld [vmem:[#allocation5 + $0x14] sm:$0xf0]  ;;  %v3391_v34 = vld [vmem:[#allocation7 + $0x40] sm:$0xff] }
 0x4a7   : > { %v1709_v41 = vpop.f32.mrf.mxu3 }
 0x4a8   : > { %v1622_v42 = vpop.f32.mrf.mxu1 }
 0x4a9   : > { %v1627_v43 = vadd.f32 %v1622_v42, %v1538_v40  ;;  %v3372_v40 = vld [vmem:[#allocation5 + $0xac] sm:$0xf] }
 0x4ab   : > { %v1714_v25 = vadd.f32 %v1709_v41, %v1627_v43  ;;  %v3074_v41 = vld [vmem:[#allocation5 + $0xb8] sm:$0xf0]  ;;  %v3048_v43 = vld [vmem:[#allocation5 + $0x80] sm:$0xf] }
 0x4ac   : > { %v3077_v42 = vor.u32 %v3372_v40, %v3074_v41  ;;  %v3352_v40 = vld [vmem:[#allocation5 + $0xc] sm:$0xf] }
 0x4ad   : > { %v1716_v46 = vmul.f32 0.25, %v1714_v25  ;;  %v3369_v25 = vld [vmem:[#allocation5 + $0x8c] sm:$0xf0] }
 0x4ae   : > { %2026 = vmatpush.bf16.msrb.mxu3 %v3077_v42  ;;  %v2993_v42 = vor.u32 %v3354_v38, %v2992_v18  ;;  %v3399_v18 = vld [vmem:[#allocation7 + $0x80] sm:$0xff] }
 0x4af   : > { %v1718_v19 = vadd.f32 %v3514_v48, %v1716_v46  ;;  %v1711_v49 = vpop.f32.mrf.mxu3  ;;  %v3367_v46 = vld [vmem:[#allocation5 + $0x84] sm:$0xf]  ;;  %v3050_v48 = vld [vmem:[#allocation5 + $0x90] sm:$0xf0] }
 0x4b0   : > { %v1624_v44 = vpop.f32.mrf.mxu1  ;;  %v3407_v38 = vld [vmem:[#allocation7 + $0xc0] sm:$0xff] }
 0x4b1   : > { %v1628_v31 = vadd.f32 %v1624_v44, %v1540_v47  ;;  %1722 = vadd.xlane.f32.xlu1 %v1718_v19  ;;  %v3049_v47 = vor.u32 %v3369_v25, %v3048_v43  ;;  %v3370_v44 = vld [vmem:[#allocation5 + $0x94] sm:$0xf0]  ;;  %v2994_v43 = vld [vmem:[#allocation5 + $0x18] sm:$0xf0] }
 0x4b2   : > { %v2997_v25 = vor.u32 %v3352_v40, %v2994_v43  ;;  %v1812_v40 = vld [vmem:[%s3964_s10] sm:$0xf] }
 0x4b3   : > { %v1715_v50 = vadd.f32 %v1711_v49, %v1628_v31  ;;  %v3053_v31 = vor.u32 %v3367_v46, %v3050_v48  ;;  %1985 = vmatpush.bf16.msrb.mxu0 %v3049_v47  ;;  %v3390_v47 = vld [vmem:[#allocation7 + $0x38] sm:$0xff]  ;;  %v1814_v43 = vperm.slane %v1812_v40, 0 }
 0x4b4   : > { %v3398_v48 = vld [vmem:[#allocation7 + $0x78] sm:$0xff] }
 0x4b5   : > { %v1717_v51 = vmul.f32 0.25, %v1715_v50  ;;  %v3368_v50 = vld [vmem:[#allocation5 + $0x8c] sm:$0xf]  ;;  %1999 = vmatpush.bf16.msrb.mxu1 %v3053_v31  ;;  %v3414_v31 = vld [vmem:[#allocation7 + $0xf8] sm:$0xff] }
 0x4b7   : > { %v1719_v35 = vadd.f32 %v3515_v52, %v1717_v51  ;;  %v3058_v51 = vld [vmem:[#allocation5 + $0x98] sm:$0xf0] }
 0x4b8   : > { %v3061_v52 = vor.u32 %v3368_v50, %v3058_v51  ;;  %v3397_v50 = vld [vmem:[#allocation7 + $0x70] sm:$0xff] }
 0x4b9   : > { %1724 = vadd.xlane.f32.xlu2 %v1719_v35 }
 0x4ba   : > { %2027 = vmatpush.bf16.msrb.mxu3 %v3061_v52 }
 0x524   : > { %v1723_v57 = vpop.xlane.xlu1 %1722 }
 0x525   : > { %v1733_v58 = vmul.f32 %v3901_v0, %v1723_v57  ;;  %v3037_v57 = vor.u32 %v3363_v30, %v3034_v37  ;;  %v3388_v37 = vld [vmem:[#allocation7 + $0x28] sm:$0xff] }
 0x527   : > { %v3904_v60 = vsub.f32 %v1718_v19, %v1733_v58  ;;  %v3056_v19 = vld [vmem:[#allocation5 + $0x88] sm:$0xf]  ;;  %v3041_v58 = vor.u32 %v3366_v56, %v3040_v55  ;;  %2000 = vmatpush.bf16.msrb.mxu1 %v3037_v57 }
 0x528   : > { %v3057_v49 = vor.u32 %v3370_v44, %v3056_v19  ;;  %v3406_v44 = vld [vmem:[#allocation7 + $0xb8] sm:$0xff]  ;;  %v3396_v55 = vld [vmem:[#allocation7 + $0x68] sm:$0xff] }
 0x529   : > { %v1737_v61 = vmul.f32 %v3904_v60, %v3904_v60  ;;  %v3404_v56 = vld [vmem:[#allocation7 + $0xa8] sm:$0xff] }
 0x52a   : > { %2013 = vmatpush.bf16.msrb.mxu2 %v3057_v49  ;;  %v3389_v49 = vld [vmem:[#allocation7 + $0x30] sm:$0xff]  ;;  %v3412_v57 = vld [vmem:[#allocation7 + $0xe8] sm:$0xff] }
 0x52b   : > { %1739 = vadd.xlane.f32.xlu0 %v1737_v61  ;;  %v3364_v61 = vld [vmem:[#allocation5 + $0x6c] sm:$0xf]  ;;  %2001 = vmatpush.bf16.msrb.mxu1 %v3021_v8 }
 0x52c   : > { %v1725_v39 = vpop.xlane.xlu2 %1724 }
 0x52d   : > { %v1734_v62 = vmul.f32 %v3901_v0, %v1725_v39  ;;  %v3042_v39 = vld [vmem:[#allocation5 + $0x78] sm:$0xf0] }
 0x52e   : > { %2014 = vmatpush.bf16.msrb.mxu2 %v3041_v58 }
 0x52f   : > { %v3909_v63 = vsub.f32 %v1719_v35, %v1734_v62  ;;  %v3032_v35 = vld [vmem:[#allocation5 + $0x60] sm:$0xf]  ;;  %v3045_v62 = vor.u32 %v3364_v61, %v3042_v39  ;;  %2002 = vmatpush.bf16.msrb.mxu1 %v3005_v22  ;;  %v3385_v22 = vld [vmem:[#allocation7 + $0x10] sm:$0xff] }
 0x530   : > { %v3033_v54 = vor.u32 %v3365_v53, %v3032_v35  ;;  %v3405_v35 = vld [vmem:[#allocation7 + $0xb0] sm:$0xff]  ;;  %v3387_v39 = vld [vmem:[#allocation7 + $0x20] sm:$0xff] }
 0x531   : > { %v1738_v2 = vmul.f32 %v3909_v63, %v3909_v63  ;;  %2028 = vmatpush.bf16.msrb.mxu3 %v3045_v62  ;;  %v3413_v53 = vld [vmem:[#allocation7 + $0xf0] sm:$0xff]  ;;  %v3395_v62 = vld [vmem:[#allocation7 + $0x60] sm:$0xff] }
 0x532   : > { %1986 = vmatpush.bf16.msrb.mxu0 %v3033_v54  ;;  %2015 = vmatpush.bf16.msrb.mxu2 %v3025_v9  ;;  %v3467_v9 = vld [vmem:[%s3959_s5] ss:$0 sm:$0xff] }
 0x533   : > { %1741 = vadd.xlane.f32.xlu1 %v1738_v2  ;;  %v3016_v2 = vld [vmem:[#allocation5 + $0x40] sm:$0xf]  ;;  %2003 = vmatpush.bf16.msrb.mxu1 %v2989_v36  ;;  %v3408_v36 = vld [vmem:[#allocation7 + $0xc8] sm:$0xff] }
 0x534   : > { %v3017_v5 = vor.u32 %v3361_v3, %v3016_v2 }
 0x535   : > { %2029 = vmatpush.bf16.msrb.mxu3 %v3029_v12 }
 0x536   : > { %1987 = vmatpush.bf16.msrb.mxu0 %v3017_v5  ;;  %2016 = vmatpush.bf16.msrb.mxu2 %v3009_v23  ;;  %v3393_v23 = vld [vmem:[#allocation7 + $0x50] sm:$0xff] }
 0x537   : > { %2324 = vmatpush.bf16.msra.mxu1 %v3398_v48 }
 0x539   : > { %2030 = vmatpush.bf16.msrb.mxu3 %v3013_v29  ;;  %v3401_v29 = vld [vmem:[#allocation7 + $0x90] sm:$0xff] }
 0x53a   : > { %1988 = vmatpush.bf16.msrb.mxu0 %v3001_v16  ;;  %2017 = vmatpush.bf16.msrb.mxu2 %v2993_v42 }
 0x53b   : > { %2325 = vmatpush.bf16.msra.mxu1 %v3397_v50 }
 0x53d   : > { %2031 = vmatpush.bf16.msrb.mxu3 %v2997_v25  ;;  %v1815_v25 = vperm.slane %v1812_v40, 1 }
 0x53e   : > { %1989 = vmatpush.bf16.msrb.mxu0 %v2985_v45  ;;  %2338 = vmatpush.bf16.msra.mxu2 %v3406_v44  ;;  %v3400_v45 = vld [vmem:[#allocation7 + $0x88] sm:$0xff] }
 0x53f   : > { %2326 = vmatpush.bf16.msra.mxu1 %v3396_v55 }
 0x541   : > { %2352 = vmatpush.bf16.msra.mxu3 %v3414_v31 }
 0x542   : > { %2310 = vmatpush.bf16.msra.mxu0 %v3390_v47  ;;  %2339 = vmatpush.bf16.msra.mxu2 %v3405_v35 }
 0x543   : > { %2327 = vmatpush.bf16.msra.mxu1 %v3395_v62 }
 0x545   : > { %2353 = vmatpush.bf16.msra.mxu3 %v3413_v53 }
 0x546   : > { %2311 = vmatpush.bf16.msra.mxu0 %v3389_v49  ;;  %2340 = vmatpush.bf16.msra.mxu2 %v3404_v56 }
 0x547   : > { %2328 = vmatpush.bf16.msra.mxu1 %v3394_v59 }
 0x549   : > { %2354 = vmatpush.bf16.msra.mxu3 %v3412_v57 }
 0x54a   : > { %2312 = vmatpush.bf16.msra.mxu0 %v3388_v37 }
 0x54b   : > { %2329 = vmatpush.bf16.msra.mxu1 %v3393_v23 }
 0x54e   : > { %2313 = vmatpush.bf16.msra.mxu0 %v3387_v39 }
 0x552   : > { %2314 = vmatpush.bf16.msra.mxu0 %v3386_v20 }
 0x556   : > { %2315 = vmatpush.bf16.msra.mxu0 %v3385_v22 }
 0x55a   : > { %2316 = vmatpush.bf16.msra.mxu0 %v3384_v27 }
 0x55e   : > { %2317 = vmatpush.bf16.msra.mxu0 %v3383_v33 }
 0x59e   : > { %v1740_v21 = vpop.xlane.xlu0 %1739 }
 0x59f   : > { %v1743_v28 = vmul.f32 %v1740_v21, %v3901_v0  ;;  %v3411_v21 = vld [vmem:[#allocation7 + $0xe0] sm:$0xff] }
 0x5a0   : > { %2355 = vmatpush.bf16.msra.mxu3 %v3411_v21 }
 0x5a1   : > { %v1745_v41 = vadd.f32 1e-05, %v1743_v28  ;;  %v3392_v28 = vld [vmem:[#allocation7 + $0x48] sm:$0xff] }
 0x5a2   : > { %2330 = vmatpush.bf16.msra.mxu1 %v3392_v28 }
 0x5a3   : > { %3506 = vrsqrt.f32 %v1745_v41  ;;  %vm1753_vm14 = vweird.f32 %v1745_v41 }
 0x5a4   : > { %2356 = vmatpush.bf16.msra.mxu3 %v3410_v26 }
 0x5a6   : > { %v1742_v46 = vpop.xlane.xlu1 %1741  ;;  %2331 = vmatpush.bf16.msra.mxu1 %v3391_v34 }
 0x5a7   : > { %v1744_v19 = vmul.f32 %v1742_v46, %v3901_v0 }
 0x5a8   : > { %2357 = vmatpush.bf16.msra.mxu3 %v3409_v32 }
 0x5a9   : > { %v3507_v51 = vpop.eup %3506  ;;  %v1746_v52 = vadd.f32 1e-05, %v1744_v19 }
 0x5aa   : > { %v1748_v30 = vmul.f32 %v3507_v51, %v1745_v41  ;;  %vm1754_vm13 = vweird.f32 %v3507_v51 }
 0x5ab   : > { %3508 = vrsqrt.f32 %v1746_v52  ;;  %vm1755_vm15 = vmor %vm1753_vm14, %vm1754_vm13  ;;  %vm1763_vm1 = vweird.f32 %v1746_v52 }
 0x5ac   : > { %v1749_v54 = vmul.f32 %v3507_v51, %v1748_v30  ;;  %2358 = vmatpush.bf16.msra.mxu3 %v3408_v36 }
 0x5ae   : > { %v1750_v58 = vmul.f32 0.5, %v1749_v54 }
 0x5b0   : > { %v1751_v61 = vsub.f32 1.5, %v1750_v58  ;;  %2359 = vmatpush.bf16.msra.mxu3 %v3407_v38 }
 0x5b1   : > { %v3509_v2 = vpop.eup %3508 }
 0x5b2   : > { %v1752_v3 = vmul.f32 %v3507_v51, %v1751_v61  ;;  %v1758_v4 = vmul.f32 %v3509_v2, %v1746_v52  ;;  %vm1764_vm0 = vweird.f32 %v3509_v2  ;;  %v1817_v52 = vperm.slane %v1812_v40, 3 }
 0x5b3   : > { %vm1765_vm2 = vmor %vm1763_vm1, %vm1764_vm0 }
 0x5b4   : > { %v1759_v5 = vmul.f32 %v3509_v2, %v1758_v4  ;;  %v1756_v6 = vsel %vm1755_vm15, %v3507_v51, %v1752_v3  ;;  %v1816_v51 = vperm.slane %v1812_v40, 2 }
 0x5b5   : > { %v1767_v8 = vmul.f32 %v1756_v6, %v3904_v60 }
 0x5b6   : > { %v1760_v7 = vmul.f32 0.5, %v1759_v5 }
 0x5b7   : > { %v1772_v13 = vmul.f32 %v3467_v9, %v1767_v8  ;;  %v3469_v8 = vld [vmem:[%s3966_s12] ss:$0 sm:$0xff] }
 0x5b8   : > { %v1761_v1 = vsub.f32 1.5, %v1760_v7 }
 0x5b9   : > { %v3923_v16 = vadd.f32 %v3468_v14, %v1772_v13 }
 0x5ba   : > { %v1762_v10 = vmul.f32 %v3509_v2, %v1761_v1 }
 0x5bc   : > { %v1766_v11 = vsel %vm1765_vm2, %v3509_v2, %v1762_v10 }
 0x5bd   : > { %v1768_v12 = vmul.f32 %v1766_v11, %v3909_v63  ;;  %v3403_v63 = vld [vmem:[#allocation7 + $0xa0] sm:$0xff] }
 0x5be   : > { %2341 = vmatpush.bf16.msra.mxu2 %v3403_v63 }
 0x5bf   : > { %v1773_v15 = vmul.f32 %v3467_v9, %v1768_v12 }
 0x5c1   : > { %v3925_v17 = vadd.f32 %v3468_v14, %v1773_v15 }
 0x5c2   : > { %2342 = vmatpush.bf16.msra.mxu2 %v3402_v24 }
 0x5c3   : > { %v1779_v60 = vpack.c.bf16 %v3925_v17, %v3923_v16 }
 0x5c5   : > { %1990 = vmatmul.bf16.vlgmr.msrb.gmra.mxu0 %v1779_v60  ;;  %2004 = vmatmul.bf16.vlgmr.msrb.gmra.mxu1 %v1779_v60 }
 0x5c6   : > { %2018 = vmatmul.bf16.vlgmr.msrb.gmra.mxu2 %v1779_v60  ;;  %2032 = vmatmul.bf16.vlgmr.msrb.gmra.mxu3 %v1779_v60 }
 0x5c7   : > { %2343 = vmatpush.bf16.msra.mxu2 %v3401_v29 }
 0x5cb   : > { %2344 = vmatpush.bf16.msra.mxu2 %v3400_v45 }
 0x5cf   : > { %2345 = vmatpush.bf16.msra.mxu2 %v3399_v18 }
 0x642   : > { %v1991_v41 = vpop.f32.mrf.mxu0  ;;  %v2005_v42 = vpop.f32.mrf.mxu1 }
 0x643   : > { %v1992_v46 = vadd.f32 %v1991_v41, %v1814_v43  ;;  %v2006_v47 = vadd.f32 %v2005_v42, %v1815_v25 }
 0x645   : > { %v2038_v35 = vmax.f32 %v1992_v46, 0.0  ;;  %v2039_v53 = vmax.f32 %v2006_v47, 0.0 }
 0x649   : > { %v2019_v48 = vpop.f32.mrf.mxu2  ;;  %v2033_v19 = vpop.f32.mrf.mxu3 }
 0x64a   : > { %v1993_v44 = vpop.f32.mrf.mxu0  ;;  %v2007_v31 = vpop.f32.mrf.mxu1  ;;  %v2020_v56 = vadd.f32 %v2019_v48, %v1816_v51  ;;  %v2034_v57 = vadd.f32 %v2033_v19, %v1817_v52 }
 0x64b   : > { %v1994_v49 = vadd.f32 %v1993_v44, %v1814_v43  ;;  %v2008_v50 = vadd.f32 %v2007_v31, %v1815_v25 }
 0x64c   : > { %v2040_v2 = vmax.f32 %v2020_v56, 0.0  ;;  %v2041_v3 = vmax.f32 %v2034_v57, 0.0 }
 0x64d   : > { %v2042_v30 = vmax.f32 %v1994_v49, 0.0  ;;  %v2043_v54 = vmax.f32 %v2008_v50, 0.0  ;;  %v3470_v49 = vld [vmem:[%s3961_s7] ss:$0 sm:$0xff] }
 0x64f   : > { %v2046_v37 = vpack.c.bf16 %v2042_v30, %v2038_v35  ;;  %v2047_v55 = vpack.c.bf16 %v2043_v54, %v2039_v53 }
 0x651   : > { %v2021_v58 = vpop.f32.mrf.mxu2  ;;  %v2035_v61 = vpop.f32.mrf.mxu3  ;;  %2318 = vmatmul.bf16.vlgmr.msra.gmra.mxu0 %v2046_v37  ;;  %2332 = vmatmul.bf16.vlgmr.msra.gmra.mxu1 %v2047_v55 }
 0x652   : > { %v2022_v39 = vadd.f32 %v2021_v58, %v1816_v51  ;;  %v2036_v62 = vadd.f32 %v2035_v61, %v1817_v52  ;;  %v3471_v51 = vld [vmem:[%s3962_s8] ss:$0 sm:$0xff] }
 0x654   : > { %v2044_v4 = vmax.f32 %v2022_v39, 0.0  ;;  %v2045_v5 = vmax.f32 %v2036_v62, 0.0 }
 0x656   : > { %v2048_v6 = vpack.c.bf16 %v2044_v4, %v2040_v2  ;;  %v2049_v7 = vpack.c.bf16 %v2045_v5, %v2041_v3 }
 0x658   : > { %2346 = vmatmul.bf16.vlgmr.msra.gmra.mxu2 %v2048_v6  ;;  %2360 = vmatmul.bf16.vlgmr.msra.gmra.mxu3 %v2049_v7 }
 0x6ce   : > { %v2319_v1 = vpop.f32.mrf.mxu0  ;;  %v2333_v10 = vpop.f32.mrf.mxu1 }
 0x6cf   : > { %v2320_v9 = vadd.f32 %v3469_v8, %v2319_v1 }
 0x6d1   : > { %v2334_v11 = vadd.f32 %v2333_v10, %v2320_v9 }
 0x6d6   : > { %v2321_v12 = vpop.f32.mrf.mxu0  ;;  %v2335_v63 = vpop.f32.mrf.mxu1 }
 0x6d7   : > { %v2322_v60 = vadd.f32 %v3469_v8, %v2321_v12 }
 0x6d9   : > { %v2336_v21 = vadd.f32 %v2335_v63, %v2322_v60 }
 0x6db   : > { %v2347_v13 = vpop.f32.mrf.mxu2  ;;  %v2361_v14 = vpop.f32.mrf.mxu3 }
 0x6dc   : > { %v2348_v15 = vadd.f32 %v2347_v13, %v2334_v11 }
 0x6de   : > { %v2362_v20 = vadd.f32 %v2361_v14, %v2348_v15 }
 0x6e0   : > { %v2366_v59 = vadd.f32 %v2362_v20, %v3923_v16 }
 0x6e2   : > { %2370 = vadd.xlane.f32.xlu2 %v2366_v59 }
 0x6e3   : > { %v2349_v22 = vpop.f32.mrf.mxu2  ;;  %v2363_v24 = vpop.f32.mrf.mxu3 }
 0x6e4   : > { %v2350_v23 = vadd.f32 %v2349_v22, %v2336_v21 }
 0x6e6   : > { %v2364_v26 = vadd.f32 %v2363_v24, %v2350_v23 }
 0x6e8   : > { %v2367_v27 = vadd.f32 %v2364_v26, %v3925_v17 }
 0x6ea   : > { %2372 = vadd.xlane.f32.xlu0 %v2367_v27 }
 0x755   : > { %v2371_v28 = vpop.xlane.xlu2 %2370 }
 0x756   : > { %v2374_v29 = vmul.f32 %v2371_v28, %v3901_v0 }
 0x758   : > { %v2376_v32 = vsub.f32 %v2366_v59, %v2374_v29 }
 0x75a   : > { %v2378_v33 = vmul.f32 %v2376_v32, %v2376_v32 }
 0x75c   : > { %2380 = vadd.xlane.f32.xlu1 %v2378_v33 }
 0x75d   : > { %v2373_v34 = vpop.xlane.xlu0 %2372 }
 0x75e   : > { %v2375_v45 = vmul.f32 %v2373_v34, %v3901_v0 }
 0x760   : > { %v2377_v16 = vsub.f32 %v2367_v27, %v2375_v45 }
 0x762   : > { %v2379_v36 = vmul.f32 %v2377_v16, %v2377_v16 }
 0x764   : > { %2382 = vadd.xlane.f32.xlu2 %v2379_v36 }
 0x7cf   : > { %v2381_v18 = vpop.xlane.xlu1 %2380 }
 0x7d0   : > { %v2384_v38 = vmul.f32 %v2381_v18, %v3901_v0 }
 0x7d2   : > { %v2386_v40 = vadd.f32 1e-05, %v2384_v38 }
 0x7d4   : > { %3510 = vrsqrt.f32 %v2386_v40  ;;  %vm2394_vm4 = vweird.f32 %v2386_v40 }
 0x7d7   : > { %v2383_v41 = vpop.xlane.xlu2 %2382 }
 0x7d8   : > { %v2385_v17 = vmul.f32 %v2383_v41, %v3901_v0 }
 0x7da   : > { %v3511_v42 = vpop.eup %3510  ;;  %v2387_v43 = vadd.f32 1e-05, %v2385_v17 }
 0x7db   : > { %v2389_v25 = vmul.f32 %v3511_v42, %v2386_v40  ;;  %vm2395_vm3 = vweird.f32 %v3511_v42 }
 0x7dc   : > { %3512 = vrsqrt.f32 %v2387_v43  ;;  %vm2396_vm5 = vmor %vm2394_vm4, %vm2395_vm3  ;;  %vm2404_vm7 = vweird.f32 %v2387_v43 }
 0x7dd   : > { %v2390_v46 = vmul.f32 %v3511_v42, %v2389_v25 }
 0x7df   : > { %v2391_v47 = vmul.f32 0.5, %v2390_v46 }
 0x7e1   : > { %v2392_v48 = vsub.f32 1.5, %v2391_v47 }
 0x7e2   : > { %v3513_v19 = vpop.eup %3512 }
 0x7e3   : > { %v2393_v44 = vmul.f32 %v3511_v42, %v2392_v48  ;;  %v2399_v31 = vmul.f32 %v3513_v19, %v2387_v43  ;;  %vm2405_vm6 = vweird.f32 %v3513_v19 }
 0x7e4   : > { %vm2406_vm8 = vmor %vm2404_vm7, %vm2405_vm6 }
 0x7e5   : > { %v2397_v50 = vsel %vm2396_vm5, %v3511_v42, %v2393_v44  ;;  %v2400_v0 = vmul.f32 %v3513_v19, %v2399_v31 }
 0x7e6   : > { %v2408_v52 = vmul.f32 %v2397_v50, %v2376_v32 }
 0x7e7   : > { %v2401_v35 = vmul.f32 0.5, %v2400_v0 }
 0x7e8   : > { %v2413_v53 = vmul.f32 %v3470_v49, %v2408_v52 }
 0x7e9   : > { %v2402_v30 = vsub.f32 1.5, %v2401_v35 }
 0x7ea   : > { %v2418_v54 = vadd.f32 %v3471_v51, %v2413_v53 }
 0x7eb   : > { %v2403_v37 = vmul.f32 %v3513_v19, %v2402_v30 }
 0x7ec   : > { %2420 = vst [vmem:[%s524_s29] sm:$0xff] %v2418_v54 }
 0x7ed   : > { %v2407_v55 = vsel %vm2406_vm8, %v3513_v19, %v2403_v37 }
 0x7ee   : > { %v2409_v56 = vmul.f32 %v2407_v55, %v2377_v16 }
 0x7f0   : > { %v2414_v57 = vmul.f32 %v3470_v49, %v2409_v56 }
 0x7f2   : > { %v2419_v58 = vadd.f32 %v3471_v51, %v2414_v57 }
 0x7f4   : > { %2421 = vst [vmem:[%s524_s29 + $0x8] sm:$0xff] %v2419_v58 }
 0x7f5 PF: > { %s3976_s24 = sld [smem:[#allocation10_spill]] }
 0x7fb   : > { %s25_s25 = sadd.s32 1, %s3976_s24  }
 0x7fc   : > { %p22_p7 = scmp.ge.s32.totalorder %s25_s25, 4  }
 0x7fe   :  { %24 = sbr.rel (!%p22_p7) target bundleno = 5 (0x5), region = 132 }
 0x803   :  { %2443 = vsyncpa [#allocation4], 1 }
 0x804   :  { %2445 = vsyncpa [#allocation4 + $0x1], 1 }
 0x805   :  { %2446 = vsyncpa [#allocation6], 1 }

</bundles_post_ra>
